<compile_context>
chip_gen: v7x
topology: tpu7x:2x2x1
jax: 0.10.0
libtpu: 0.0.40
codegen_flags: <defaults>
</compile_context>

<pallas_src>
import jax
import jax.numpy as jnp
from jax.experimental import pallas as pl
from jax.experimental.pallas import tpu as pltpu

# ---------------- model dimensions (small, consistent with the forward) -------
B = 2            # real batch
BPAD = 8         # sublane-padded batch used inside the kernel
T_HIST = 8       # max_src_length (dialogue history)
T_Q = 8          # src_q length
EMB = 32         # word embedding dim
HID = 32         # encoder / guesser / qgen hidden dim
VIS = 64         # ResNet avg-pool visual feature dim (toy size)
N_OBJ = 20       # objects per image (Bx20)
SPATIAL = 8      # spatial feature dim (Bx20x8)
CAT_EMB = 16     # object-category embedding dim
N_CAT = 90       # number of object categories
WORD_VOCAB = 128 # history / src_q vocabulary
QVOCAB = 64      # qgen output vocabulary (logical)
QV_PAD = 128     # lane-dense padded qgen vocab width
SLAB = 128       # lane-dense packed (enc | decider | guesser) output width

VMEM = pltpu.MemorySpace.VMEM


def _vmem(n):
    return [pl.BlockSpec(memory_space=VMEM) for _ in range(n)]


# ---------------------------- in-kernel helpers --------------------------------
def _one_hot(ids_2d, n, dtype=jnp.float32):
    """ids_2d: (R, 1) int32 -> (R, n) one-hot (MXU-friendly gather)."""
    r = ids_2d.shape[0]
    iota = jax.lax.broadcasted_iota(jnp.int32, (r, n), 1)
    return (iota == ids_2d).astype(dtype)


def _lstm_unrolled(x_proj_tm, w_hh, h, c, n_steps, bk, hdim, lens=None, hs_ref=None):
    """Run an unrolled LSTM.

    x_proj_tm: (n_steps*bk, 4*hdim) time-major, pre-projected inputs (x @ W_ih + b);
    the input projection is hoisted out of the recurrence so each step only does the
    h @ W_hh matmul plus gate nonlinearities. bk == 8, so every per-step slice/store
    below is a statically aligned full-sublane-tile access (offset t*8).
    Gate activations are computed on the whole (bk, 4H) vreg: one sigmoid + one tanh
    EUP push per step; i/f/o come from the sigmoid slab, g from the tanh slab.
    If `lens` (bk,1) int32 is given, (h, c) are frozen via jnp.where once t >= len
    (packed-sequence final-hidden semantics). If `hs_ref` is given, per-step h is
    stored there.
    """
    for t in range(n_steps):
        row0 = t * bk  # static, multiple of 8 -> aligned sublane tile
        gates = x_proj_tm[row0:row0 + bk, :] + jnp.dot(
            h, w_hh, preferred_element_type=jnp.float32)
        sig = jax.nn.sigmoid(gates)
        tnh = jnp.tanh(gates)
        i = sig[:, 0 * hdim:1 * hdim]
        f = sig[:, 1 * hdim:2 * hdim]
        g = tnh[:, 2 * hdim:3 * hdim]
        o = sig[:, 3 * hdim:4 * hdim]
        c_new = f * c + i * g
        h_new = o * jnp.tanh(c_new)
        if lens is not None:
            keep = lens > t                       # (bk, 1) bool, broadcasts
            h = jnp.where(keep, h_new, h)
            c = jnp.where(keep, c_new, c)
        else:
            h, c = h_new, c_new
        if hs_ref is not None:
            hs_ref[row0:row0 + bk, :] = h
    return h, c


# ---------------------------- fused Ensemble kernel -----------------------------
def ensemble_kernel(hist_ids_ref, hist_len_ref, srcq_ids_ref, obj_ids_ref,
                    spat_ref, vis_ref, wemb_ref, cemb_ref,
                    e_wih_ref, e_whh_ref, e_b_ref, e_wfh_ref, e_wfv_ref, e_bf_ref,
                    d_w1_ref, d_b1_ref, d_w2_ref, d_b2_ref,
                    g_w1_ref, g_b1_ref, g_w2_ref, g_b2_ref,
                    q_wh0e_ref, q_wh0v_ref, q_bh0_ref,
                    q_wih_ref, q_whh_ref, q_b_ref, q_wv_ref, q_bv_ref,
                    out_main_ref, out_qgen_ref, hs_ref):
    f32 = jnp.float32
    bf16 = jnp.bfloat16
    bk = hist_len_ref.shape[0]                 # padded batch (8)
    hdim = e_whh_ref.shape[0]
    t_h = hist_ids_ref.shape[0] // bk
    t_q = srcq_ids_ref.shape[0] // bk
    n_obj = N_OBJ                              # objects per (real) batch row
    b_real = obj_ids_ref.shape[0] // n_obj     # real batch owning object blocks
    n_cat = cemb_ref.shape[0]
    cat_dim = cemb_ref.shape[1]
    vocab = wemb_ref.shape[0]

    vis = vis_ref[...]
    wemb = wemb_ref[...]                       # bf16 table

    # ---------------- Encoder: LSTM over history, length-masked ----------------
    hist_emb = jnp.dot(_one_hot(hist_ids_ref[...], vocab, bf16), wemb,
                       preferred_element_type=f32).astype(bf16)        # (t_h*bk, E)
    e_xp = jnp.dot(hist_emb, e_wih_ref[...],
                   preferred_element_type=f32) + e_b_ref[...]          # (t_h*bk, 4H)
    h0 = jnp.zeros((bk, hdim), f32)
    c0 = jnp.zeros((bk, hdim), f32)
    h_enc, _ = _lstm_unrolled(e_xp, e_whh_ref[...], h0, c0, t_h, bk, hdim,
                              lens=hist_len_ref[...])
    enc = jnp.tanh(jnp.dot(h_enc, e_wfh_ref[...], preferred_element_type=f32)
                   + jnp.dot(vis, e_wfv_ref[...], preferred_element_type=f32)
                   + e_bf_ref[...])                                    # (bk, H)

    # ---------------- Decider ---------------------------------------------------
    dh = jnp.maximum(jnp.dot(enc, d_w1_ref[...], preferred_element_type=f32)
                     + d_b1_ref[...], 0.0)
    dec = jnp.dot(dh, d_w2_ref[...], preferred_element_type=f32) + d_b2_ref[...]  # (bk, 2)

    # ---------------- Guesser: flattened per-object MLP -------------------------
    cat_e = jnp.dot(_one_hot(obj_ids_ref[...], n_cat), cemb_ref[...],
                    preferred_element_type=f32)                        # (b_real*n_obj, cat)
    # [cat ; spatial] @ W1 computed as split-weight matmuls (no in-kernel concat).
    g_w1 = g_w1_ref[...]
    g1 = jnp.maximum(
        jnp.dot(cat_e, g_w1[:cat_dim, :], preferred_element_type=f32)
        + jnp.dot(spat_ref[...], g_w1[cat_dim:, :], preferred_element_type=f32)
        + g_b1_ref[...], 0.0)                                          # (b_real*n_obj, H)
    obj_emb = (jnp.dot(g1, g_w2_ref[...], preferred_element_type=f32)
               + g_b2_ref[...])                                        # (b_real*n_obj, H)

    # scores_all[b, r] = <enc[b], obj_emb[r]>; contraction on the trailing dim of both
    # operands (no XLU transpose of obj_emb before the MXU). Batch b owns rows
    # [b*n_obj, (b+1)*n_obj); rows >= b_real are dead padding and masked to zero.
    scores_all = jax.lax.dot_general(
        enc, obj_emb, (((1,), (1,)), ((), ())),
        preferred_element_type=f32)                                    # (bk, b_real*n_obj)
    r_total = b_real * n_obj
    col = jax.lax.broadcasted_iota(jnp.int32, (bk, r_total), 1)
    row = jax.lax.broadcasted_iota(jnp.int32, (bk, r_total), 0)
    own = ((col >= row * n_obj) & (col < (row + 1) * n_obj)).astype(f32)
    masked = scores_all * own                                          # block-diagonal
    scores = masked[:, 0:n_obj]
    for bb in range(1, b_real):                                        # fold lane blocks
        scores = scores + masked[:, bb * n_obj:(bb + 1) * n_obj]       # (bk, n_obj)

    m = jnp.max(scores, axis=-1, keepdims=True)
    lse = jnp.log(jnp.sum(jnp.exp(scores - m), axis=-1, keepdims=True)) + m
    guess = scores - lse                                               # log-probs

    # ------------- pack lane-dense (bk, 128) output slab: ONE unmasked store -----
    pad_w = out_main_ref.shape[1] - (hdim + 2 + n_obj)
    slab = jnp.concatenate(
        [enc, dec, guess, jnp.zeros((bk, pad_w), f32)], axis=-1)       # (bk, 128)
    out_main_ref[...] = slab

    # ---------------- QGen: decoder LSTM + single fused vocab projection --------
    sq_emb = jnp.dot(_one_hot(srcq_ids_ref[...], vocab, bf16), wemb,
                     preferred_element_type=f32).astype(bf16)          # (t_q*bk, E)
    q_xp = jnp.dot(sq_emb, q_wih_ref[...],
                   preferred_element_type=f32) + q_b_ref[...]          # (t_q*bk, 4H)
    qh0 = jnp.tanh(jnp.dot(enc, q_wh0e_ref[...], preferred_element_type=f32)
                   + jnp.dot(vis, q_wh0v_ref[...], preferred_element_type=f32)
                   + q_bh0_ref[...])
    qc0 = jnp.zeros((bk, hdim), f32)
    _lstm_unrolled(q_xp, q_whh_ref[...], qh0, qc0, t_q, bk, hdim, hs_ref=hs_ref)
    # one (t_q*bk, H) x (H, 128) bf16 matmul + one unmasked lane-dense store
    out_qgen_ref[...] = (jnp.dot(hs_ref[...].astype(bf16), q_wv_ref[...],
                                 preferred_element_type=f32) + q_bv_ref[...])


# ---------------------------- parameters ---------------------------------------
def init_params(key):
    keys = iter(jax.random.split(key, 32))

    def w(shape, scale=0.08):
        return scale * jax.random.normal(next(keys), shape, dtype=jnp.float32)

    def z(*shape):
        return jnp.zeros(shape, jnp.float32)

    return {
        'word_emb': w((WORD_VOCAB, EMB)),
        'cat_emb': w((N_CAT, CAT_EMB)),
        # Encoder: LSTM + visual fusion
        'enc_wih': w((EMB, 4 * HID)), 'enc_whh': w((HID, 4 * HID)),
        'enc_b': z(1, 4 * HID),
        'enc_wfh': w((HID, HID)), 'enc_wfv': w((VIS, HID)), 'enc_bf': z(1, HID),
        # Decider: 2-layer MLP -> 2 logits
        'dec_w1': w((HID, HID)), 'dec_b1': z(1, HID),
        'dec_w2': w((HID, 2)), 'dec_b2': z(1, 2),
        # Guesser: per-object MLP
        'gss_w1': w((CAT_EMB + SPATIAL, HID)), 'gss_b1': z(1, HID),
        'gss_w2': w((HID, HID)), 'gss_b2': z(1, HID),
        # QGen: decoder LSTM + vocab projection (stored lane-dense padded to 128;
        # the real vocabulary is the first QVOCAB columns)
        'qg_wh0e': w((HID, HID)), 'qg_wh0v': w((VIS, HID)), 'qg_bh0': z(1, HID),
        'qg_wih': w((EMB, 4 * HID)), 'qg_whh': w((HID, 4 * HID)),
        'qg_b': z(1, 4 * HID),
        'qg_wv_p': jnp.pad(w((HID, QVOCAB)), ((0, 0), (0, QV_PAD - QVOCAB))),
        'qg_bv_p': z(1, QV_PAD),
    }


# ---------------------------- fused forward (all heads) -------------------------
def ensemble_forward_all(params, history, history_len, visual_features,
                         src_q, spatials, objects):
    bk, t_h = history.shape
    t_q = src_q.shape[1]
    n_obj = objects.shape[1]
    bf16 = jnp.bfloat16

    # Pad batch to 8 sublanes and build time-major flattened index layouts so every
    # per-step kernel slice/store is a full aligned (8, lanes) sublane tile
    # (row = t*BPAD + b). Tiny int32/f32 glue, fused under jit. Padded rows carry
    # length 0 / zero features and are sliced off below.
    pad_b = BPAD - bk
    hist_p = jnp.pad(history.astype(jnp.int32), ((0, pad_b), (0, 0)))
    srcq_p = jnp.pad(src_q.astype(jnp.int32), ((0, pad_b), (0, 0)))
    hist_tm = hist_p.T.reshape(t_h * BPAD, 1)
    srcq_tm = srcq_p.T.reshape(t_q * BPAD, 1)
    hist_len = jnp.pad(history_len.reshape(bk, 1).astype(jnp.int32),
                       ((0, pad_b), (0, 0)))
    vis = jnp.pad(visual_features.astype(jnp.float32),
                  ((0, pad_b), (0, 0)))               # dropout(p=0.5): eval identity
    obj_flat = objects.reshape(bk * n_obj, 1).astype(jnp.int32)
    spat_flat = spatials.reshape(bk * n_obj, SPATIAL).astype(jnp.float32)

    out_main, out_q = pl.pallas_call(
        ensemble_kernel,
        out_shape=(jax.ShapeDtypeStruct((BPAD, SLAB), jnp.float32),
                   jax.ShapeDtypeStruct((t_q * BPAD, QV_PAD), jnp.float32)),
        in_specs=_vmem(30),
        out_specs=(pl.BlockSpec(memory_space=VMEM),
                   pl.BlockSpec(memory_space=VMEM)),
        scratch_shapes=[pltpu.VMEM((t_q * BPAD, HID), jnp.float32)],
    )(hist_tm, hist_len, srcq_tm, obj_flat, spat_flat, vis,
      params['word_emb'].astype(bf16), params['cat_emb'],
      params['enc_wih'].astype(bf16), params['enc_whh'], params['enc_b'],
      params['enc_wfh'], params['enc_wfv'], params['enc_bf'],
      params['dec_w1'], params['dec_b1'], params['dec_w2'], params['dec_b2'],
      params['gss_w1'], params['gss_b1'], params['gss_w2'], params['gss_b2'],
      params['qg_wh0e'], params['qg_wh0v'], params['qg_bh0'],
      params['qg_wih'].astype(bf16), params['qg_whh'], params['qg_b'],
      params['qg_wv_p'].astype(bf16), params['qg_bv_p'])

    # Unpack the lane-dense slabs and drop the padded batch rows (free layout
    # plumbing in the wrapper).
    enc_hidden = out_main[:bk, :HID]
    decider_out = out_main[:bk, HID:HID + 2]
    guesser_out = out_main[:bk, HID + 2:HID + 2 + n_obj]
    qgen_out = out_q.reshape(t_q, BPAD, QV_PAD)[:, :bk, :QVOCAB].transpose(1, 0, 2)
    return enc_hidden, decider_out, guesser_out, qgen_out


# ---------------------------- Ensemble.forward-compatible wrapper ---------------
def ensemble_forward(params, *, history, history_len, visual_features,
                     src_q=None, spatials=None, objects=None, mask_select=1):
    if mask_select == 2:
        # TODO(synk): Oracle branch depends on external config/Oracle model; not implemented.
        raise NotImplementedError("oracle branch (mask_select == 2) not implemented")
    if mask_select not in (0, 1):
        raise ValueError("mask_select must be 0, 1 or 2")

    bk = history.shape[0]
    if src_q is None:
        src_q = jnp.zeros((bk, T_Q), jnp.int32)
    if spatials is None:
        spatials = jnp.zeros((bk, N_OBJ, SPATIAL), jnp.float32)
    if objects is None:
        objects = jnp.zeros((bk, N_OBJ), jnp.int32)

    _, decider_out, guesser_out, qgen_out = ensemble_forward_all(
        params, history, history_len, visual_features, src_q, spatials, objects)
    if mask_select == 1:
        return decider_out, guesser_out
    return decider_out, qgen_out


# ---------------------------- main ----------------------------------------------
if __name__ == "__main__":
    root = jax.random.PRNGKey(0)
    k_par, k_hist, k_vis, k_spa, k_obj, k_src = jax.random.split(root, 6)

    params = init_params(k_par)

    history = jax.random.randint(k_hist, (B, T_HIST), 1, WORD_VOCAB, dtype=jnp.int32)
    history_len = jnp.array([[5], [T_HIST]], dtype=jnp.int32)           # (B, 1)
    visual_features = jax.random.normal(k_vis, (B, VIS), dtype=jnp.float32)
    spatials = jax.random.uniform(k_spa, (B, N_OBJ, SPATIAL), dtype=jnp.float32,
                                  minval=-1.0, maxval=1.0)
    objects = jax.random.randint(k_obj, (B, N_OBJ), 0, N_CAT, dtype=jnp.int32)
    src_q = jax.random.randint(k_src, (B, T_Q), 1, WORD_VOCAB, dtype=jnp.int32)

    # Single fused kernel launch; encoder/decider computed once and reused for both
    # mask_select branches.
    fwd = jax.jit(ensemble_forward_all)
    enc_hidden, decider_out, guesser_out, qgen_out = fwd(
        params, history, history_len, visual_features, src_q, spatials, objects)
    jax.block_until_ready((enc_hidden, decider_out, guesser_out, qgen_out))

    # Branch views equivalent to Ensemble.forward(mask_select=1 / 0):
    branch_guess = (decider_out, guesser_out)   # mask_select == 1
    branch_qgen = (decider_out, qgen_out)       # mask_select == 0

    assert enc_hidden.shape == (B, HID)
    assert decider_out.shape == (B, 2)
    assert guesser_out.shape == (B, N_OBJ)
    assert qgen_out.shape == (B, T_Q, QVOCAB)
    assert bool(jnp.all(jnp.isfinite(decider_out)))
    assert bool(jnp.all(jnp.isfinite(guesser_out)))
    assert bool(jnp.all(jnp.isfinite(qgen_out)))
    # guesser_out are log-probs over 20 objects -> rows sum to ~1 after exp
    assert bool(jnp.all(jnp.abs(jnp.sum(jnp.exp(guesser_out), axis=-1) - 1.0) < 1e-4))

    print("KERNEL_OK")
</pallas_src>

<mosaic_0001>
module attributes {stable_mosaic.version = 11 : i64} {
  func.func @ensemble_kernel(%arg0: memref<64x1xi32, #tpu.memory_space<vmem>>, %arg1: memref<8x1xi32, #tpu.memory_space<vmem>>, %arg2: memref<64x1xi32, #tpu.memory_space<vmem>>, %arg3: memref<40x1xi32, #tpu.memory_space<vmem>>, %arg4: memref<40x8xf32, #tpu.memory_space<vmem>>, %arg5: memref<8x64xf32, #tpu.memory_space<vmem>>, %arg6: memref<128x32xbf16, #tpu.memory_space<vmem>>, %arg7: memref<90x16xf32, #tpu.memory_space<vmem>>, %arg8: memref<32x128xbf16, #tpu.memory_space<vmem>>, %arg9: memref<32x128xf32, #tpu.memory_space<vmem>>, %arg10: memref<1x128xf32, #tpu.memory_space<vmem>>, %arg11: memref<32x32xf32, #tpu.memory_space<vmem>>, %arg12: memref<64x32xf32, #tpu.memory_space<vmem>>, %arg13: memref<1x32xf32, #tpu.memory_space<vmem>>, %arg14: memref<32x32xf32, #tpu.memory_space<vmem>>, %arg15: memref<1x32xf32, #tpu.memory_space<vmem>>, %arg16: memref<32x2xf32, #tpu.memory_space<vmem>>, %arg17: memref<1x2xf32, #tpu.memory_space<vmem>>, %arg18: memref<24x32xf32, #tpu.memory_space<vmem>>, %arg19: memref<1x32xf32, #tpu.memory_space<vmem>>, %arg20: memref<32x32xf32, #tpu.memory_space<vmem>>, %arg21: memref<1x32xf32, #tpu.memory_space<vmem>>, %arg22: memref<32x32xf32, #tpu.memory_space<vmem>>, %arg23: memref<64x32xf32, #tpu.memory_space<vmem>>, %arg24: memref<1x32xf32, #tpu.memory_space<vmem>>, %arg25: memref<32x128xbf16, #tpu.memory_space<vmem>>, %arg26: memref<32x128xf32, #tpu.memory_space<vmem>>, %arg27: memref<1x128xf32, #tpu.memory_space<vmem>>, %arg28: memref<32x128xbf16, #tpu.memory_space<vmem>>, %arg29: memref<1x128xf32, #tpu.memory_space<vmem>>, %arg30: memref<8x128xf32, #tpu.memory_space<vmem>>, %arg31: memref<64x128xf32, #tpu.memory_space<vmem>>, %arg32: memref<64x32xf32, #tpu.memory_space<vmem>>) attributes {dimension_semantics = [], scalar_prefetch = 0 : i64, scratch_operands = 1 : i64, tpu.core_type = #tpu.core_type<tc>} {
    %c0 = arith.constant 0 : index
    %c0_0 = arith.constant 0 : index
    %0 = vector.load %arg5[%c0, %c0_0] : memref<8x64xf32, #tpu.memory_space<vmem>>, vector<8x64xf32>
    %c0_1 = arith.constant 0 : index
    %c0_2 = arith.constant 0 : index
    %1 = vector.load %arg6[%c0_1, %c0_2] : memref<128x32xbf16, #tpu.memory_space<vmem>>, vector<128x32xbf16>
    %c0_3 = arith.constant 0 : index
    %c0_4 = arith.constant 0 : index
    %2 = vector.load %arg0[%c0_3, %c0_4] : memref<64x1xi32, #tpu.memory_space<vmem>>, vector<64x1xi32>
    %3 = tpu.iota {dimensions = array<i32: 1>} : vector<64x128xi32>
    %4 = vector.broadcast %2 : vector<64x1xi32> to vector<64x128xi32>
    %5 = arith.cmpi eq, %3, %4 : vector<64x128xi32>
    %6 = arith.extui %5 : vector<64x128xi1> to vector<64x128xi32>
    %7 = arith.sitofp %6 : vector<64x128xi32> to vector<64x128xf32>
    %8 = arith.truncf %7 : vector<64x128xf32> to vector<64x128xbf16>
    %cst = arith.constant dense<0.000000e+00> : vector<64x32xf32>
    %9 = tpu.matmul %8, %1, %cst {dimension_numbers = #tpu.dot_dimension_numbers<[1], [0], [0], [1], [0, 0, 1, 1], [], []>} : vector<64x128xbf16>, vector<128x32xbf16>, vector<64x32xf32> -> vector<64x32xf32>
    %10 = arith.truncf %9 : vector<64x32xf32> to vector<64x32xbf16>
    %c0_5 = arith.constant 0 : index
    %c0_6 = arith.constant 0 : index
    %11 = vector.load %arg8[%c0_5, %c0_6] : memref<32x128xbf16, #tpu.memory_space<vmem>>, vector<32x128xbf16>
    %cst_7 = arith.constant dense<0.000000e+00> : vector<64x128xf32>
    %12 = tpu.matmul %10, %11, %cst_7 {dimension_numbers = #tpu.dot_dimension_numbers<[1], [0], [0], [1], [0, 0, 1, 1], [], []>} : vector<64x32xbf16>, vector<32x128xbf16>, vector<64x128xf32> -> vector<64x128xf32>
    %c0_8 = arith.constant 0 : index
    %c0_9 = arith.constant 0 : index
    %13 = vector.load %arg10[%c0_8, %c0_9] : memref<1x128xf32, #tpu.memory_space<vmem>>, vector<1x128xf32>
    %14 = vector.broadcast %13 : vector<1x128xf32> to vector<64x128xf32>
    %15 = arith.addf %12, %14 : vector<64x128xf32>
    %cst_10 = arith.constant 0.000000e+00 : f32
    %16 = vector.broadcast %cst_10 : f32 to vector<8x32xf32>
    %cst_11 = arith.constant 0.000000e+00 : f32
    %17 = vector.broadcast %cst_11 : f32 to vector<8x32xf32>
    %c0_12 = arith.constant 0 : index
    %c0_13 = arith.constant 0 : index
    %18 = vector.load %arg9[%c0_12, %c0_13] : memref<32x128xf32, #tpu.memory_space<vmem>>, vector<32x128xf32>
    %c0_14 = arith.constant 0 : index
    %c0_15 = arith.constant 0 : index
    %19 = vector.load %arg1[%c0_14, %c0_15] : memref<8x1xi32, #tpu.memory_space<vmem>>, vector<8x1xi32>
    %20 = vector.extract_strided_slice %15 {offsets = [0, 0], sizes = [8, 128], strides = [1, 1]} : vector<64x128xf32> to vector<8x128xf32>
    %cst_16 = arith.constant dense<0.000000e+00> : vector<8x128xf32>
    %21 = tpu.matmul %16, %18, %cst_16 {dimension_numbers = #tpu.dot_dimension_numbers<[1], [0], [0], [1], [0, 0, 1, 1], [], []>} : vector<8x32xf32>, vector<32x128xf32>, vector<8x128xf32> -> vector<8x128xf32>
    %22 = arith.addf %20, %21 : vector<8x128xf32>
    %23 = arith.negf %22 : vector<8x128xf32>
    %24 = math.exp %23 : vector<8x128xf32>
    %cst_17 = arith.constant 1.000000e+00 : f32
    %25 = vector.broadcast %cst_17 : f32 to vector<8x128xf32>
    %26 = arith.addf %25, %24 : vector<8x128xf32>
    %27 = arith.divf %25, %26 : vector<8x128xf32>
    %28 = math.tanh %22 : vector<8x128xf32>
    %29 = vector.extract_strided_slice %27 {offsets = [0, 0], sizes = [8, 32], strides = [1, 1]} : vector<8x128xf32> to vector<8x32xf32>
    %30 = vector.extract_strided_slice %27 {offsets = [0, 32], sizes = [8, 32], strides = [1, 1]} : vector<8x128xf32> to vector<8x32xf32>
    %31 = vector.extract_strided_slice %28 {offsets = [0, 64], sizes = [8, 32], strides = [1, 1]} : vector<8x128xf32> to vector<8x32xf32>
    %32 = vector.extract_strided_slice %27 {offsets = [0, 96], sizes = [8, 32], strides = [1, 1]} : vector<8x128xf32> to vector<8x32xf32>
    %33 = arith.mulf %30, %17 : vector<8x32xf32>
    %34 = arith.mulf %29, %31 : vector<8x32xf32>
    %35 = arith.addf %33, %34 : vector<8x32xf32>
    %36 = math.tanh %35 : vector<8x32xf32>
    %37 = arith.mulf %32, %36 : vector<8x32xf32>
    %c0_i32 = arith.constant 0 : i32
    %38 = vector.broadcast %c0_i32 : i32 to vector<8x1xi32>
    %39 = arith.cmpi sgt, %19, %38 : vector<8x1xi32>
    %40 = vector.shape_cast %39 : vector<8x1xi1> to vector<8x1xi1>
    %41 = vector.broadcast %40 : vector<8x1xi1> to vector<8x32xi1>
    %42 = arith.select %41, %37, %16 : vector<8x32xi1>, vector<8x32xf32>
    %43 = vector.shape_cast %39 : vector<8x1xi1> to vector<8x1xi1>
    %44 = vector.broadcast %43 : vector<8x1xi1> to vector<8x32xi1>
    %45 = arith.select %44, %35, %17 : vector<8x32xi1>, vector<8x32xf32>
    %46 = vector.extract_strided_slice %15 {offsets = [8, 0], sizes = [8, 128], strides = [1, 1]} : vector<64x128xf32> to vector<8x128xf32>
    %cst_18 = arith.constant dense<0.000000e+00> : vector<8x128xf32>
    %47 = tpu.matmul %42, %18, %cst_18 {dimension_numbers = #tpu.dot_dimension_numbers<[1], [0], [0], [1], [0, 0, 1, 1], [], []>} : vector<8x32xf32>, vector<32x128xf32>, vector<8x128xf32> -> vector<8x128xf32>
    %48 = arith.addf %46, %47 : vector<8x128xf32>
    %49 = arith.negf %48 : vector<8x128xf32>
    %50 = math.exp %49 : vector<8x128xf32>
    %cst_19 = arith.constant 1.000000e+00 : f32
    %51 = vector.broadcast %cst_19 : f32 to vector<8x128xf32>
    %52 = arith.addf %51, %50 : vector<8x128xf32>
    %53 = arith.divf %51, %52 : vector<8x128xf32>
    %54 = math.tanh %48 : vector<8x128xf32>
    %55 = vector.extract_strided_slice %53 {offsets = [0, 0], sizes = [8, 32], strides = [1, 1]} : vector<8x128xf32> to vector<8x32xf32>
    %56 = vector.extract_strided_slice %53 {offsets = [0, 32], sizes = [8, 32], strides = [1, 1]} : vector<8x128xf32> to vector<8x32xf32>
    %57 = vector.extract_strided_slice %54 {offsets = [0, 64], sizes = [8, 32], strides = [1, 1]} : vector<8x128xf32> to vector<8x32xf32>
    %58 = vector.extract_strided_slice %53 {offsets = [0, 96], sizes = [8, 32], strides = [1, 1]} : vector<8x128xf32> to vector<8x32xf32>
    %59 = arith.mulf %56, %45 : vector<8x32xf32>
    %60 = arith.mulf %55, %57 : vector<8x32xf32>
    %61 = arith.addf %59, %60 : vector<8x32xf32>
    %62 = math.tanh %61 : vector<8x32xf32>
    %63 = arith.mulf %58, %62 : vector<8x32xf32>
    %c1_i32 = arith.constant 1 : i32
    %64 = vector.broadcast %c1_i32 : i32 to vector<8x1xi32>
    %65 = arith.cmpi sgt, %19, %64 : vector<8x1xi32>
    %66 = vector.shape_cast %65 : vector<8x1xi1> to vector<8x1xi1>
    %67 = vector.broadcast %66 : vector<8x1xi1> to vector<8x32xi1>
    %68 = arith.select %67, %63, %42 : vector<8x32xi1>, vector<8x32xf32>
    %69 = vector.shape_cast %65 : vector<8x1xi1> to vector<8x1xi1>
    %70 = vector.broadcast %69 : vector<8x1xi1> to vector<8x32xi1>
    %71 = arith.select %70, %61, %45 : vector<8x32xi1>, vector<8x32xf32>
    %72 = vector.extract_strided_slice %15 {offsets = [16, 0], sizes = [8, 128], strides = [1, 1]} : vector<64x128xf32> to vector<8x128xf32>
    %cst_20 = arith.constant dense<0.000000e+00> : vector<8x128xf32>
    %73 = tpu.matmul %68, %18, %cst_20 {dimension_numbers = #tpu.dot_dimension_numbers<[1], [0], [0], [1], [0, 0, 1, 1], [], []>} : vector<8x32xf32>, vector<32x128xf32>, vector<8x128xf32> -> vector<8x128xf32>
    %74 = arith.addf %72, %73 : vector<8x128xf32>
    %75 = arith.negf %74 : vector<8x128xf32>
    %76 = math.exp %75 : vector<8x128xf32>
    %cst_21 = arith.constant 1.000000e+00 : f32
    %77 = vector.broadcast %cst_21 : f32 to vector<8x128xf32>
    %78 = arith.addf %77, %76 : vector<8x128xf32>
    %79 = arith.divf %77, %78 : vector<8x128xf32>
    %80 = math.tanh %74 : vector<8x128xf32>
    %81 = vector.extract_strided_slice %79 {offsets = [0, 0], sizes = [8, 32], strides = [1, 1]} : vector<8x128xf32> to vector<8x32xf32>
    %82 = vector.extract_strided_slice %79 {offsets = [0, 32], sizes = [8, 32], strides = [1, 1]} : vector<8x128xf32> to vector<8x32xf32>
    %83 = vector.extract_strided_slice %80 {offsets = [0, 64], sizes = [8, 32], strides = [1, 1]} : vector<8x128xf32> to vector<8x32xf32>
    %84 = vector.extract_strided_slice %79 {offsets = [0, 96], sizes = [8, 32], strides = [1, 1]} : vector<8x128xf32> to vector<8x32xf32>
    %85 = arith.mulf %82, %71 : vector<8x32xf32>
    %86 = arith.mulf %81, %83 : vector<8x32xf32>
    %87 = arith.addf %85, %86 : vector<8x32xf32>
    %88 = math.tanh %87 : vector<8x32xf32>
    %89 = arith.mulf %84, %88 : vector<8x32xf32>
    %c2_i32 = arith.constant 2 : i32
    %90 = vector.broadcast %c2_i32 : i32 to vector<8x1xi32>
    %91 = arith.cmpi sgt, %19, %90 : vector<8x1xi32>
    %92 = vector.shape_cast %91 : vector<8x1xi1> to vector<8x1xi1>
    %93 = vector.broadcast %92 : vector<8x1xi1> to vector<8x32xi1>
    %94 = arith.select %93, %89, %68 : vector<8x32xi1>, vector<8x32xf32>
    %95 = vector.shape_cast %91 : vector<8x1xi1> to vector<8x1xi1>
    %96 = vector.broadcast %95 : vector<8x1xi1> to vector<8x32xi1>
    %97 = arith.select %96, %87, %71 : vector<8x32xi1>, vector<8x32xf32>
    %98 = vector.extract_strided_slice %15 {offsets = [24, 0], sizes = [8, 128], strides = [1, 1]} : vector<64x128xf32> to vector<8x128xf32>
    %cst_22 = arith.constant dense<0.000000e+00> : vector<8x128xf32>
    %99 = tpu.matmul %94, %18, %cst_22 {dimension_numbers = #tpu.dot_dimension_numbers<[1], [0], [0], [1], [0, 0, 1, 1], [], []>} : vector<8x32xf32>, vector<32x128xf32>, vector<8x128xf32> -> vector<8x128xf32>
    %100 = arith.addf %98, %99 : vector<8x128xf32>
    %101 = arith.negf %100 : vector<8x128xf32>
    %102 = math.exp %101 : vector<8x128xf32>
    %cst_23 = arith.constant 1.000000e+00 : f32
    %103 = vector.broadcast %cst_23 : f32 to vector<8x128xf32>
    %104 = arith.addf %103, %102 : vector<8x128xf32>
    %105 = arith.divf %103, %104 : vector<8x128xf32>
    %106 = math.tanh %100 : vector<8x128xf32>
    %107 = vector.extract_strided_slice %105 {offsets = [0, 0], sizes = [8, 32], strides = [1, 1]} : vector<8x128xf32> to vector<8x32xf32>
    %108 = vector.extract_strided_slice %105 {offsets = [0, 32], sizes = [8, 32], strides = [1, 1]} : vector<8x128xf32> to vector<8x32xf32>
    %109 = vector.extract_strided_slice %106 {offsets = [0, 64], sizes = [8, 32], strides = [1, 1]} : vector<8x128xf32> to vector<8x32xf32>
    %110 = vector.extract_strided_slice %105 {offsets = [0, 96], sizes = [8, 32], strides = [1, 1]} : vector<8x128xf32> to vector<8x32xf32>
    %111 = arith.mulf %108, %97 : vector<8x32xf32>
    %112 = arith.mulf %107, %109 : vector<8x32xf32>
    %113 = arith.addf %111, %112 : vector<8x32xf32>
    %114 = math.tanh %113 : vector<8x32xf32>
    %115 = arith.mulf %110, %114 : vector<8x32xf32>
    %c3_i32 = arith.constant 3 : i32
    %116 = vector.broadcast %c3_i32 : i32 to vector<8x1xi32>
    %117 = arith.cmpi sgt, %19, %116 : vector<8x1xi32>
    %118 = vector.shape_cast %117 : vector<8x1xi1> to vector<8x1xi1>
    %119 = vector.broadcast %118 : vector<8x1xi1> to vector<8x32xi1>
    %120 = arith.select %119, %115, %94 : vector<8x32xi1>, vector<8x32xf32>
    %121 = vector.shape_cast %117 : vector<8x1xi1> to vector<8x1xi1>
    %122 = vector.broadcast %121 : vector<8x1xi1> to vector<8x32xi1>
    %123 = arith.select %122, %113, %97 : vector<8x32xi1>, vector<8x32xf32>
    %124 = vector.extract_strided_slice %15 {offsets = [32, 0], sizes = [8, 128], strides = [1, 1]} : vector<64x128xf32> to vector<8x128xf32>
    %cst_24 = arith.constant dense<0.000000e+00> : vector<8x128xf32>
    %125 = tpu.matmul %120, %18, %cst_24 {dimension_numbers = #tpu.dot_dimension_numbers<[1], [0], [0], [1], [0, 0, 1, 1], [], []>} : vector<8x32xf32>, vector<32x128xf32>, vector<8x128xf32> -> vector<8x128xf32>
    %126 = arith.addf %124, %125 : vector<8x128xf32>
    %127 = arith.negf %126 : vector<8x128xf32>
    %128 = math.exp %127 : vector<8x128xf32>
    %cst_25 = arith.constant 1.000000e+00 : f32
    %129 = vector.broadcast %cst_25 : f32 to vector<8x128xf32>
    %130 = arith.addf %129, %128 : vector<8x128xf32>
    %131 = arith.divf %129, %130 : vector<8x128xf32>
    %132 = math.tanh %126 : vector<8x128xf32>
    %133 = vector.extract_strided_slice %131 {offsets = [0, 0], sizes = [8, 32], strides = [1, 1]} : vector<8x128xf32> to vector<8x32xf32>
    %134 = vector.extract_strided_slice %131 {offsets = [0, 32], sizes = [8, 32], strides = [1, 1]} : vector<8x128xf32> to vector<8x32xf32>
    %135 = vector.extract_strided_slice %132 {offsets = [0, 64], sizes = [8, 32], strides = [1, 1]} : vector<8x128xf32> to vector<8x32xf32>
    %136 = vector.extract_strided_slice %131 {offsets = [0, 96], sizes = [8, 32], strides = [1, 1]} : vector<8x128xf32> to vector<8x32xf32>
    %137 = arith.mulf %134, %123 : vector<8x32xf32>
    %138 = arith.mulf %133, %135 : vector<8x32xf32>
    %139 = arith.addf %137, %138 : vector<8x32xf32>
    %140 = math.tanh %139 : vector<8x32xf32>
    %141 = arith.mulf %136, %140 : vector<8x32xf32>
    %c4_i32 = arith.constant 4 : i32
    %142 = vector.broadcast %c4_i32 : i32 to vector<8x1xi32>
    %143 = arith.cmpi sgt, %19, %142 : vector<8x1xi32>
    %144 = vector.shape_cast %143 : vector<8x1xi1> to vector<8x1xi1>
    %145 = vector.broadcast %144 : vector<8x1xi1> to vector<8x32xi1>
    %146 = arith.select %145, %141, %120 : vector<8x32xi1>, vector<8x32xf32>
    %147 = vector.shape_cast %143 : vector<8x1xi1> to vector<8x1xi1>
    %148 = vector.broadcast %147 : vector<8x1xi1> to vector<8x32xi1>
    %149 = arith.select %148, %139, %123 : vector<8x32xi1>, vector<8x32xf32>
    %150 = vector.extract_strided_slice %15 {offsets = [40, 0], sizes = [8, 128], strides = [1, 1]} : vector<64x128xf32> to vector<8x128xf32>
    %cst_26 = arith.constant dense<0.000000e+00> : vector<8x128xf32>
    %151 = tpu.matmul %146, %18, %cst_26 {dimension_numbers = #tpu.dot_dimension_numbers<[1], [0], [0], [1], [0, 0, 1, 1], [], []>} : vector<8x32xf32>, vector<32x128xf32>, vector<8x128xf32> -> vector<8x128xf32>
    %152 = arith.addf %150, %151 : vector<8x128xf32>
    %153 = arith.negf %152 : vector<8x128xf32>
    %154 = math.exp %153 : vector<8x128xf32>
    %cst_27 = arith.constant 1.000000e+00 : f32
    %155 = vector.broadcast %cst_27 : f32 to vector<8x128xf32>
    %156 = arith.addf %155, %154 : vector<8x128xf32>
    %157 = arith.divf %155, %156 : vector<8x128xf32>
    %158 = math.tanh %152 : vector<8x128xf32>
    %159 = vector.extract_strided_slice %157 {offsets = [0, 0], sizes = [8, 32], strides = [1, 1]} : vector<8x128xf32> to vector<8x32xf32>
    %160 = vector.extract_strided_slice %157 {offsets = [0, 32], sizes = [8, 32], strides = [1, 1]} : vector<8x128xf32> to vector<8x32xf32>
    %161 = vector.extract_strided_slice %158 {offsets = [0, 64], sizes = [8, 32], strides = [1, 1]} : vector<8x128xf32> to vector<8x32xf32>
    %162 = vector.extract_strided_slice %157 {offsets = [0, 96], sizes = [8, 32], strides = [1, 1]} : vector<8x128xf32> to vector<8x32xf32>
    %163 = arith.mulf %160, %149 : vector<8x32xf32>
    %164 = arith.mulf %159, %161 : vector<8x32xf32>
    %165 = arith.addf %163, %164 : vector<8x32xf32>
    %166 = math.tanh %165 : vector<8x32xf32>
    %167 = arith.mulf %162, %166 : vector<8x32xf32>
    %c5_i32 = arith.constant 5 : i32
    %168 = vector.broadcast %c5_i32 : i32 to vector<8x1xi32>
    %169 = arith.cmpi sgt, %19, %168 : vector<8x1xi32>
    %170 = vector.shape_cast %169 : vector<8x1xi1> to vector<8x1xi1>
    %171 = vector.broadcast %170 : vector<8x1xi1> to vector<8x32xi1>
    %172 = arith.select %171, %167, %146 : vector<8x32xi1>, vector<8x32xf32>
    %173 = vector.shape_cast %169 : vector<8x1xi1> to vector<8x1xi1>
    %174 = vector.broadcast %173 : vector<8x1xi1> to vector<8x32xi1>
    %175 = arith.select %174, %165, %149 : vector<8x32xi1>, vector<8x32xf32>
    %176 = vector.extract_strided_slice %15 {offsets = [48, 0], sizes = [8, 128], strides = [1, 1]} : vector<64x128xf32> to vector<8x128xf32>
    %cst_28 = arith.constant dense<0.000000e+00> : vector<8x128xf32>
    %177 = tpu.matmul %172, %18, %cst_28 {dimension_numbers = #tpu.dot_dimension_numbers<[1], [0], [0], [1], [0, 0, 1, 1], [], []>} : vector<8x32xf32>, vector<32x128xf32>, vector<8x128xf32> -> vector<8x128xf32>
    %178 = arith.addf %176, %177 : vector<8x128xf32>
    %179 = arith.negf %178 : vector<8x128xf32>
    %180 = math.exp %179 : vector<8x128xf32>
    %cst_29 = arith.constant 1.000000e+00 : f32
    %181 = vector.broadcast %cst_29 : f32 to vector<8x128xf32>
    %182 = arith.addf %181, %180 : vector<8x128xf32>
    %183 = arith.divf %181, %182 : vector<8x128xf32>
    %184 = math.tanh %178 : vector<8x128xf32>
    %185 = vector.extract_strided_slice %183 {offsets = [0, 0], sizes = [8, 32], strides = [1, 1]} : vector<8x128xf32> to vector<8x32xf32>
    %186 = vector.extract_strided_slice %183 {offsets = [0, 32], sizes = [8, 32], strides = [1, 1]} : vector<8x128xf32> to vector<8x32xf32>
    %187 = vector.extract_strided_slice %184 {offsets = [0, 64], sizes = [8, 32], strides = [1, 1]} : vector<8x128xf32> to vector<8x32xf32>
    %188 = vector.extract_strided_slice %183 {offsets = [0, 96], sizes = [8, 32], strides = [1, 1]} : vector<8x128xf32> to vector<8x32xf32>
    %189 = arith.mulf %186, %175 : vector<8x32xf32>
    %190 = arith.mulf %185, %187 : vector<8x32xf32>
    %191 = arith.addf %189, %190 : vector<8x32xf32>
    %192 = math.tanh %191 : vector<8x32xf32>
    %193 = arith.mulf %188, %192 : vector<8x32xf32>
    %c6_i32 = arith.constant 6 : i32
    %194 = vector.broadcast %c6_i32 : i32 to vector<8x1xi32>
    %195 = arith.cmpi sgt, %19, %194 : vector<8x1xi32>
    %196 = vector.shape_cast %195 : vector<8x1xi1> to vector<8x1xi1>
    %197 = vector.broadcast %196 : vector<8x1xi1> to vector<8x32xi1>
    %198 = arith.select %197, %193, %172 : vector<8x32xi1>, vector<8x32xf32>
    %199 = vector.shape_cast %195 : vector<8x1xi1> to vector<8x1xi1>
    %200 = vector.broadcast %199 : vector<8x1xi1> to vector<8x32xi1>
    %201 = arith.select %200, %191, %175 : vector<8x32xi1>, vector<8x32xf32>
    %202 = vector.extract_strided_slice %15 {offsets = [56, 0], sizes = [8, 128], strides = [1, 1]} : vector<64x128xf32> to vector<8x128xf32>
    %cst_30 = arith.constant dense<0.000000e+00> : vector<8x128xf32>
    %203 = tpu.matmul %198, %18, %cst_30 {dimension_numbers = #tpu.dot_dimension_numbers<[1], [0], [0], [1], [0, 0, 1, 1], [], []>} : vector<8x32xf32>, vector<32x128xf32>, vector<8x128xf32> -> vector<8x128xf32>
    %204 = arith.addf %202, %203 : vector<8x128xf32>
    %205 = arith.negf %204 : vector<8x128xf32>
    %206 = math.exp %205 : vector<8x128xf32>
    %cst_31 = arith.constant 1.000000e+00 : f32
    %207 = vector.broadcast %cst_31 : f32 to vector<8x128xf32>
    %208 = arith.addf %207, %206 : vector<8x128xf32>
    %209 = arith.divf %207, %208 : vector<8x128xf32>
    %210 = math.tanh %204 : vector<8x128xf32>
    %211 = vector.extract_strided_slice %209 {offsets = [0, 0], sizes = [8, 32], strides = [1, 1]} : vector<8x128xf32> to vector<8x32xf32>
    %212 = vector.extract_strided_slice %209 {offsets = [0, 32], sizes = [8, 32], strides = [1, 1]} : vector<8x128xf32> to vector<8x32xf32>
    %213 = vector.extract_strided_slice %210 {offsets = [0, 64], sizes = [8, 32], strides = [1, 1]} : vector<8x128xf32> to vector<8x32xf32>
    %214 = vector.extract_strided_slice %209 {offsets = [0, 96], sizes = [8, 32], strides = [1, 1]} : vector<8x128xf32> to vector<8x32xf32>
    %215 = arith.mulf %212, %201 : vector<8x32xf32>
    %216 = arith.mulf %211, %213 : vector<8x32xf32>
    %217 = arith.addf %215, %216 : vector<8x32xf32>
    %218 = math.tanh %217 : vector<8x32xf32>
    %219 = arith.mulf %214, %218 : vector<8x32xf32>
    %c7_i32 = arith.constant 7 : i32
    %220 = vector.broadcast %c7_i32 : i32 to vector<8x1xi32>
    %221 = arith.cmpi sgt, %19, %220 : vector<8x1xi32>
    %222 = vector.shape_cast %221 : vector<8x1xi1> to vector<8x1xi1>
    %223 = vector.broadcast %222 : vector<8x1xi1> to vector<8x32xi1>
    %224 = arith.select %223, %219, %198 : vector<8x32xi1>, vector<8x32xf32>
    %c0_32 = arith.constant 0 : index
    %c0_33 = arith.constant 0 : index
    %225 = vector.load %arg11[%c0_32, %c0_33] : memref<32x32xf32, #tpu.memory_space<vmem>>, vector<32x32xf32>
    %cst_34 = arith.constant dense<0.000000e+00> : vector<8x32xf32>
    %226 = tpu.matmul %224, %225, %cst_34 {dimension_numbers = #tpu.dot_dimension_numbers<[1], [0], [0], [1], [0, 0, 1, 1], [], []>} : vector<8x32xf32>, vector<32x32xf32>, vector<8x32xf32> -> vector<8x32xf32>
    %c0_35 = arith.constant 0 : index
    %c0_36 = arith.constant 0 : index
    %227 = vector.load %arg12[%c0_35, %c0_36] : memref<64x32xf32, #tpu.memory_space<vmem>>, vector<64x32xf32>
    %cst_37 = arith.constant dense<0.000000e+00> : vector<8x32xf32>
    %228 = tpu.matmul %0, %227, %cst_37 {dimension_numbers = #tpu.dot_dimension_numbers<[1], [0], [0], [1], [0, 0, 1, 1], [], []>} : vector<8x64xf32>, vector<64x32xf32>, vector<8x32xf32> -> vector<8x32xf32>
    %229 = arith.addf %226, %228 : vector<8x32xf32>
    %c0_38 = arith.constant 0 : index
    %c0_39 = arith.constant 0 : index
    %230 = vector.load %arg13[%c0_38, %c0_39] : memref<1x32xf32, #tpu.memory_space<vmem>>, vector<1x32xf32>
    %231 = vector.broadcast %230 : vector<1x32xf32> to vector<8x32xf32>
    %232 = arith.addf %229, %231 : vector<8x32xf32>
    %233 = math.tanh %232 : vector<8x32xf32>
    %c0_40 = arith.constant 0 : index
    %c0_41 = arith.constant 0 : index
    %234 = vector.load %arg14[%c0_40, %c0_41] : memref<32x32xf32, #tpu.memory_space<vmem>>, vector<32x32xf32>
    %cst_42 = arith.constant dense<0.000000e+00> : vector<8x32xf32>
    %235 = tpu.matmul %233, %234, %cst_42 {dimension_numbers = #tpu.dot_dimension_numbers<[1], [0], [0], [1], [0, 0, 1, 1], [], []>} : vector<8x32xf32>, vector<32x32xf32>, vector<8x32xf32> -> vector<8x32xf32>
    %c0_43 = arith.constant 0 : index
    %c0_44 = arith.constant 0 : index
    %236 = vector.load %arg15[%c0_43, %c0_44] : memref<1x32xf32, #tpu.memory_space<vmem>>, vector<1x32xf32>
    %237 = vector.broadcast %236 : vector<1x32xf32> to vector<8x32xf32>
    %238 = arith.addf %235, %237 : vector<8x32xf32>
    %cst_45 = arith.constant 0.000000e+00 : f32
    %239 = vector.broadcast %cst_45 : f32 to vector<8x32xf32>
    %240 = arith.maximumf %238, %239 : vector<8x32xf32>
    %c0_46 = arith.constant 0 : index
    %c0_47 = arith.constant 0 : index
    %241 = vector.load %arg16[%c0_46, %c0_47] : memref<32x2xf32, #tpu.memory_space<vmem>>, vector<32x2xf32>
    %cst_48 = arith.constant dense<0.000000e+00> : vector<8x2xf32>
    %242 = tpu.matmul %240, %241, %cst_48 {dimension_numbers = #tpu.dot_dimension_numbers<[1], [0], [0], [1], [0, 0, 1, 1], [], []>} : vector<8x32xf32>, vector<32x2xf32>, vector<8x2xf32> -> vector<8x2xf32>
    %c0_49 = arith.constant 0 : index
    %c0_50 = arith.constant 0 : index
    %243 = vector.load %arg17[%c0_49, %c0_50] : memref<1x2xf32, #tpu.memory_space<vmem>>, vector<1x2xf32>
    %244 = vector.broadcast %243 : vector<1x2xf32> to vector<8x2xf32>
    %245 = arith.addf %242, %244 : vector<8x2xf32>
    %c0_51 = arith.constant 0 : index
    %c0_52 = arith.constant 0 : index
    %246 = vector.load %arg3[%c0_51, %c0_52] : memref<40x1xi32, #tpu.memory_space<vmem>>, vector<40x1xi32>
    %247 = tpu.iota {dimensions = array<i32: 1>} : vector<40x90xi32>
    %248 = vector.broadcast %246 : vector<40x1xi32> to vector<40x90xi32>
    %249 = arith.cmpi eq, %247, %248 : vector<40x90xi32>
    %250 = arith.extui %249 : vector<40x90xi1> to vector<40x90xi32>
    %251 = arith.sitofp %250 : vector<40x90xi32> to vector<40x90xf32>
    %c0_53 = arith.constant 0 : index
    %c0_54 = arith.constant 0 : index
    %252 = vector.load %arg7[%c0_53, %c0_54] : memref<90x16xf32, #tpu.memory_space<vmem>>, vector<90x16xf32>
    %cst_55 = arith.constant dense<0.000000e+00> : vector<40x16xf32>
    %253 = tpu.matmul %251, %252, %cst_55 {dimension_numbers = #tpu.dot_dimension_numbers<[1], [0], [0], [1], [0, 0, 1, 1], [], []>} : vector<40x90xf32>, vector<90x16xf32>, vector<40x16xf32> -> vector<40x16xf32>
    %c0_56 = arith.constant 0 : index
    %c0_57 = arith.constant 0 : index
    %254 = vector.load %arg18[%c0_56, %c0_57] : memref<24x32xf32, #tpu.memory_space<vmem>>, vector<24x32xf32>
    %255 = vector.extract_strided_slice %254 {offsets = [0, 0], sizes = [16, 32], strides = [1, 1]} : vector<24x32xf32> to vector<16x32xf32>
    %cst_58 = arith.constant dense<0.000000e+00> : vector<40x32xf32>
    %256 = tpu.matmul %253, %255, %cst_58 {dimension_numbers = #tpu.dot_dimension_numbers<[1], [0], [0], [1], [0, 0, 1, 1], [], []>} : vector<40x16xf32>, vector<16x32xf32>, vector<40x32xf32> -> vector<40x32xf32>
    %c0_59 = arith.constant 0 : index
    %c0_60 = arith.constant 0 : index
    %257 = vector.load %arg4[%c0_59, %c0_60] : memref<40x8xf32, #tpu.memory_space<vmem>>, vector<40x8xf32>
    %258 = vector.extract_strided_slice %254 {offsets = [16, 0], sizes = [8, 32], strides = [1, 1]} : vector<24x32xf32> to vector<8x32xf32>
    %cst_61 = arith.constant dense<0.000000e+00> : vector<40x32xf32>
    %259 = tpu.matmul %257, %258, %cst_61 {dimension_numbers = #tpu.dot_dimension_numbers<[1], [0], [0], [1], [0, 0, 1, 1], [], []>} : vector<40x8xf32>, vector<8x32xf32>, vector<40x32xf32> -> vector<40x32xf32>
    %260 = arith.addf %256, %259 : vector<40x32xf32>
    %c0_62 = arith.constant 0 : index
    %c0_63 = arith.constant 0 : index
    %261 = vector.load %arg19[%c0_62, %c0_63] : memref<1x32xf32, #tpu.memory_space<vmem>>, vector<1x32xf32>
    %262 = vector.broadcast %261 : vector<1x32xf32> to vector<40x32xf32>
    %263 = arith.addf %260, %262 : vector<40x32xf32>
    %cst_64 = arith.constant 0.000000e+00 : f32
    %264 = vector.broadcast %cst_64 : f32 to vector<40x32xf32>
    %265 = arith.maximumf %263, %264 : vector<40x32xf32>
    %c0_65 = arith.constant 0 : index
    %c0_66 = arith.constant 0 : index
    %266 = vector.load %arg20[%c0_65, %c0_66] : memref<32x32xf32, #tpu.memory_space<vmem>>, vector<32x32xf32>
    %cst_67 = arith.constant dense<0.000000e+00> : vector<40x32xf32>
    %267 = tpu.matmul %265, %266, %cst_67 {dimension_numbers = #tpu.dot_dimension_numbers<[1], [0], [0], [1], [0, 0, 1, 1], [], []>} : vector<40x32xf32>, vector<32x32xf32>, vector<40x32xf32> -> vector<40x32xf32>
    %c0_68 = arith.constant 0 : index
    %c0_69 = arith.constant 0 : index
    %268 = vector.load %arg21[%c0_68, %c0_69] : memref<1x32xf32, #tpu.memory_space<vmem>>, vector<1x32xf32>
    %269 = vector.broadcast %268 : vector<1x32xf32> to vector<40x32xf32>
    %270 = arith.addf %267, %269 : vector<40x32xf32>
    %cst_70 = arith.constant dense<0.000000e+00> : vector<8x40xf32>
    %271 = tpu.matmul %233, %270, %cst_70 {dimension_numbers = #tpu.dot_dimension_numbers<[1], [1], [0], [0], [0, 0, 1, 0], [], []>} : vector<8x32xf32>, vector<40x32xf32>, vector<8x40xf32> -> vector<8x40xf32>
    %272 = tpu.iota {dimensions = array<i32: 1>} : vector<8x40xi32>
    %273 = tpu.iota {dimensions = array<i32: 0>} : vector<8x40xi32>
    %c20_i32 = arith.constant 20 : i32
    %274 = vector.broadcast %c20_i32 : i32 to vector<8x40xi32>
    %275 = arith.muli %273, %274 : vector<8x40xi32>
    %276 = arith.cmpi sge, %272, %275 : vector<8x40xi32>
    %c1_i32_71 = arith.constant 1 : i32
    %277 = vector.broadcast %c1_i32_71 : i32 to vector<8x40xi32>
    %278 = arith.addi %273, %277 : vector<8x40xi32>
    %c20_i32_72 = arith.constant 20 : i32
    %279 = vector.broadcast %c20_i32_72 : i32 to vector<8x40xi32>
    %280 = arith.muli %278, %279 : vector<8x40xi32>
    %281 = arith.cmpi slt, %272, %280 : vector<8x40xi32>
    %282 = arith.andi %276, %281 : vector<8x40xi1>
    %283 = arith.extui %282 : vector<8x40xi1> to vector<8x40xi32>
    %284 = arith.sitofp %283 : vector<8x40xi32> to vector<8x40xf32>
    %285 = arith.mulf %271, %284 : vector<8x40xf32>
    %286 = vector.extract_strided_slice %285 {offsets = [0, 0], sizes = [8, 20], strides = [1, 1]} : vector<8x40xf32> to vector<8x20xf32>
    %287 = vector.extract_strided_slice %285 {offsets = [0, 20], sizes = [8, 20], strides = [1, 1]} : vector<8x40xf32> to vector<8x20xf32>
    %288 = arith.addf %286, %287 : vector<8x20xf32>
    %cst_73 = arith.constant dense<0xFF800000> : vector<8xf32>
    %289 = vector.multi_reduction <maximumf>, %288, %cst_73 [1] : vector<8x20xf32> to vector<8xf32>
    %290 = vector.shape_cast %289 : vector<8xf32> to vector<8x1xf32>
    %291 = vector.broadcast %290 : vector<8x1xf32> to vector<8x20xf32>
    %292 = arith.subf %288, %291 : vector<8x20xf32>
    %293 = math.exp %292 : vector<8x20xf32>
    %cst_74 = arith.constant dense<0.000000e+00> : vector<8xf32>
    %294 = vector.multi_reduction <add>, %293, %cst_74 [1] : vector<8x20xf32> to vector<8xf32>
    %295 = vector.shape_cast %294 : vector<8xf32> to vector<8x1xf32>
    %296 = math.log %295 : vector<8x1xf32>
    %297 = arith.addf %296, %290 : vector<8x1xf32>
    %298 = vector.broadcast %297 : vector<8x1xf32> to vector<8x20xf32>
    %299 = arith.subf %288, %298 : vector<8x20xf32>
    %cst_75 = arith.constant 0.000000e+00 : f32
    %300 = vector.broadcast %cst_75 : f32 to vector<8x74xf32>
    %301 = tpu.concatenate %233, %245, %299, %300 in 1 : vector<8x32xf32>, vector<8x2xf32>, vector<8x20xf32>, vector<8x74xf32> -> vector<8x128xf32>
    %c0_76 = arith.constant 0 : index
    %c0_77 = arith.constant 0 : index
    %302 = vector.load %arg30[%c0_76, %c0_77] : memref<8x128xf32, #tpu.memory_space<vmem>>, vector<8x128xf32>
    tpu.vector_store %arg30[%c0_76, %c0_77], %301 {strides = array<i32>} : memref<8x128xf32, #tpu.memory_space<vmem>>, vector<8x128xf32>,
    %c0_78 = arith.constant 0 : index
    %c0_79 = arith.constant 0 : index
    %303 = vector.load %arg2[%c0_78, %c0_79] : memref<64x1xi32, #tpu.memory_space<vmem>>, vector<64x1xi32>
    %304 = tpu.iota {dimensions = array<i32: 1>} : vector<64x128xi32>
    %305 = vector.broadcast %303 : vector<64x1xi32> to vector<64x128xi32>
    %306 = arith.cmpi eq, %304, %305 : vector<64x128xi32>
    %307 = arith.extui %306 : vector<64x128xi1> to vector<64x128xi32>
    %308 = arith.sitofp %307 : vector<64x128xi32> to vector<64x128xf32>
    %309 = arith.truncf %308 : vector<64x128xf32> to vector<64x128xbf16>
    %cst_80 = arith.constant dense<0.000000e+00> : vector<64x32xf32>
    %310 = tpu.matmul %309, %1, %cst_80 {dimension_numbers = #tpu.dot_dimension_numbers<[1], [0], [0], [1], [0, 0, 1, 1], [], []>} : vector<64x128xbf16>, vector<128x32xbf16>, vector<64x32xf32> -> vector<64x32xf32>
    %311 = arith.truncf %310 : vector<64x32xf32> to vector<64x32xbf16>
    %c0_81 = arith.constant 0 : index
    %c0_82 = arith.constant 0 : index
    %312 = vector.load %arg25[%c0_81, %c0_82] : memref<32x128xbf16, #tpu.memory_space<vmem>>, vector<32x128xbf16>
    %cst_83 = arith.constant dense<0.000000e+00> : vector<64x128xf32>
    %313 = tpu.matmul %311, %312, %cst_83 {dimension_numbers = #tpu.dot_dimension_numbers<[1], [0], [0], [1], [0, 0, 1, 1], [], []>} : vector<64x32xbf16>, vector<32x128xbf16>, vector<64x128xf32> -> vector<64x128xf32>
    %c0_84 = arith.constant 0 : index
    %c0_85 = arith.constant 0 : index
    %314 = vector.load %arg27[%c0_84, %c0_85] : memref<1x128xf32, #tpu.memory_space<vmem>>, vector<1x128xf32>
    %315 = vector.broadcast %314 : vector<1x128xf32> to vector<64x128xf32>
    %316 = arith.addf %313, %315 : vector<64x128xf32>
    %c0_86 = arith.constant 0 : index
    %c0_87 = arith.constant 0 : index
    %317 = vector.load %arg22[%c0_86, %c0_87] : memref<32x32xf32, #tpu.memory_space<vmem>>, vector<32x32xf32>
    %cst_88 = arith.constant dense<0.000000e+00> : vector<8x32xf32>
    %318 = tpu.matmul %233, %317, %cst_88 {dimension_numbers = #tpu.dot_dimension_numbers<[1], [0], [0], [1], [0, 0, 1, 1], [], []>} : vector<8x32xf32>, vector<32x32xf32>, vector<8x32xf32> -> vector<8x32xf32>
    %c0_89 = arith.constant 0 : index
    %c0_90 = arith.constant 0 : index
    %319 = vector.load %arg23[%c0_89, %c0_90] : memref<64x32xf32, #tpu.memory_space<vmem>>, vector<64x32xf32>
    %cst_91 = arith.constant dense<0.000000e+00> : vector<8x32xf32>
    %320 = tpu.matmul %0, %319, %cst_91 {dimension_numbers = #tpu.dot_dimension_numbers<[1], [0], [0], [1], [0, 0, 1, 1], [], []>} : vector<8x64xf32>, vector<64x32xf32>, vector<8x32xf32> -> vector<8x32xf32>
    %321 = arith.addf %318, %320 : vector<8x32xf32>
    %c0_92 = arith.constant 0 : index
    %c0_93 = arith.constant 0 : index
    %322 = vector.load %arg24[%c0_92, %c0_93] : memref<1x32xf32, #tpu.memory_space<vmem>>, vector<1x32xf32>
    %323 = vector.broadcast %322 : vector<1x32xf32> to vector<8x32xf32>
    %324 = arith.addf %321, %323 : vector<8x32xf32>
    %325 = math.tanh %324 : vector<8x32xf32>
    %cst_94 = arith.constant 0.000000e+00 : f32
    %326 = vector.broadcast %cst_94 : f32 to vector<8x32xf32>
    %c0_95 = arith.constant 0 : index
    %c0_96 = arith.constant 0 : index
    %327 = vector.load %arg26[%c0_95, %c0_96] : memref<32x128xf32, #tpu.memory_space<vmem>>, vector<32x128xf32>
    %328 = vector.extract_strided_slice %316 {offsets = [0, 0], sizes = [8, 128], strides = [1, 1]} : vector<64x128xf32> to vector<8x128xf32>
    %cst_97 = arith.constant dense<0.000000e+00> : vector<8x128xf32>
    %329 = tpu.matmul %325, %327, %cst_97 {dimension_numbers = #tpu.dot_dimension_numbers<[1], [0], [0], [1], [0, 0, 1, 1], [], []>} : vector<8x32xf32>, vector<32x128xf32>, vector<8x128xf32> -> vector<8x128xf32>
    %330 = arith.addf %328, %329 : vector<8x128xf32>
    %331 = arith.negf %330 : vector<8x128xf32>
    %332 = math.exp %331 : vector<8x128xf32>
    %cst_98 = arith.constant 1.000000e+00 : f32
    %333 = vector.broadcast %cst_98 : f32 to vector<8x128xf32>
    %334 = arith.addf %333, %332 : vector<8x128xf32>
    %335 = arith.divf %333, %334 : vector<8x128xf32>
    %336 = math.tanh %330 : vector<8x128xf32>
    %337 = vector.extract_strided_slice %335 {offsets = [0, 0], sizes = [8, 32], strides = [1, 1]} : vector<8x128xf32> to vector<8x32xf32>
    %338 = vector.extract_strided_slice %335 {offsets = [0, 32], sizes = [8, 32], strides = [1, 1]} : vector<8x128xf32> to vector<8x32xf32>
    %339 = vector.extract_strided_slice %336 {offsets = [0, 64], sizes = [8, 32], strides = [1, 1]} : vector<8x128xf32> to vector<8x32xf32>
    %340 = vector.extract_strided_slice %335 {offsets = [0, 96], sizes = [8, 32], strides = [1, 1]} : vector<8x128xf32> to vector<8x32xf32>
    %341 = arith.mulf %338, %326 : vector<8x32xf32>
    %342 = arith.mulf %337, %339 : vector<8x32xf32>
    %343 = arith.addf %341, %342 : vector<8x32xf32>
    %344 = math.tanh %343 : vector<8x32xf32>
    %345 = arith.mulf %340, %344 : vector<8x32xf32>
    %c0_99 = arith.constant 0 : index
    %c0_100 = arith.constant 0 : index
    %346 = vector.load %arg32[%c0_99, %c0_100] : memref<64x32xf32, #tpu.memory_space<vmem>>, vector<8x32xf32>
    tpu.vector_store %arg32[%c0_99, %c0_100], %345 {strides = array<i32>} : memref<64x32xf32, #tpu.memory_space<vmem>>, vector<8x32xf32>,
    %347 = vector.extract_strided_slice %316 {offsets = [8, 0], sizes = [8, 128], strides = [1, 1]} : vector<64x128xf32> to vector<8x128xf32>
    %cst_101 = arith.constant dense<0.000000e+00> : vector<8x128xf32>
    %348 = tpu.matmul %345, %327, %cst_101 {dimension_numbers = #tpu.dot_dimension_numbers<[1], [0], [0], [1], [0, 0, 1, 1], [], []>} : vector<8x32xf32>, vector<32x128xf32>, vector<8x128xf32> -> vector<8x128xf32>
    %349 = arith.addf %347, %348 : vector<8x128xf32>
    %350 = arith.negf %349 : vector<8x128xf32>
    %351 = math.exp %350 : vector<8x128xf32>
    %cst_102 = arith.constant 1.000000e+00 : f32
    %352 = vector.broadcast %cst_102 : f32 to vector<8x128xf32>
    %353 = arith.addf %352, %351 : vector<8x128xf32>
    %354 = arith.divf %352, %353 : vector<8x128xf32>
    %355 = math.tanh %349 : vector<8x128xf32>
    %356 = vector.extract_strided_slice %354 {offsets = [0, 0], sizes = [8, 32], strides = [1, 1]} : vector<8x128xf32> to vector<8x32xf32>
    %357 = vector.extract_strided_slice %354 {offsets = [0, 32], sizes = [8, 32], strides = [1, 1]} : vector<8x128xf32> to vector<8x32xf32>
    %358 = vector.extract_strided_slice %355 {offsets = [0, 64], sizes = [8, 32], strides = [1, 1]} : vector<8x128xf32> to vector<8x32xf32>
    %359 = vector.extract_strided_slice %354 {offsets = [0, 96], sizes = [8, 32], strides = [1, 1]} : vector<8x128xf32> to vector<8x32xf32>
    %360 = arith.mulf %357, %343 : vector<8x32xf32>
    %361 = arith.mulf %356, %358 : vector<8x32xf32>
    %362 = arith.addf %360, %361 : vector<8x32xf32>
    %363 = math.tanh %362 : vector<8x32xf32>
    %364 = arith.mulf %359, %363 : vector<8x32xf32>
    %c8 = arith.constant 8 : index
    %c0_103 = arith.constant 0 : index
    %365 = vector.load %arg32[%c8, %c0_103] : memref<64x32xf32, #tpu.memory_space<vmem>>, vector<8x32xf32>
    tpu.vector_store %arg32[%c8, %c0_103], %364 {strides = array<i32>} : memref<64x32xf32, #tpu.memory_space<vmem>>, vector<8x32xf32>,
    %366 = vector.extract_strided_slice %316 {offsets = [16, 0], sizes = [8, 128], strides = [1, 1]} : vector<64x128xf32> to vector<8x128xf32>
    %cst_104 = arith.constant dense<0.000000e+00> : vector<8x128xf32>
    %367 = tpu.matmul %364, %327, %cst_104 {dimension_numbers = #tpu.dot_dimension_numbers<[1], [0], [0], [1], [0, 0, 1, 1], [], []>} : vector<8x32xf32>, vector<32x128xf32>, vector<8x128xf32> -> vector<8x128xf32>
    %368 = arith.addf %366, %367 : vector<8x128xf32>
    %369 = arith.negf %368 : vector<8x128xf32>
    %370 = math.exp %369 : vector<8x128xf32>
    %cst_105 = arith.constant 1.000000e+00 : f32
    %371 = vector.broadcast %cst_105 : f32 to vector<8x128xf32>
    %372 = arith.addf %371, %370 : vector<8x128xf32>
    %373 = arith.divf %371, %372 : vector<8x128xf32>
    %374 = math.tanh %368 : vector<8x128xf32>
    %375 = vector.extract_strided_slice %373 {offsets = [0, 0], sizes = [8, 32], strides = [1, 1]} : vector<8x128xf32> to vector<8x32xf32>
    %376 = vector.extract_strided_slice %373 {offsets = [0, 32], sizes = [8, 32], strides = [1, 1]} : vector<8x128xf32> to vector<8x32xf32>
    %377 = vector.extract_strided_slice %374 {offsets = [0, 64], sizes = [8, 32], strides = [1, 1]} : vector<8x128xf32> to vector<8x32xf32>
    %378 = vector.extract_strided_slice %373 {offsets = [0, 96], sizes = [8, 32], strides = [1, 1]} : vector<8x128xf32> to vector<8x32xf32>
    %379 = arith.mulf %376, %362 : vector<8x32xf32>
    %380 = arith.mulf %375, %377 : vector<8x32xf32>
    %381 = arith.addf %379, %380 : vector<8x32xf32>
    %382 = math.tanh %381 : vector<8x32xf32>
    %383 = arith.mulf %378, %382 : vector<8x32xf32>
    %c16 = arith.constant 16 : index
    %c0_106 = arith.constant 0 : index
    %384 = vector.load %arg32[%c16, %c0_106] : memref<64x32xf32, #tpu.memory_space<vmem>>, vector<8x32xf32>
    tpu.vector_store %arg32[%c16, %c0_106], %383 {strides = array<i32>} : memref<64x32xf32, #tpu.memory_space<vmem>>, vector<8x32xf32>,
    %385 = vector.extract_strided_slice %316 {offsets = [24, 0], sizes = [8, 128], strides = [1, 1]} : vector<64x128xf32> to vector<8x128xf32>
    %cst_107 = arith.constant dense<0.000000e+00> : vector<8x128xf32>
    %386 = tpu.matmul %383, %327, %cst_107 {dimension_numbers = #tpu.dot_dimension_numbers<[1], [0], [0], [1], [0, 0, 1, 1], [], []>} : vector<8x32xf32>, vector<32x128xf32>, vector<8x128xf32> -> vector<8x128xf32>
    %387 = arith.addf %385, %386 : vector<8x128xf32>
    %388 = arith.negf %387 : vector<8x128xf32>
    %389 = math.exp %388 : vector<8x128xf32>
    %cst_108 = arith.constant 1.000000e+00 : f32
    %390 = vector.broadcast %cst_108 : f32 to vector<8x128xf32>
    %391 = arith.addf %390, %389 : vector<8x128xf32>
    %392 = arith.divf %390, %391 : vector<8x128xf32>
    %393 = math.tanh %387 : vector<8x128xf32>
    %394 = vector.extract_strided_slice %392 {offsets = [0, 0], sizes = [8, 32], strides = [1, 1]} : vector<8x128xf32> to vector<8x32xf32>
    %395 = vector.extract_strided_slice %392 {offsets = [0, 32], sizes = [8, 32], strides = [1, 1]} : vector<8x128xf32> to vector<8x32xf32>
    %396 = vector.extract_strided_slice %393 {offsets = [0, 64], sizes = [8, 32], strides = [1, 1]} : vector<8x128xf32> to vector<8x32xf32>
    %397 = vector.extract_strided_slice %392 {offsets = [0, 96], sizes = [8, 32], strides = [1, 1]} : vector<8x128xf32> to vector<8x32xf32>
    %398 = arith.mulf %395, %381 : vector<8x32xf32>
    %399 = arith.mulf %394, %396 : vector<8x32xf32>
    %400 = arith.addf %398, %399 : vector<8x32xf32>
    %401 = math.tanh %400 : vector<8x32xf32>
    %402 = arith.mulf %397, %401 : vector<8x32xf32>
    %c24 = arith.constant 24 : index
    %c0_109 = arith.constant 0 : index
    %403 = vector.load %arg32[%c24, %c0_109] : memref<64x32xf32, #tpu.memory_space<vmem>>, vector<8x32xf32>
    tpu.vector_store %arg32[%c24, %c0_109], %402 {strides = array<i32>} : memref<64x32xf32, #tpu.memory_space<vmem>>, vector<8x32xf32>,
    %404 = vector.extract_strided_slice %316 {offsets = [32, 0], sizes = [8, 128], strides = [1, 1]} : vector<64x128xf32> to vector<8x128xf32>
    %cst_110 = arith.constant dense<0.000000e+00> : vector<8x128xf32>
    %405 = tpu.matmul %402, %327, %cst_110 {dimension_numbers = #tpu.dot_dimension_numbers<[1], [0], [0], [1], [0, 0, 1, 1], [], []>} : vector<8x32xf32>, vector<32x128xf32>, vector<8x128xf32> -> vector<8x128xf32>
    %406 = arith.addf %404, %405 : vector<8x128xf32>
    %407 = arith.negf %406 : vector<8x128xf32>
    %408 = math.exp %407 : vector<8x128xf32>
    %cst_111 = arith.constant 1.000000e+00 : f32
    %409 = vector.broadcast %cst_111 : f32 to vector<8x128xf32>
    %410 = arith.addf %409, %408 : vector<8x128xf32>
    %411 = arith.divf %409, %410 : vector<8x128xf32>
    %412 = math.tanh %406 : vector<8x128xf32>
    %413 = vector.extract_strided_slice %411 {offsets = [0, 0], sizes = [8, 32], strides = [1, 1]} : vector<8x128xf32> to vector<8x32xf32>
    %414 = vector.extract_strided_slice %411 {offsets = [0, 32], sizes = [8, 32], strides = [1, 1]} : vector<8x128xf32> to vector<8x32xf32>
    %415 = vector.extract_strided_slice %412 {offsets = [0, 64], sizes = [8, 32], strides = [1, 1]} : vector<8x128xf32> to vector<8x32xf32>
    %416 = vector.extract_strided_slice %411 {offsets = [0, 96], sizes = [8, 32], strides = [1, 1]} : vector<8x128xf32> to vector<8x32xf32>
    %417 = arith.mulf %414, %400 : vector<8x32xf32>
    %418 = arith.mulf %413, %415 : vector<8x32xf32>
    %419 = arith.addf %417, %418 : vector<8x32xf32>
    %420 = math.tanh %419 : vector<8x32xf32>
    %421 = arith.mulf %416, %420 : vector<8x32xf32>
    %c32 = arith.constant 32 : index
    %c0_112 = arith.constant 0 : index
    %422 = vector.load %arg32[%c32, %c0_112] : memref<64x32xf32, #tpu.memory_space<vmem>>, vector<8x32xf32>
    tpu.vector_store %arg32[%c32, %c0_112], %421 {strides = array<i32>} : memref<64x32xf32, #tpu.memory_space<vmem>>, vector<8x32xf32>,
    %423 = vector.extract_strided_slice %316 {offsets = [40, 0], sizes = [8, 128], strides = [1, 1]} : vector<64x128xf32> to vector<8x128xf32>
    %cst_113 = arith.constant dense<0.000000e+00> : vector<8x128xf32>
    %424 = tpu.matmul %421, %327, %cst_113 {dimension_numbers = #tpu.dot_dimension_numbers<[1], [0], [0], [1], [0, 0, 1, 1], [], []>} : vector<8x32xf32>, vector<32x128xf32>, vector<8x128xf32> -> vector<8x128xf32>
    %425 = arith.addf %423, %424 : vector<8x128xf32>
    %426 = arith.negf %425 : vector<8x128xf32>
    %427 = math.exp %426 : vector<8x128xf32>
    %cst_114 = arith.constant 1.000000e+00 : f32
    %428 = vector.broadcast %cst_114 : f32 to vector<8x128xf32>
    %429 = arith.addf %428, %427 : vector<8x128xf32>
    %430 = arith.divf %428, %429 : vector<8x128xf32>
    %431 = math.tanh %425 : vector<8x128xf32>
    %432 = vector.extract_strided_slice %430 {offsets = [0, 0], sizes = [8, 32], strides = [1, 1]} : vector<8x128xf32> to vector<8x32xf32>
    %433 = vector.extract_strided_slice %430 {offsets = [0, 32], sizes = [8, 32], strides = [1, 1]} : vector<8x128xf32> to vector<8x32xf32>
    %434 = vector.extract_strided_slice %431 {offsets = [0, 64], sizes = [8, 32], strides = [1, 1]} : vector<8x128xf32> to vector<8x32xf32>
    %435 = vector.extract_strided_slice %430 {offsets = [0, 96], sizes = [8, 32], strides = [1, 1]} : vector<8x128xf32> to vector<8x32xf32>
    %436 = arith.mulf %433, %419 : vector<8x32xf32>
    %437 = arith.mulf %432, %434 : vector<8x32xf32>
    %438 = arith.addf %436, %437 : vector<8x32xf32>
    %439 = math.tanh %438 : vector<8x32xf32>
    %440 = arith.mulf %435, %439 : vector<8x32xf32>
    %c40 = arith.constant 40 : index
    %c0_115 = arith.constant 0 : index
    %441 = vector.load %arg32[%c40, %c0_115] : memref<64x32xf32, #tpu.memory_space<vmem>>, vector<8x32xf32>
    tpu.vector_store %arg32[%c40, %c0_115], %440 {strides = array<i32>} : memref<64x32xf32, #tpu.memory_space<vmem>>, vector<8x32xf32>,
    %442 = vector.extract_strided_slice %316 {offsets = [48, 0], sizes = [8, 128], strides = [1, 1]} : vector<64x128xf32> to vector<8x128xf32>
    %cst_116 = arith.constant dense<0.000000e+00> : vector<8x128xf32>
    %443 = tpu.matmul %440, %327, %cst_116 {dimension_numbers = #tpu.dot_dimension_numbers<[1], [0], [0], [1], [0, 0, 1, 1], [], []>} : vector<8x32xf32>, vector<32x128xf32>, vector<8x128xf32> -> vector<8x128xf32>
    %444 = arith.addf %442, %443 : vector<8x128xf32>
    %445 = arith.negf %444 : vector<8x128xf32>
    %446 = math.exp %445 : vector<8x128xf32>
    %cst_117 = arith.constant 1.000000e+00 : f32
    %447 = vector.broadcast %cst_117 : f32 to vector<8x128xf32>
    %448 = arith.addf %447, %446 : vector<8x128xf32>
    %449 = arith.divf %447, %448 : vector<8x128xf32>
    %450 = math.tanh %444 : vector<8x128xf32>
    %451 = vector.extract_strided_slice %449 {offsets = [0, 0], sizes = [8, 32], strides = [1, 1]} : vector<8x128xf32> to vector<8x32xf32>
    %452 = vector.extract_strided_slice %449 {offsets = [0, 32], sizes = [8, 32], strides = [1, 1]} : vector<8x128xf32> to vector<8x32xf32>
    %453 = vector.extract_strided_slice %450 {offsets = [0, 64], sizes = [8, 32], strides = [1, 1]} : vector<8x128xf32> to vector<8x32xf32>
    %454 = vector.extract_strided_slice %449 {offsets = [0, 96], sizes = [8, 32], strides = [1, 1]} : vector<8x128xf32> to vector<8x32xf32>
    %455 = arith.mulf %452, %438 : vector<8x32xf32>
    %456 = arith.mulf %451, %453 : vector<8x32xf32>
    %457 = arith.addf %455, %456 : vector<8x32xf32>
    %458 = math.tanh %457 : vector<8x32xf32>
    %459 = arith.mulf %454, %458 : vector<8x32xf32>
    %c48 = arith.constant 48 : index
    %c0_118 = arith.constant 0 : index
    %460 = vector.load %arg32[%c48, %c0_118] : memref<64x32xf32, #tpu.memory_space<vmem>>, vector<8x32xf32>
    tpu.vector_store %arg32[%c48, %c0_118], %459 {strides = array<i32>} : memref<64x32xf32, #tpu.memory_space<vmem>>, vector<8x32xf32>,
    %461 = vector.extract_strided_slice %316 {offsets = [56, 0], sizes = [8, 128], strides = [1, 1]} : vector<64x128xf32> to vector<8x128xf32>
    %cst_119 = arith.constant dense<0.000000e+00> : vector<8x128xf32>
    %462 = tpu.matmul %459, %327, %cst_119 {dimension_numbers = #tpu.dot_dimension_numbers<[1], [0], [0], [1], [0, 0, 1, 1], [], []>} : vector<8x32xf32>, vector<32x128xf32>, vector<8x128xf32> -> vector<8x128xf32>
    %463 = arith.addf %461, %462 : vector<8x128xf32>
    %464 = arith.negf %463 : vector<8x128xf32>
    %465 = math.exp %464 : vector<8x128xf32>
    %cst_120 = arith.constant 1.000000e+00 : f32
    %466 = vector.broadcast %cst_120 : f32 to vector<8x128xf32>
    %467 = arith.addf %466, %465 : vector<8x128xf32>
    %468 = arith.divf %466, %467 : vector<8x128xf32>
    %469 = math.tanh %463 : vector<8x128xf32>
    %470 = vector.extract_strided_slice %468 {offsets = [0, 0], sizes = [8, 32], strides = [1, 1]} : vector<8x128xf32> to vector<8x32xf32>
    %471 = vector.extract_strided_slice %468 {offsets = [0, 32], sizes = [8, 32], strides = [1, 1]} : vector<8x128xf32> to vector<8x32xf32>
    %472 = vector.extract_strided_slice %469 {offsets = [0, 64], sizes = [8, 32], strides = [1, 1]} : vector<8x128xf32> to vector<8x32xf32>
    %473 = vector.extract_strided_slice %468 {offsets = [0, 96], sizes = [8, 32], strides = [1, 1]} : vector<8x128xf32> to vector<8x32xf32>
    %474 = arith.mulf %471, %457 : vector<8x32xf32>
    %475 = arith.mulf %470, %472 : vector<8x32xf32>
    %476 = arith.addf %474, %475 : vector<8x32xf32>
    %477 = math.tanh %476 : vector<8x32xf32>
    %478 = arith.mulf %473, %477 : vector<8x32xf32>
    %c56 = arith.constant 56 : index
    %c0_121 = arith.constant 0 : index
    %479 = vector.load %arg32[%c56, %c0_121] : memref<64x32xf32, #tpu.memory_space<vmem>>, vector<8x32xf32>
    tpu.vector_store %arg32[%c56, %c0_121], %478 {strides = array<i32>} : memref<64x32xf32, #tpu.memory_space<vmem>>, vector<8x32xf32>,
    %c0_122 = arith.constant 0 : index
    %c0_123 = arith.constant 0 : index
    %480 = vector.load %arg32[%c0_122, %c0_123] : memref<64x32xf32, #tpu.memory_space<vmem>>, vector<64x32xf32>
    %481 = arith.truncf %480 : vector<64x32xf32> to vector<64x32xbf16>
    %c0_124 = arith.constant 0 : index
    %c0_125 = arith.constant 0 : index
    %482 = vector.load %arg28[%c0_124, %c0_125] : memref<32x128xbf16, #tpu.memory_space<vmem>>, vector<32x128xbf16>
    %cst_126 = arith.constant dense<0.000000e+00> : vector<64x128xf32>
    %483 = tpu.matmul %481, %482, %cst_126 {dimension_numbers = #tpu.dot_dimension_numbers<[1], [0], [0], [1], [0, 0, 1, 1], [], []>} : vector<64x32xbf16>, vector<32x128xbf16>, vector<64x128xf32> -> vector<64x128xf32>
    %c0_127 = arith.constant 0 : index
    %c0_128 = arith.constant 0 : index
    %484 = vector.load %arg29[%c0_127, %c0_128] : memref<1x128xf32, #tpu.memory_space<vmem>>, vector<1x128xf32>
    %485 = vector.broadcast %484 : vector<1x128xf32> to vector<64x128xf32>
    %486 = arith.addf %483, %485 : vector<64x128xf32>
    %c0_129 = arith.constant 0 : index
    %c0_130 = arith.constant 0 : index
    %487 = vector.load %arg31[%c0_129, %c0_130] : memref<64x128xf32, #tpu.memory_space<vmem>>, vector<64x128xf32>
    tpu.vector_store %arg31[%c0_129, %c0_130], %486 {strides = array<i32>} : memref<64x128xf32, #tpu.memory_space<vmem>>, vector<64x128xf32>,
    return
  }
}

</mosaic_0001>

<bundles_post_ra>
// kernel: ensemble_forward_all.1
= control target key start
LH: loop header
LB: loop body
LE: loop exit
PB: predicated region body
PF: predicated region fallthrough
CT: control target
= control target key end

     0   :  { %v4821_v0 = vmov 0   ;;  %s4822_s6 = smov 6   ;;  %s4823_s10 = smov 8   ;;  %v155_v18 = vlaneseq  ;;  %v4824_v24 = vmov 1.0|1.0   ;;  %v4825_v30 = vmov 0.0|0.0   ;;  %s5499_s0 = inlined_call_operand.smem [shape: u32[32], index: -1, kind: input, shape index: {}] }
   0x1   :  { %4662 = vset.pattern.permute.xlu1 %v4821_v0  ;;  %4661 = vset.pattern.permute.xlu0 %v4821_v0  ;;  %s1_s5 = sld [smem:[%s5499_s0]]   ;;  %s4826_s14 = smov 9   ;;  %vm349_vm12 = vcmask 261120   ;;  %vm4827_vm13 = vmmov 0   ;;  %v4828_v43 = vmov 0.0  }
   0x2   :  { %s4875_s9 = sld [smem:[%s5499_s0 + %s4822_s6]]   ;;  %v4892_v21 = vand.u32 127, %v155_v18  ;;  %s4829_s18 = smov 10  }
   0x3   :  { %s4885_s13 = sld [smem:[%s5499_s0 + %s4823_s10]]   ;;  %s4830_s22 = smov 1  }
   0x4   :  { %s3618_s17 = sld [smem:[%s5499_s0 + %s4826_s14]]   ;;  %s4831_s26 = smov 64  }
   0x5   :  { %s3619_s21 = sld [smem:[%s5499_s0 + %s4829_s18]]   ;;  %s4832_s27 = smov 32  }
   0x6   :  { %s3610_s25 = sld [smem:[%s5499_s0 + %s4830_s22]]   ;;  %s4833_s28 = smov 3  }
   0x7   :  { %v149_v1 = vld [vmem:[%s1_s5 + $0x10] sm:$0xff]  ;;  %v147_v2 = vld [vmem:[%s1_s5] sm:$0xff]  ;;  %v150_v3 = vld [vmem:[%s1_s5 + $0x18] sm:$0xff]  ;;  %s5076_s1 = sld [smem:[%s5499_s0 + %s4833_s28]]   ;;  %s4834_s2 = smov 2  }
   0x8   :  { %164 = vperm.xlu1 %4662, %v149_v1   ;;  %158 = vperm.xlu0 %4661, %v147_v2   ;;  %v148_v4 = vld [vmem:[%s1_s5 + $0x8] sm:$0xff]  ;;  %v4663_v5 = vld [vmem:[%s4875_s9] sm:$0xff]   ;;  %v4665_v9 = vld [vmem:[%s4875_s9 + $0x10] sm:$0xff]   ;;  %s4835_s6 = smov 12   ;;  %s4836_s11 = smov 11  }
   0x9   :  { %v4664_v6 = vld [vmem:[%s4875_s9 + $0x8] sm:$0xff]   ;;  %v151_v8 = vld [vmem:[%s1_s5 + $0x20] sm:$0xff]  ;;  %3983 = vmatprep.subr.bf16.mxu0 %v4663_v5  ;;  %v154_v10 = vld [vmem:[%s1_s5 + $0x38] sm:$0xff]  ;;  %s3621_s10 = sld [smem:[%s5499_s0 + %s4835_s6]]   ;;  %s4837_s15 = smov 5  }
   0xa   :  { %v152_v7 = vld [vmem:[%s1_s5 + $0x28] sm:$0xff]  ;;  %3984 = vmatpush3.bf16.msra.mxu0 %v4663_v5  ;;  %v153_v11 = vld [vmem:[%s1_s5 + $0x30] sm:$0xff]  ;;  %v4666_v12 = vld [vmem:[%s4875_s9 + $0x18] sm:$0xff]   ;;  %s5084_s5 = sld [smem:[%s5499_s0 + %s4834_s2]]   ;;  %s4838_s19 = smov 14  }
   0xb   :  { %3985 = vmatprep.subr.bf16.mxu0 %v4664_v6  ;;  %v4667_v13 = vld [vmem:[%s4875_s9 + $0x20] sm:$0xff]   ;;  %v4668_v14 = vld [vmem:[%s4875_s9 + $0x28] sm:$0xff]   ;;  %v4669_v15 = vld [vmem:[%s4875_s9 + $0x30] sm:$0xff]   ;;  %s3620_s14 = sld [smem:[%s5499_s0 + %s4836_s11]]   ;;  %s4839_s23 = smov 16  }
   0xc   :  { %167 = vperm.xlu1 %4662, %v150_v3   ;;  %161 = vperm.xlu0 %4661, %v148_v4   ;;  %v4671_v16 = vld [vmem:[%s4885_s13] sm:$0xff]   ;;  %v4670_v17 = vld [vmem:[%s4875_s9 + $0x38] sm:$0xff]   ;;  %v4672_v29 = vld [vmem:[%s4885_s13 + $0x8] sm:$0xff]   ;;  %s3614_s18 = sld [smem:[%s5499_s0 + %s4837_s15]]   ;;  %s4840_s29 = smov 13  }
   0xd   :  { %4616 = vmatprep.subr.bf16.mxu1 %v4671_v16  ;;  %v427_v36 = vld [vmem:[%s3618_s17] sm:$0xff]  ;;  %v428_v37 = vld [vmem:[%s3618_s17 + $0x8] sm:$0xff]  ;;  %v429_v40 = vld [vmem:[%s3618_s17 + $0x10] sm:$0xff]  ;;  %s3623_s22 = sld [smem:[%s5499_s0 + %s4838_s19]]   ;;  %s4841_s3 = smov 7  }
   0xe   :  { %3986 = vmatpush3.bf16.msra.mxu0 %v4664_v6  ;;  %4618 = vmatpush3.bf16.msra.mxu1 %v4671_v16  ;;  %v4913_v39 = vpack.c.bf16 %v428_v37, %v427_v36  ;;  %v430_v41 = vld [vmem:[%s3618_s17 + $0x18] sm:$0xff]  ;;  %v3665_v50 = vld [vmem:[%s3619_s21] ss:$0 sm:$0xff]  ;;  %s5132_s28 = sld [smem:[%s5499_s0 + %s4839_s23]]   ;;  %s4843_s7 = smov 15  }
   0xf   :  { %3987 = vmatprep.subr.bf16.mxu0 %v4665_v9  ;;  %4617 = vmatprep.subr.bf16.mxu1 %v4672_v29  ;;  %v4920_v46 = vpack.c.bf16 %v430_v41, %v429_v40  ;;  %s3622_s2 = sld [smem:[%s5499_s0 + %s4840_s29]]   ;;  %s4844_s12 = smov 18  }
  0x10   :  { %173 = vperm.xlu1 %4662, %v152_v7   ;;  %170 = vperm.xlu0 %4661, %v151_v8   ;;  %v4957_v7 = vld [vmem:[%s3610_s25] sm:$0xff]  ;;  %s3616_s6 = sld [smem:[%s5499_s0 + %s4841_s3]]   ;;  %s4845_s16 = smov 4  }
  0x11   :  { %vm530_vm14 = vcmp.gt.s32.totalorder %v4957_v7, 0  ;;  %s3624_s11 = sld [smem:[%s5499_s0 + %s4843_s7]]   ;;  %s4846_s20 = smov 20  }
  0x12   :  { %3988 = vmatpush3.bf16.msra.mxu0 %v4665_v9  ;;  %4619 = vmatpush3.bf16.msra.mxu1 %v4672_v29  ;;  %v531_v9 = vsel %vm530_vm14, 1, %v4821_v0  ;;  %vm1286_vm14 = vcmp.gt.s32.totalorder %v4957_v7, 7  ;;  %s3627_s15 = sld [smem:[%s5499_s0 + %s4844_s12]]   ;;  %s4847_s24 = smov 19  }
  0x13   :  { %3989 = vmatprep.subr.bf16.mxu0 %v4666_v12  ;;  %4436 = vmatprep.subr.bf16.mxu1 %v4825_v30  ;;  %s3613_s19 = sld [smem:[%s5499_s0 + %s4845_s16]]   ;;  %s4849_s3 = smov 21  }
  0x14   :  { %179 = vperm.xlu1 %4662, %v154_v10   ;;  %176 = vperm.xlu0 %4661, %v153_v11   ;;  %s3629_s23 = sld [smem:[%s5499_s0 + %s4846_s20]]   ;;  %s4850_s7 = smov 23  }
  0x15   :  { %s3628_s29 = sld [smem:[%s5499_s0 + %s4847_s24]]   ;;  %s4851_s12 = smov 22  }
  0x16   :  { %3990 = vmatpush3.bf16.msra.mxu0 %v4666_v12  ;;  %s4852_s16 = smov 26   ;;  %s4853_s20 = smov 27  }
  0x17   :  { %3991 = vmatprep.subr.bf16.mxu0 %v4667_v13  ;;  %s4854_s24 = smov 24   ;;  %s4859_s13 = smov 17  }
  0x1a   :  { %3992 = vmatpush3.bf16.msra.mxu0 %v4667_v13 }
  0x1b   :  { %3993 = vmatprep.subr.bf16.mxu0 %v4668_v14 }
  0x1e   :  { %3994 = vmatpush3.bf16.msra.mxu0 %v4668_v14 }
  0x1f   :  { %3995 = vmatprep.subr.bf16.mxu0 %v4669_v15 }
  0x22   :  { %3996 = vmatpush3.bf16.msra.mxu0 %v4669_v15 }
  0x23   :  { %3997 = vmatprep.subr.bf16.mxu0 %v4670_v17 }
  0x26   :  { %3998 = vmatpush3.bf16.msra.mxu0 %v4670_v17 }
  0x27   :  { %4007 = vmatprep.subr.bf16.mxu0 %v4671_v16 }
  0x87   :  { %v165_v19 = vpop.permute.xlu1 %164  ;;  %v159_v20 = vpop.permute.xlu0 %158 }
  0x88   :  { %vm183_vm0 = vcmp.eq.s32.totalorder %v4892_v21, %v165_v19  ;;  %vm181_vm3 = vcmp.eq.s32.totalorder %v4892_v21, %v159_v20 }
  0x8b   :  { %v168_v22 = vpop.permute.xlu1 %167  ;;  %v162_v23 = vpop.permute.xlu0 %161 }
  0x8c   :  { %vm184_vm1 = vcmp.eq.s32.totalorder %v4892_v21, %v168_v22  ;;  %vm182_vm2 = vcmp.eq.s32.totalorder %v4892_v21, %v162_v23 }
  0x8d   :  { %vm3659_vm4 = vmpackc.low %vm184_vm1, %vm183_vm0  ;;  %vm638_vm0 = vcmp.gt.s32.totalorder %v4957_v7, 1 }
  0x8e   :  { %vm3657_vm5 = vmpackc.low %vm182_vm2, %vm181_vm3  ;;  %vm746_vm2 = vcmp.gt.s32.totalorder %v4957_v7, 2 }
  0x8f   :  { %3999 = vmatprep.mubr.msk.bf16.mxu0 %vm3657_vm5, %v4824_v24  ;;  %v174_v25 = vpop.permute.xlu1 %173  ;;  %v171_v26 = vpop.permute.xlu0 %170 }
  0x90   :  { %vm186_vm6 = vcmp.eq.s32.totalorder %v4892_v21, %v174_v25  ;;  %4000 = vmatmul.mubr.msk.bf16.vlgmr.msra.gmra.mrb[0].mxu0 %vm3659_vm4, %v4824_v24  ;;  %vm185_vm7 = vcmp.eq.s32.totalorder %v4892_v21, %v171_v26  ;;  %vm854_vm4 = vcmp.gt.s32.totalorder %v4957_v7, 3 }
  0x91   :  { %vm3661_vm8 = vmpackc.low %vm186_vm6, %vm185_vm7  ;;  %4008 = vmatpush3.bf16.msra.mxu0 %v4671_v16  ;;  %vm962_vm6 = vcmp.gt.s32.totalorder %v4957_v7, 4 }
  0x92   :  { %4003 = vmatprep.mubr.msk.bf16.mxu0 %vm3661_vm8, %v4824_v24  ;;  %4009 = vmatprep.subr.bf16.mxu0 %v4672_v29  ;;  %vm1070_vm8 = vcmp.gt.s32.totalorder %v4957_v7, 5 }
  0x93   :  { %v180_v27 = vpop.permute.xlu1 %179  ;;  %v177_v28 = vpop.permute.xlu0 %176 }
  0x94   :  { %vm188_vm9 = vcmp.eq.s32.totalorder %v4892_v21, %v180_v27  ;;  %vm187_vm10 = vcmp.eq.s32.totalorder %v4892_v21, %v177_v28 }
  0x95   :  { %vm3663_vm11 = vmpackc.low %vm188_vm9, %vm187_vm10  ;;  %4010 = vmatpush3.bf16.msra.mxu0 %v4672_v29  ;;  %vm1178_vm10 = vcmp.gt.s32.totalorder %v4957_v7, 6 }
  0x96   :  { %4454 = vmatprep.subr.bf16.mxu0 %v4825_v30 }
  0x98   :  { %4004 = vmatmul.mubr.msk.bf16.gmra.mrb[4].mxu0 %vm3663_vm11, %v4824_v24 }
 0x163   :  { %v4001_v31 = vpop.f32.mrb[0].mxu0 }
 0x164   :  { %v291_v32 = vpop.f32.mrb[1].mxu0 }
 0x165   :  { %v4002_v33 = vpop.f32.mrb[2].mxu0 }
 0x166   :  { %v323_v34 = vpack.c.bf16 %v4002_v33, %v4001_v31  ;;  %v294_v35 = vpop.f32.mrb[3].mxu0  ;;  %v639_v33 = vsel %vm638_vm0, 1, %v4821_v0 }
 0x167   :  { %v322_v38 = vpack.c.bf16 %v294_v35, %v291_v32 }
 0x169   :  { %4011 = vmatprep.mubr.msk.bf16.mxu0 %vm349_vm12, %v322_v38 }
 0x16a   :  { %4012 = vmatmul.mubr.msk.bf16.vlgmr.msra.gmra.mrb[8].mxu0 %vm349_vm12, %v323_v34 }
 0x16b   :  { %v4005_v42 = vpop.f32.mrb[4].mxu0  ;;  %4456 = vmatpush3.bf16.msra.mxu0 %v4913_v39  ;;  %4060 = vmatprep.mubr.msk.f32.mxu0 %vm4827_vm13, %v4828_v43 }
 0x16c   :  { %v307_v44 = vpop.f32.mrb[5].mxu0  ;;  %4457 = vmatprep.subr.bf16.mxu0 %v4825_v30 }
 0x16d   :  { %v4006_v45 = vpop.f32.mrb[6].mxu0 }
 0x16e   :  { %v325_v47 = vpack.c.bf16 %v4006_v45, %v4005_v42  ;;  %v310_v48 = vpop.f32.mrb[7].mxu0 }
 0x16f   :  { %v324_v49 = vpack.c.bf16 %v310_v48, %v307_v44  ;;  %4459 = vmatpush3.bf16.msra.mxu0 %v4920_v46 }
 0x170   :  { %4466 = vmatprep.subr.bf16.mxu0 %v4825_v30 }
 0x171   :  { %4015 = vmatprep.mubr.msk.bf16.mxu1 %vm349_vm12, %v324_v49 }
 0x172   :  { %4016 = vmatmul.mubr.msk.bf16.vlgmr.msra.gmra.mrb[0].mxu1 %vm349_vm12, %v325_v47 }
 0x173   :  { %4438 = vmatpush3.bf16.msra.mxu1 %v4913_v39  ;;  %4027 = vmatprep.mubr.msk.f32.mxu1 %vm4827_vm13, %v4828_v43 }
 0x174   :  { %4439 = vmatprep.subr.bf16.mxu1 %v4825_v30 }
 0x177   :  { %4441 = vmatpush3.bf16.msra.mxu1 %v4920_v46 }
 0x178   :  { %4442 = vmatprep.subr.bf16.mxu1 %v4825_v30 }
 0x17a   :  { %4028 = vmatmul.mubr.f32.vlgmr.msra.gmra.mrb[4].mxu1 %v4828_v43 }
 0x17b   :  { %4444 = vmatpush3.bf16.msra.mxu1 %v4913_v39  ;;  %4038 = vmatprep.mubr.msk.f32.mxu1 %vm4827_vm13, %v4828_v43 }
 0x17c   :  { %4445 = vmatprep.subr.bf16.mxu1 %v4825_v30 }
 0x17f   :  { %4447 = vmatpush3.bf16.msra.mxu1 %v4920_v46 }
 0x180   :  { %4448 = vmatprep.subr.bf16.mxu1 %v4825_v30 }
 0x23d   :  { %v4013_v51 = vpop.f32.mrb[8].mxu0 }
 0x23e   :  { %v4942_v52 = vadd.f32 %v4013_v51, %v3665_v50  ;;  %v396_v53 = vpop.f32.mrb[9].mxu0 }
 0x23f   :  { %v4014_v54 = vpop.f32.mrb[10].mxu0  ;;  %v397_v3 = vadd.f32 %v3665_v50, %v396_v53 }
 0x240   :  { %v4944_v55 = vadd.f32 %v4014_v54, %v3665_v50  ;;  %v399_v56 = vpop.f32.mrb[11].mxu0 }
 0x241   :  { %v400_v57 = vadd.f32 %v3665_v50, %v399_v56 }
 0x245   :  { %v4017_v58 = vpop.f32.mrb[0].mxu1 }
 0x246   :  { %v4946_v59 = vadd.f32 %v4017_v58, %v3665_v50  ;;  %v412_v60 = vpop.f32.mrb[1].mxu1 }
 0x247   :  { %v4948_v61 = vadd.f32 %v3665_v50, %v412_v60  ;;  %v4018_v62 = vpop.f32.mrb[2].mxu1  ;;  %v747_v60 = vsel %vm746_vm2, 1, %v4821_v0  ;;  %vm4842_vm2 = vmmov 1  }
 0x248   :  { %v4950_v63 = vadd.f32 %v4018_v62, %v3665_v50  ;;  %v415_v1 = vpop.f32.mrb[3].mxu1 }
 0x249   :  { %v4952_v2 = vadd.f32 %v3665_v50, %v415_v1 }
 0x24d   :  { %v501_v4 = vpop.f32.mrb[4].mxu1 }
 0x24e   :  { %v505_v5 = vadd.f32 %v501_v4, %v397_v3  ;;  %v4029_v6 = vpop.f32.mrb[5].mxu1 }
 0x250   :  { %4677 = vtanh.f32 %v505_v5  ;;  %v3672_v10 = vmul.f32 -1.442695, %v505_v5 }
 0x252   :  { %4679 = vpow2.f32 %v3672_v10 }
 0x25a   :  { %v4678_v8 = vpop.eup %4677 }
 0x25b   :  { %515 = vrot.lane.b32.xlu0 %v4678_v8, %s4831_s26 }
 0x25c   :  { %v4680_v11 = vpop.eup %4679 }
 0x25d   :  { %v509_v12 = vadd.f32 1.0, %v4680_v11 }
 0x25f   :  { %533 = vperm.xlu0 %4661, %v531_v9   ;;  %4681 = vrcp.f32 %v509_v12 }
 0x269   :  { %v4682_v13 = vpop.eup %4681 }
 0x26a   :  { %v513_v16 = vmul.f32 0.0, %v4682_v13 }
 0x2cd   :  { %v516_v14 = vpop.permute.xlu0 %515 }
 0x2ce   :  { %v518_v15 = vmul.f32 %v4682_v13, %v516_v14 }
 0x2d0   :  { %520 = vrot.lane.b32.xlu1 %v518_v15, %s4832_s27 }
 0x2de   :  { %v534_v22 = vpop.permute.xlu0 %533 }
 0x2df   :  { %vm535_vm15 = vcmp.eq.s32.totalorder %v534_v22, 1 }
 0x342   :  { %v521_v17 = vpop.permute.xlu1 %520 }
 0x343   :  { %v523_v19 = vadd.f32 %v521_v17, %v513_v16 }
 0x345   :  { %4683 = vtanh.f32 %v523_v19  ;;  %v537_v41 = vsel %vm535_vm15, %v523_v19, 0.0 }
 0x34f   :  { %v4684_v20 = vpop.eup %4683 }
 0x350   :  { %526 = vrot.lane.b32.xlu1 %v4684_v20, %s4831_s26 }
 0x3c2   :  { %v527_v23 = vpop.permute.xlu1 %526 }
 0x3c3   :  { %v529_v25 = vmul.f32 %v4682_v13, %v527_v23  ;;  %v855_v23 = vsel %vm854_vm4, 1, %v4821_v0 }
 0x3c5   :  { %v536_v26 = vsel %vm535_vm15, %v529_v25, 0.0  ;;  %vm1305_vm15 = vcmask 523264  }
 0x3c6   :  { %539 = vrot.lane.b32.xlu0 %v536_v26, %s4832_s27 }
 0x438   :  { %v540_v27 = vpop.permute.xlu0 %539 }
 0x439   :  { %4039 = vmatmul.mubr.msk.f32.vlgmr.msra.gmra.mrb[6].mxu1 %vm349_vm12, %v540_v27 }
 0x43a   :  { %4450 = vmatpush3.bf16.msra.mxu1 %v4913_v39  ;;  %4049 = vmatprep.mubr.msk.f32.mxu1 %vm4827_vm13, %v4828_v43 }
 0x43b   :  { %4451 = vmatprep.subr.bf16.mxu1 %v4825_v30 }
 0x43e   :  { %4453 = vmatpush3.bf16.msra.mxu1 %v4920_v46 }
 0x43f   :  { %4460 = vmatprep.subr.bf16.mxu1 %v4825_v30 }
 0x50c   :  { %v609_v28 = vpop.f32.mrb[6].mxu1 }
 0x50d   :  { %v613_v29 = vadd.f32 %v609_v28, %v400_v57  ;;  %v4040_v31 = vpop.f32.mrb[7].mxu1 }
 0x50f   :  { %4685 = vtanh.f32 %v613_v29  ;;  %v3674_v34 = vmul.f32 -1.442695, %v613_v29 }
 0x511   :  { %4687 = vpow2.f32 %v3674_v34 }
 0x519   :  { %v4686_v32 = vpop.eup %4685 }
 0x51a   :  { %623 = vrot.lane.b32.xlu1 %v4686_v32, %s4831_s26 }
 0x51b   :  { %v4688_v35 = vpop.eup %4687 }
 0x51c   :  { %v617_v36 = vadd.f32 1.0, %v4688_v35 }
 0x51e   :  { %641 = vperm.xlu1 %4662, %v639_v33   ;;  %4689 = vrcp.f32 %v617_v36 }
 0x528   :  { %v4690_v37 = vpop.eup %4689 }
 0x529   :  { %v621_v42 = vmul.f32 %v4690_v37, %v537_v41 }
 0x58c   :  { %v624_v38 = vpop.permute.xlu1 %623 }
 0x58d   :  { %v626_v40 = vmul.f32 %v4690_v37, %v624_v38 }
 0x58f   :  { %628 = vrot.lane.b32.xlu0 %v626_v40, %s4832_s27 }
 0x59d   :  { %v642_v48 = vpop.permute.xlu1 %641 }
 0x59e   :  { %vm643_vm1 = vcmp.eq.s32.totalorder %v642_v48, 1  ;;  %v963_v48 = vsel %vm962_vm6, 1, %v4821_v0 }
 0x601   :  { %v629_v44 = vpop.permute.xlu0 %628 }
 0x602   :  { %v631_v45 = vadd.f32 %v629_v44, %v621_v42 }
 0x604   :  { %4691 = vtanh.f32 %v631_v45 }
 0x60e   :  { %v4692_v47 = vpop.eup %4691 }
 0x60f   :  { %634 = vrot.lane.b32.xlu0 %v4692_v47, %s4831_s26 }
 0x681   :  { %v635_v49 = vpop.permute.xlu0 %634 }
 0x682   :  { %v637_v50 = vmul.f32 %v4690_v37, %v635_v49 }
 0x684   :  { %v644_v51 = vsel %vm643_vm1, %v637_v50, %v536_v26 }
 0x685   :  { %647 = vrot.lane.b32.xlu1 %v644_v51, %s4832_s27 }
 0x6f7   :  { %v648_v53 = vpop.permute.xlu1 %647 }
 0x6f8   :  { %4050 = vmatmul.mubr.msk.f32.vlgmr.msra.gmra.mrb[8].mxu1 %vm349_vm12, %v648_v53 }
 0x6f9   :  { %4462 = vmatpush3.bf16.msra.mxu1 %v4913_v39  ;;  %4071 = vmatprep.mubr.msk.f32.mxu1 %vm4827_vm13, %v4828_v43 }
 0x6fa   :  { %4463 = vmatprep.subr.bf16.mxu1 %v4825_v30 }
 0x6fd   :  { %4465 = vmatpush3.bf16.msra.mxu1 %v4920_v46 }
 0x6fe   :  { %4472 = vmatprep.subr.bf16.mxu1 %v4825_v30 }
 0x7cb   :  { %v717_v54 = vpop.f32.mrb[8].mxu1 }
 0x7cc   :  { %v721_v56 = vadd.f32 %v717_v54, %v4942_v52  ;;  %v4051_v57 = vpop.f32.mrb[9].mxu1  ;;  %v645_v52 = vsel %vm643_vm1, %v631_v45, %v537_v41  ;;  %vm1695_vm1 = vcmask 1041408  }
 0x7ce   :  { %4693 = vtanh.f32 %v721_v56  ;;  %v3676_v62 = vmul.f32 -1.442695, %v721_v56 }
 0x7d0   :  { %4695 = vpow2.f32 %v3676_v62 }
 0x7d8   :  { %v4694_v58 = vpop.eup %4693 }
 0x7d9   :  { %731 = vrot.lane.b32.xlu0 %v4694_v58, %s4831_s26 }
 0x7da   :  { %v4696_v1 = vpop.eup %4695 }
 0x7db   :  { %v725_v3 = vadd.f32 1.0, %v4696_v1 }
 0x7dd   :  { %749 = vperm.xlu0 %4661, %v747_v60   ;;  %4697 = vrcp.f32 %v725_v3 }
 0x7e7   :  { %v4698_v4 = vpop.eup %4697 }
 0x7e8   :  { %v729_v8 = vmul.f32 %v4698_v4, %v645_v52 }
 0x84b   :  { %v732_v5 = vpop.permute.xlu0 %731 }
 0x84c   :  { %v734_v6 = vmul.f32 %v4698_v4, %v732_v5 }
 0x84e   :  { %736 = vrot.lane.b32.xlu1 %v734_v6, %s4832_s27 }
 0x85c   :  { %v750_v12 = vpop.permute.xlu0 %749 }
 0x85d   :  { %vm751_vm3 = vcmp.eq.s32.totalorder %v750_v12, 1 }
 0x8c0   :  { %v737_v9 = vpop.permute.xlu1 %736 }
 0x8c1   :  { %v739_v10 = vadd.f32 %v737_v9, %v729_v8 }
 0x8c3   :  { %4699 = vtanh.f32 %v739_v10 }
 0x8cd   :  { %v4700_v11 = vpop.eup %4699 }
 0x8ce   :  { %742 = vrot.lane.b32.xlu1 %v4700_v11, %s4831_s26 }
 0x940   :  { %v743_v13 = vpop.permute.xlu1 %742 }
 0x941   :  { %v745_v14 = vmul.f32 %v4698_v4, %v743_v13 }
 0x943   :  { %v752_v15 = vsel %vm751_vm3, %v745_v14, %v644_v51 }
 0x944   :  { %755 = vrot.lane.b32.xlu0 %v752_v15, %s4832_s27 }
 0x9b6   :  { %v756_v16 = vpop.permute.xlu0 %755 }
 0x9b7   :  { %4061 = vmatmul.mubr.msk.f32.vlgmr.msra.gmra.mrb[12].mxu0 %vm349_vm12, %v756_v16 }
 0x9b8   :  { %4468 = vmatpush3.bf16.msra.mxu0 %v4913_v39  ;;  %4082 = vmatprep.mubr.msk.f32.mxu0 %vm4827_vm13, %v4828_v43 }
 0x9b9   :  { %4469 = vmatprep.subr.bf16.mxu0 %v4825_v30 }
 0x9bc   :  { %4471 = vmatpush3.bf16.msra.mxu0 %v4920_v46 }
 0x9bd   :  { %4478 = vmatprep.subr.bf16.mxu0 %v4825_v30 }
 0xa8a   :  { %v825_v17 = vpop.f32.mrb[12].mxu0 }
 0xa8b   :  { %v829_v19 = vadd.f32 %v825_v17, %v4944_v55  ;;  %v4062_v20 = vpop.f32.mrb[13].mxu0  ;;  %v753_v55 = vsel %vm751_vm3, %v739_v10, %v645_v52  ;;  %vm4531_vm3 = vmpackc.low %vm1695_vm1, %vm4842_vm2 }
 0xa8d   :  { %4701 = vtanh.f32 %v829_v19  ;;  %v3678_v25 = vmul.f32 -1.442695, %v829_v19 }
 0xa8f   :  { %4703 = vpow2.f32 %v3678_v25 }
 0xa97   :  { %v4702_v22 = vpop.eup %4701 }
 0xa98   :  { %839 = vrot.lane.b32.xlu1 %v4702_v22, %s4831_s26 }
 0xa99   :  { %v4704_v26 = vpop.eup %4703 }
 0xa9a   :  { %v833_v27 = vadd.f32 1.0, %v4704_v26 }
 0xa9c   :  { %857 = vperm.xlu1 %4662, %v855_v23   ;;  %4705 = vrcp.f32 %v833_v27 }
 0xaa6   :  { %v4706_v28 = vpop.eup %4705 }
 0xaa7   :  { %v837_v32 = vmul.f32 %v4706_v28, %v753_v55 }
 0xb0a   :  { %v840_v29 = vpop.permute.xlu1 %839 }
 0xb0b   :  { %v842_v31 = vmul.f32 %v4706_v28, %v840_v29 }
 0xb0d   :  { %844 = vrot.lane.b32.xlu0 %v842_v31, %s4832_s27 }
 0xb1b   :  { %v858_v36 = vpop.permute.xlu1 %857 }
 0xb1c   :  { %vm859_vm5 = vcmp.eq.s32.totalorder %v858_v36, 1 }
 0xb7f   :  { %v845_v33 = vpop.permute.xlu0 %844 }
 0xb80   :  { %v847_v34 = vadd.f32 %v845_v33, %v837_v32  ;;  %v1179_v32 = vsel %vm1178_vm10, 1, %v4821_v0  ;;  %vm1797_vm10 = vcmask 64512  }
 0xb82   :  { %4707 = vtanh.f32 %v847_v34 }
 0xb8c   :  { %v4708_v35 = vpop.eup %4707 }
 0xb8d   :  { %850 = vrot.lane.b32.xlu0 %v4708_v35, %s4831_s26 }
 0xbff   :  { %v851_v37 = vpop.permute.xlu0 %850 }
 0xc00   :  { %v853_v38 = vmul.f32 %v4706_v28, %v851_v37 }
 0xc02   :  { %v860_v40 = vsel %vm859_vm5, %v853_v38, %v752_v15 }
 0xc03   :  { %863 = vrot.lane.b32.xlu1 %v860_v40, %s4832_s27 }
 0xc75   :  { %v864_v41 = vpop.permute.xlu1 %863 }
 0xc76   :  { %4072 = vmatmul.mubr.msk.f32.vlgmr.msra.gmra.mrb[10].mxu1 %vm349_vm12, %v864_v41 }
 0xc77   :  { %4474 = vmatpush3.bf16.msra.mxu1 %v4913_v39  ;;  %4093 = vmatprep.mubr.msk.f32.mxu1 %vm4827_vm13, %v4828_v43 }
 0xc78   :  { %4475 = vmatprep.subr.bf16.mxu1 %v4825_v30 }
 0xc7b   :  { %4477 = vmatpush3.bf16.msra.mxu1 %v4920_v46 }
 0xc7c   :  { %4484 = vmatprep.subr.bf16.mxu1 %v4825_v30 }
 0xd49   :  { %v933_v42 = vpop.f32.mrb[10].mxu1 }
 0xd4a   :  { %v937_v44 = vadd.f32 %v933_v42, %v4948_v61  ;;  %v4073_v45 = vpop.f32.mrb[11].mxu1  ;;  %v861_v61 = vsel %vm859_vm5, %v847_v34, %v753_v55  ;;  %vm1679_vm5 = vcmask 736256  }
 0xd4c   :  { %4709 = vtanh.f32 %v937_v44  ;;  %v3680_v49 = vmul.f32 -1.442695, %v937_v44 }
 0xd4e   :  { %4711 = vpow2.f32 %v3680_v49 }
 0xd56   :  { %v4710_v47 = vpop.eup %4709 }
 0xd57   :  { %947 = vrot.lane.b32.xlu0 %v4710_v47, %s4831_s26 }
 0xd58   :  { %v4712_v50 = vpop.eup %4711 }
 0xd59   :  { %v941_v51 = vadd.f32 1.0, %v4712_v50 }
 0xd5b   :  { %965 = vperm.xlu0 %4661, %v963_v48   ;;  %4713 = vrcp.f32 %v941_v51 }
 0xd65   :  { %v4714_v53 = vpop.eup %4713 }
 0xd66   :  { %v945_v57 = vmul.f32 %v4714_v53, %v861_v61 }
 0xdc9   :  { %v948_v54 = vpop.permute.xlu0 %947 }
 0xdca   :  { %v950_v56 = vmul.f32 %v4714_v53, %v948_v54 }
 0xdcc   :  { %952 = vrot.lane.b32.xlu1 %v950_v56, %s4832_s27 }
 0xdda   :  { %v966_v1 = vpop.permute.xlu0 %965 }
 0xddb   :  { %vm967_vm7 = vcmp.eq.s32.totalorder %v966_v1, 1 }
 0xe3e   :  { %v953_v58 = vpop.permute.xlu1 %952 }
 0xe3f   :  { %v955_v60 = vadd.f32 %v953_v58, %v945_v57 }
 0xe41   :  { %4715 = vtanh.f32 %v955_v60 }
 0xe4b   :  { %v4716_v62 = vpop.eup %4715 }
 0xe4c   :  { %958 = vrot.lane.b32.xlu1 %v4716_v62, %s4831_s26 }
 0xebe   :  { %v959_v3 = vpop.permute.xlu1 %958 }
 0xebf   :  { %v961_v4 = vmul.f32 %v4714_v53, %v959_v3 }
 0xec1   :  { %v968_v5 = vsel %vm967_vm7, %v961_v4, %v860_v40 }
 0xec2   :  { %971 = vrot.lane.b32.xlu0 %v968_v5, %s4832_s27 }
 0xf34   :  { %v972_v6 = vpop.permute.xlu0 %971 }
 0xf35   :  { %4083 = vmatmul.mubr.msk.f32.vlgmr.msra.gmra.mrb[14].mxu0 %vm349_vm12, %v972_v6  ;;  %v1632_v6 = vld [vmem:[%s5076_s1] sm:$0xff] }
 0xf36   :  { %4480 = vmatpush3.bf16.msra.mxu0 %v4913_v39  ;;  %4104 = vmatprep.mubr.msk.f32.mxu0 %vm4827_vm13, %v4828_v43  ;;  %v1071_v39 = vsel %vm1070_vm8, 1, %v4821_v0 }
 0xf37   :  { %4481 = vmatprep.subr.bf16.mxu0 %v4825_v30 }
 0xf3a   :  { %4483 = vmatpush3.bf16.msra.mxu0 %v4920_v46 }
 0xf3b   :  { %4496 = vmatprep.subr.bf16.mxu0 %v4825_v30 }
0x1008   :  { %v1041_v52 = vpop.f32.mrb[14].mxu0 }
0x1009   :  { %v1045_v8 = vadd.f32 %v1041_v52, %v4952_v2  ;;  %v4084_v9 = vpop.f32.mrb[15].mxu0  ;;  %v969_v2 = vsel %vm967_vm7, %v955_v60, %v861_v61  ;;  %v1287_v61 = vsel %vm1286_vm14, 1, %v4821_v0  ;;  %v1634_v52 = vld [vmem:[%s5076_s1 + $0x10] sm:$0xff] }
0x100a   :  { %v2272_v9 = vld [vmem:[%s5084_s5 + $0x8] sm:$0xff] }
0x100b   :  { %4717 = vtanh.f32 %v1045_v8  ;;  %v3682_v11 = vmul.f32 -1.442695, %v1045_v8  ;;  %v1636_v8 = vld [vmem:[%s5076_s1 + $0x20] sm:$0xff] }
0x100d   :  { %4719 = vpow2.f32 %v3682_v11  ;;  %v2278_v11 = vld [vmem:[%s5084_s5 + $0x38] sm:$0xff] }
0x1015   :  { %v4718_v10 = vpop.eup %4717 }
0x1016   :  { %1055 = vrot.lane.b32.xlu1 %v4718_v10, %s4831_s26  ;;  %v2274_v10 = vld [vmem:[%s5084_s5 + $0x18] sm:$0xff] }
0x1017   :  { %v4720_v12 = vpop.eup %4719 }
0x1018   :  { %v1049_v13 = vadd.f32 1.0, %v4720_v12  ;;  %v1297_v12 = vld [vmem:[%s3621_s10] sm:$0xff] }
0x101a   :  { %1073 = vperm.xlu1 %4662, %v1071_v39   ;;  %4721 = vrcp.f32 %v1049_v13  ;;  %v2276_v39 = vld [vmem:[%s5084_s5 + $0x28] sm:$0xff] }
0x101b   :  { %v1298_v13 = vld [vmem:[%s3621_s10 + $0x8] sm:$0xff] }
0x1024   :  { %v4722_v46 = vpop.eup %4721 }
0x1025   :  { %v1053_v16 = vmul.f32 %v4722_v46, %v969_v2 }
0x1088   :  { %v1056_v14 = vpop.permute.xlu1 %1055 }
0x1089   :  { %v1058_v15 = vmul.f32 %v4722_v46, %v1056_v14  ;;  %v4485_v14 = vpack.c.bf16 %v1298_v13, %v1297_v12  ;;  %v1675_v12 = vld [vmem:[%s3616_s6 + $0x40] sm:$0xff]  ;;  %v1676_v13 = vld [vmem:[%s3616_s6 + $0x48] sm:$0xff] }
0x108b   :  { %1060 = vrot.lane.b32.xlu0 %v1058_v15, %s4832_s27  ;;  %v1300_v15 = vld [vmem:[%s3621_s10 + $0x18] sm:$0xff] }
0x1099   :  { %v1074_v22 = vpop.permute.xlu1 %1073 }
0x109a   :  { %vm1075_vm9 = vcmp.eq.s32.totalorder %v1074_v22, 1  ;;  %v1296_v22 = vld [vmem:[%s3620_s14 + $0x18] sm:$0xff] }
0x10fd   :  { %v1061_v17 = vpop.permute.xlu0 %1060 }
0x10fe   :  { %v1063_v19 = vadd.f32 %v1061_v17, %v1053_v16  ;;  %v1294_v16 = vld [vmem:[%s3620_s14 + $0x8] sm:$0xff] }
0x1100   :  { %4723 = vtanh.f32 %v1063_v19 }
0x110a   :  { %v4724_v20 = vpop.eup %4723 }
0x110b   :  { %1066 = vrot.lane.b32.xlu0 %v4724_v20, %s4831_s26  ;;  %v1295_v20 = vld [vmem:[%s3620_s14 + $0x10] sm:$0xff] }
0x117d   :  { %v1067_v23 = vpop.permute.xlu0 %1066 }
0x117e   :  { %v1069_v25 = vmul.f32 %v4722_v46, %v1067_v23  ;;  %v1299_v46 = vld [vmem:[%s3621_s10 + $0x10] sm:$0xff]  ;;  %v1301_v23 = vld [vmem:[%s3621_s10 + $0x20] sm:$0xff] }
0x117f   :  { %v4488_v17 = vpack.c.bf16 %v1300_v15, %v1299_v46  ;;  %v4527_v46 = vpack.c.bf16 %v1676_v13, %v1675_v12  ;;  %v1678_v15 = vld [vmem:[%s3616_s6 + $0x58] sm:$0x3] }
0x1180   :  { %v1076_v26 = vsel %vm1075_vm9, %v1069_v25, %v968_v5  ;;  %v1302_v25 = vld [vmem:[%s3621_s10 + $0x28] sm:$0xff] }
0x1181   :  { %1079 = vrot.lane.b32.xlu1 %v1076_v26, %s4832_s27 }
0x11f3   :  { %v1080_v27 = vpop.permute.xlu1 %1079 }
0x11f4   :  { %4094 = vmatmul.mubr.msk.f32.vlgmr.msra.gmra.mrb[12].mxu1 %vm349_vm12, %v1080_v27  ;;  %v4491_v27 = vpack.c.bf16 %v1302_v25, %v1301_v23 }
0x11f5   :  { %4123 = vmatprep.mubr.msk.f32.mxu1 %vm4827_vm13, %v4828_v43  ;;  %4486 = vmatpush3.bf16.msra.mxu1 %v4485_v14  ;;  %v1677_v14 = vld [vmem:[%s3616_s6 + $0x50] sm:$0xff] }
0x11f6   :  { %4487 = vmatprep.subr.bf16.mxu1 %v4825_v30 }
0x11f9   :  { %4489 = vmatpush3.bf16.msra.mxu1 %v4488_v17 }
0x11fa   :  { %4490 = vmatprep.subr.bf16.mxu1 %v4825_v30 }
0x11fd   :  { %4492 = vmatpush3.bf16.msra.mxu1 %v4491_v27 }
0x11fe   :  { %4493 = vmatprep.subr.bf16.mxu1 %v4825_v30 }
0x12c7   :  { %v1149_v28 = vpop.f32.mrb[12].mxu1 }
0x12c8   :  { %v1153_v29 = vadd.f32 %v1149_v28, %v4946_v59  ;;  %v4095_v31 = vpop.f32.mrb[13].mxu1  ;;  %v1077_v59 = vsel %vm1075_vm9, %v1063_v19, %v969_v2  ;;  %v1293_v2 = vld [vmem:[%s3620_s14] sm:$0xff]  ;;  %v1303_v28 = vld [vmem:[%s3621_s10 + $0x30] sm:$0xff] }
0x12c9   :  { %v4497_v19 = vpack.c.bf16 %v1294_v16, %v1293_v2  ;;  %v4530_v16 = vpack.c.bf16 %v1678_v15, %v1677_v14 }
0x12ca   :  { %4725 = vtanh.f32 %v1153_v29  ;;  %v3684_v33 = vmul.f32 -1.442695, %v1153_v29  ;;  %v1304_v29 = vld [vmem:[%s3621_s10 + $0x38] sm:$0xff] }
0x12cb   :  { %v4494_v31 = vpack.c.bf16 %v1304_v29, %v1303_v28  ;;  %v1550_v29 = vld [vmem:[%s5132_s28 + $0x10] sm:$0xff] }
0x12cc   :  { %4727 = vpow2.f32 %v3684_v33 }
0x12cd   :  { %4495 = vmatpush3.bf16.msra.mxu1 %v4494_v31  ;;  %v1551_v31 = vld [vmem:[%s5132_s28 + $0x18] sm:$0xff] }
0x12ce   :  { %4508 = vmatprep.subr.bf16.mxu1 %v4825_v30 }
0x12d4   :  { %v4726_v55 = vpop.eup %4725 }
0x12d5   :  { %1163 = vrot.lane.b32.xlu0 %v4726_v55, %s4831_s26  ;;  %v5105_v55 = vld [vmem:[%s3614_s18] sm:$0xff] }
0x12d6   :  { %v4728_v34 = vpop.eup %4727  ;;  %4124 = vmatmul.mubr.msk.f32.vlgmr.msra.gmra.mrb[14].mxu1 %vm1305_vm15, %v5105_v55 }
0x12d7   :  { %v1157_v35 = vadd.f32 1.0, %v4728_v34  ;;  %4156 = vmatprep.mubr.msk.f32.mxu1 %vm4827_vm13, %v4828_v43 }
0x12d9   :  { %1181 = vperm.xlu0 %4661, %v1179_v32   ;;  %4729 = vrcp.f32 %v1157_v35 }
0x12e3   :  { %v4730_v36 = vpop.eup %4729 }
0x12e4   :  { %v1161_v40 = vmul.f32 %v4730_v36, %v1077_v59 }
0x1347   :  { %v1164_v37 = vpop.permute.xlu0 %1163 }
0x1348   :  { %v1166_v38 = vmul.f32 %v4730_v36, %v1164_v37  ;;  %v1635_v37 = vld [vmem:[%s5076_s1 + $0x18] sm:$0xff] }
0x134a   :  { %1168 = vrot.lane.b32.xlu1 %v1166_v38, %s4832_s27  ;;  %v2271_v38 = vld [vmem:[%s5084_s5] sm:$0xff] }
0x1358   :  { %v1182_v45 = vpop.permute.xlu0 %1181 }
0x1359   :  { %vm1183_vm11 = vcmp.eq.s32.totalorder %v1182_v45, 1 }
0x13bc   :  { %v1169_v41 = vpop.permute.xlu1 %1168 }
0x13bd   :  { %v1171_v42 = vadd.f32 %v1169_v41, %v1161_v40  ;;  %v2275_v40 = vld [vmem:[%s5084_s5 + $0x20] sm:$0xff]  ;;  %v2277_v41 = vld [vmem:[%s5084_s5 + $0x30] sm:$0xff] }
0x13bf   :  { %4731 = vtanh.f32 %v1171_v42  ;;  %v1185_v7 = vsel %vm1183_vm11, %v1171_v42, %v1077_v59  ;;  %v2273_v59 = vld [vmem:[%s5084_s5 + $0x10] sm:$0xff] }
0x13c9   :  { %v4732_v44 = vpop.eup %4731 }
0x13ca   :  { %1174 = vrot.lane.b32.xlu1 %v4732_v44, %s4831_s26  ;;  %v1375_v44 = vpop.f32.mrb[14].mxu1 }
0x13cb   :  { %v4125_v45 = vpop.f32.mrb[15].mxu1 }
0x13cc   :  { %v1794_v45 = vld [vmem:[%s3613_s19 + $0x10] sm:$0xff] }
0x143c   :  { %v1175_v47 = vpop.permute.xlu1 %1174 }
0x143d   :  { %v1177_v48 = vmul.f32 %v4730_v36, %v1175_v47  ;;  %v1633_v36 = vld [vmem:[%s5076_s1 + $0x8] sm:$0xff]  ;;  %v1463_v47 = vld [vmem:[%s3623_s22] sm:$0xff] }
0x143f   :  { %v5056_v49 = vsel %vm1183_vm11, %v1177_v48, %v1076_v26  ;;  %v4500_v26 = vpack.c.bf16 %v1296_v22, %v1295_v20  ;;  %v1464_v48 = vld [vmem:[%s3623_s22 + $0x8] sm:$0xff]  ;;  %vm1903_vm11 = vcmask 130048  }
0x1440   :  { %1187 = vrot.lane.b32.xlu0 %v5056_v49, %s4832_s27 }
0x14b2   :  { %v1188_v50 = vpop.permute.xlu0 %1187 }
0x14b3   :  { %4105 = vmatmul.mubr.msk.f32.vlgmr.msra.gmra.mrb[16].mxu0 %vm349_vm12, %v1188_v50  ;;  %v4503_v50 = vpack.c.bf16 %v1464_v48, %v1463_v47  ;;  %v1795_v47 = vld [vmem:[%s3613_s19 + $0x18] sm:$0xff]  ;;  %v1796_v48 = vld [vmem:[%s3613_s19 + $0x20] sm:$0xff] }
0x14b4   :  { %4134 = vmatprep.mubr.msk.f32.mxu0 %vm4827_vm13, %v4828_v43  ;;  %4498 = vmatpush3.bf16.msra.mxu0 %v4497_v19 }
0x14b5   :  { %4499 = vmatprep.subr.bf16.mxu0 %v4825_v30 }
0x14b8   :  { %4501 = vmatpush3.bf16.msra.mxu0 %v4500_v26 }
0x14b9   :  { %4502 = vmatprep.subr.bf16.mxu0 %v4825_v30 }
0x1586   :  { %v1257_v51 = vpop.f32.mrb[16].mxu0 }
0x1587   :  { %v1261_v53 = vadd.f32 %v1257_v51, %v4950_v63  ;;  %v4106_v54 = vpop.f32.mrb[17].mxu0  ;;  %v1466_v51 = vld [vmem:[%s3623_s22 + $0x18] sm:$0xff] }
0x1588   :  { %v1548_v54 = vld [vmem:[%s5132_s28] sm:$0xff] }
0x1589   :  { %4733 = vtanh.f32 %v1261_v53  ;;  %v3686_v57 = vmul.f32 -1.442695, %v1261_v53 }
0x158b   :  { %4735 = vpow2.f32 %v3686_v57 }
0x1593   :  { %v4734_v56 = vpop.eup %4733 }
0x1594   :  { %1271 = vrot.lane.b32.xlu1 %v4734_v56, %s4831_s26  ;;  %v1549_v56 = vld [vmem:[%s5132_s28 + $0x8] sm:$0xff] }
0x1595   :  { %v4736_v58 = vpop.eup %4735 }
0x1596   :  { %v1265_v60 = vadd.f32 1.0, %v4736_v58  ;;  %v3689_v58 = vld [vmem:[%s3622_s2] ss:$0 sm:$0xff] }
0x1598   :  { %1289 = vperm.xlu1 %4662, %v1287_v61   ;;  %4737 = vrcp.f32 %v1265_v60  ;;  %v4509_v61 = vpack.c.bf16 %v1549_v56, %v1548_v54 }
0x159a   :  { %4510 = vmatpush3.bf16.msra.mxu1 %v4509_v61 }
0x159b   :  { %4511 = vmatprep.subr.bf16.mxu1 %v4825_v30 }
0x15a2   :  { %v5067_v62 = vpop.eup %4737 }
0x15a3   :  { %v1269_v3 = vmul.f32 %v5067_v62, %v1185_v7  ;;  %v1668_v7 = vld [vmem:[%s3616_s6 + $0x8] sm:$0xff] }
0x1606   :  { %v1272_v1 = vpop.permute.xlu1 %1271 }
0x1607   :  { %v1274_v63 = vmul.f32 %v5067_v62, %v1272_v1 }
0x1609   :  { %1276 = vrot.lane.b32.xlu0 %v1274_v63, %s4832_s27  ;;  %v1667_v63 = vld [vmem:[%s3616_s6] sm:$0xff] }
0x1617   :  { %v1290_v32 = vpop.permute.xlu1 %1289 }
0x1618   :  { %vm1291_vm0 = vcmp.eq.s32.totalorder %v1290_v32, 1  ;;  %v4512_v32 = vpack.c.bf16 %v1551_v31, %v1550_v29 }
0x161a   :  { %4513 = vmatpush3.bf16.msra.mxu1 %v4512_v32 }
0x161b   :  { %4198 = vmatprep.subr.mxu1 %v4828_v43 }
0x167b   :  { %v1277_v4 = vpop.permute.xlu0 %1276 }
0x167c   :  { %v1279_v5 = vadd.f32 %v1277_v4, %v1269_v3  ;;  %v4515_v3 = vpack.c.bf16 %v1668_v7, %v1667_v63  ;;  %v1669_v4 = vld [vmem:[%s3616_s6 + $0x10] sm:$0xff] }
0x167d   :  { %v2028_v7 = vld [vmem:[%s3629_s23 + $0x10] sm:$0xff] }
0x167e   :  { %4739 = vtanh.f32 %v1279_v5  ;;  %v1670_v5 = vld [vmem:[%s3616_s6 + $0x18] sm:$0xff] }
0x1688   :  { %v4740_v0 = vpop.eup %4739 }
0x1689   :  { %1282 = vrot.lane.b32.xlu0 %v4740_v0, %s4831_s26 }
0x168d   :  { %1638 = vperm.xlu0 %4661, %v1632_v6   ;;  %v4518_v6 = vpack.c.bf16 %v1670_v5, %v1669_v4  ;;  %v4813_v5 = vld [vmem:[%s4875_s9] sm:$0xff]  }
0x1691   :  { %1644 = vperm.xlu0 %4661, %v1634_v52   ;;  %v1671_v52 = vld [vmem:[%s3616_s6 + $0x20] sm:$0xff] }
0x1695   :  { %1650 = vperm.xlu0 %4661, %v1636_v8   ;;  %v1672_v8 = vld [vmem:[%s3616_s6 + $0x28] sm:$0xff] }
0x1699   :  { %2283 = vperm.xlu0 %4661, %v2272_v9   ;;  %v4521_v9 = vpack.c.bf16 %v1672_v8, %v1671_v52 }
0x169d   :  { %2289 = vperm.xlu0 %4661, %v2274_v10   ;;  %v1673_v10 = vld [vmem:[%s3616_s6 + $0x30] sm:$0xff] }
0x16a1   :  { %2295 = vperm.xlu0 %4661, %v2276_v39   ;;  %v1674_v39 = vld [vmem:[%s3616_s6 + $0x38] sm:$0xff]  ;;  %s3630_s6 = sld [smem:[%s5499_s0 + %s4849_s3]]   ;;  %s4856_s3 = smov 29  }
0x16a5   :  { %2301 = vperm.xlu0 %4661, %v2278_v11   ;;  %v4524_v11 = vpack.c.bf16 %v1674_v39, %v1673_v10 }
0x16fb   :  { %v1283_v33 = vpop.permute.xlu0 %1282 }
0x16fc   :  { %v1285_v34 = vmul.f32 %v5067_v62, %v1283_v33  ;;  %v3690_v33 = vld [vmem:[%s3624_s11] ss:$0 sm:$0xff]  ;;  %s5289_s11 = sld [smem:[%s5499_s0 + %s4850_s7]]   ;;  %s4857_s7 = smov 31  }
0x16fe   :  { %v1292_v35 = vsel %vm1291_vm0, %v1285_v34, %v5056_v49  ;;  %v1465_v49 = vld [vmem:[%s3623_s22 + $0x10] sm:$0xff] }
0x16ff   :  { %1380 = vrot.lane.b32.xlu1 %v1292_v35, %s4832_s27  ;;  %v4506_v53 = vpack.c.bf16 %v1466_v51, %v1465_v49 }
0x1703   :  { %1641 = vperm.xlu1 %4662, %v1633_v36  }
0x1707   :  { %1647 = vperm.xlu1 %4662, %v1635_v37  }
0x170b   :  { %2280 = vperm.xlu1 %4662, %v2271_v38   ;;  %v1791_v38 = vld [vmem:[%s3627_s15 + $0x10] sm:$0xff] }
0x170c   :  { %v1639_v2 = vpop.permute.xlu0 %1638 }
0x170d   :  { %vm1652_vm4 = vcmp.eq.s32.totalorder %v4892_v21, %v1639_v2 }
0x170e   :  { %v3694_v19 = vsel %vm1652_vm4, 1.0, %v4828_v43 }
0x170f   :  { %2286 = vperm.xlu1 %4662, %v2273_v59   ;;  %v1789_v59 = vld [vmem:[%s3627_s15] sm:$0xff] }
0x1710   :  { %v1645_v20 = vpop.permute.xlu0 %1644 }
0x1711   :  { %vm1654_vm7 = vcmp.eq.s32.totalorder %v4892_v21, %v1645_v20 }
0x1712   :  { %v3696_v25 = vsel %vm1654_vm7, 1.0, %v4828_v43 }
0x1713   :  { %2292 = vperm.xlu1 %4662, %v2275_v40   ;;  %v1790_v40 = vld [vmem:[%s3627_s15 + $0x8] sm:$0xff]  ;;  %s3631_s15 = sld [smem:[%s5499_s0 + %s4851_s12]]   ;;  %s4858_s12 = smov 108  }
0x1714   :  { %v1651_v26 = vpop.permute.xlu0 %1650 }
0x1715   :  { %vm1656_vm9 = vcmp.eq.s32.totalorder %v4892_v21, %v1651_v26 }
0x1716   :  { %v3698_v28 = vsel %vm1656_vm9, 1.0, %v4828_v43 }
0x1717   :  { %2298 = vperm.xlu1 %4662, %v2277_v41   ;;  %v1792_v41 = vld [vmem:[%s3613_s19] sm:$0xff] }
0x1771   :  { %v1381_v42 = vpop.permute.xlu1 %1380 }
0x1772   :  { %4135 = vmatmul.mubr.msk.f32.vlgmr.msra.gmra.mrb[18].mxu0 %vm349_vm12, %v1381_v42  ;;  %v4534_v42 = vpack.c.bf16 %v1790_v40, %v1789_v59  ;;  %v4815_v59 = vld [vmem:[%s4875_s9 + $0x10] sm:$0xff]  }
0x1773   :  { %4145 = vmatprep.mubr.msk.f32.mxu0 %vm4827_vm13, %v4828_v43  ;;  %4504 = vmatpush3.bf16.msra.mxu0 %v4503_v50 }
0x1774   :  { %4505 = vmatprep.subr.bf16.mxu0 %v4825_v30 }
0x1777   :  { %4507 = vmatpush3.bf16.msra.mxu0 %v4506_v53 }
0x1778   :  { %4514 = vmatprep.subr.bf16.mxu0 %v4825_v30 }
0x1782   :  { %v1642_v17 = vpop.permute.xlu1 %1641 }
0x1783   :  { %vm1653_vm6 = vcmp.eq.s32.totalorder %v4892_v21, %v1642_v17 }
0x1784   :  { %v3695_v22 = vsel %vm1653_vm6, 1.0, %v4828_v43 }
0x1786   :  { %v1648_v23 = vpop.permute.xlu1 %1647 }
0x1787   :  { %vm1655_vm8 = vcmp.eq.s32.totalorder %v4892_v21, %v1648_v23 }
0x1788   :  { %v3697_v27 = vsel %vm1655_vm8, 1.0, %v4828_v43 }
0x1845   :  { %v1450_v57 = vpop.f32.mrb[18].mxu0 }
0x1846   :  { %v1451_v60 = vadd.f32 %v1450_v57, %v1375_v44  ;;  %v4136_v62 = vpop.f32.mrb[19].mxu0  ;;  %v1793_v44 = vld [vmem:[%s3613_s19 + $0x8] sm:$0xff]  ;;  %s3635_s19 = sld [smem:[%s5499_s0 + %s4852_s16]]  }
0x1847   :  { %v2026_v62 = vld [vmem:[%s3629_s23] sm:$0xff]  ;;  %s3626_s16 = sld [smem:[%s5499_s0 + %s4859_s13]]  }
0x1848   :  { %v1461_v1 = vadd.f32 %v3689_v58, %v1451_v60 }
0x184a   :  { %4741 = vtanh.f32 %v1461_v1  ;;  %v2027_v1 = vld [vmem:[%s3629_s23 + $0x8] sm:$0xff] }
0x184b   :  { %v4537_v63 = vpack.c.bf16 %v2027_v1, %v2026_v62 }
0x1854   :  { %v5143_v0 = vpop.eup %4741 }
0x1855   :  { %4146 = vmatmul.mubr.msk.f32.vlgmr.msra.gmra.mrb[20].mxu0 %vm349_vm12, %v5143_v0 }
0x1856   :  { %4516 = vmatpush3.bf16.msra.mxu0 %v4515_v3  ;;  %4183 = vmatprep.mubr.msk.f32.mxu0 %vm4827_vm13, %v4828_v43  ;;  %v2029_v3 = vld [vmem:[%s3629_s23 + $0x18] sm:$0xff]  ;;  %s3636_s23 = sld [smem:[%s5499_s0 + %s4853_s20]]  }
0x1857   :  { %4517 = vmatprep.subr.bf16.mxu0 %v4825_v30  ;;  %v4540_v4 = vpack.c.bf16 %v2029_v3, %v2028_v7 }
0x185a   :  { %4519 = vmatpush3.bf16.msra.mxu0 %v4518_v6 }
0x185b   :  { %4520 = vmatprep.subr.bf16.mxu0 %v4825_v30 }
0x185e   :  { %4522 = vmatpush3.bf16.msra.mxu0 %v4521_v9 }
0x185f   :  { %4523 = vmatprep.subr.bf16.mxu0 %v4825_v30 }
0x1862   :  { %4525 = vmatpush3.bf16.msra.mxu0 %v4524_v11 }
0x1863   :  { %4526 = vmatprep.subr.bf16.mxu0 %v4825_v30 }
0x1866   :  { %4528 = vmatpush3.bf16.msra.mxu0 %v4527_v46 }
0x1867   :  { %4529 = vmatprep.subr.bf16.mxu0 %v4825_v30 }
0x186a   :  { %4532 = vmatpush3.bf16.msk.msra.mxu0 %vm4531_vm3, %v4530_v16  ;;  %v3715_v16 = vld [vmem:[%s3628_s29] ss:$0 sm:$0xff]  ;;  %s3633_s29 = sld [smem:[%s5499_s0 + %s4854_s24]]  }
0x186b   :  { %4536 = vmatprep.subr.bf16.mxu0 %v4825_v30 }
0x186d   :  { %4184 = vmatmul.mubr.msk.f32.vlgmr.msra.gmra.mrb[22].mxu0 %vm1679_vm5, %v3694_v19 }
0x186e   :  { %4186 = vmatprep.mubr.msk.f32.mxu0 %vm4827_vm13, %v4828_v43  ;;  %4538 = vmatpush3.bf16.msra.mxu0 %v4537_v63 }
0x186f   :  { %4539 = vmatprep.subr.bf16.mxu0 %v4825_v30 }
0x1871   :  { %4187 = vmatmul.mubr.msk.f32.gmra.mrb[24].mxu0 %vm1679_vm5, %v3695_v22 }
0x1872   :  { %4189 = vmatprep.mubr.msk.f32.mxu0 %vm4827_vm13, %v4828_v43  ;;  %4541 = vmatpush3.bf16.msra.mxu0 %v4540_v4  ;;  %v3716_v4 = vld [vmem:[%s3630_s6] ss:$0 sm:$0xff]  ;;  %s3638_s6 = sld [smem:[%s5499_s0 + %s4856_s3]]  }
0x1873   :  { %4270 = vmatprep.subr.bf16.mxu0 %v4813_v5 }
0x1875   :  { %4190 = vmatmul.mubr.msk.f32.gmra.mrb[26].mxu0 %vm1679_vm5, %v3696_v25 }
0x1876   :  { %4192 = vmatprep.mubr.msk.f32.mxu0 %vm4827_vm13, %v4828_v43 }
0x1879   :  { %4193 = vmatmul.mubr.msk.f32.gmra.mrb[28].mxu0 %vm1679_vm5, %v3697_v27 }
0x187a   :  { %4195 = vmatprep.mubr.msk.f32.mxu0 %vm4827_vm13, %v4828_v43 }
0x187d   :  { %4196 = vmatmul.mubr.msk.f32.gmra.mrb[30].mxu0 %vm1679_vm5, %v3698_v28 }
0x187e   :  { %4242 = vmatprep.mubr.msk.f32.mxu0 %vm4827_vm13, %v4828_v43 }
0x1928   :  { %v1543_v34 = vpop.f32.mrb[20].mxu0 }
0x1929   :  { %v1544_v35 = vadd.f32 %v3690_v33, %v1543_v34  ;;  %v4147_v36 = vpop.f32.mrb[21].mxu0  ;;  %v4814_v33 = vld [vmem:[%s4875_s9 + $0x8] sm:$0xff]  }
0x192b   :  { %v1547_v37 = vmax.f32 %v1544_v35, 0.0 }
0x192d   :  { %4157 = vmatmul.mubr.msk.f32.vlgmr.msra.gmra.mrb[16].mxu1 %vm349_vm12, %v1547_v37 }
0x192e   :  { %4199 = vmatpush3.msra.mxu1 %v1791_v38  ;;  %4200 = vmatprep.mubr.msk.f32.mxu1 %vm4827_vm13, %v4828_v43 }
0x192f   :  { %4533 = vmatprep.subr.bf16.mxu1 %v4825_v30 }
0x1931   :  { %4201 = vmatmul.mubr.msk.f32.vlgmr.msra.gmra.mrb[18].mxu1 %vm1797_vm10, %v1792_v41 }
0x1932   :  { %4535 = vmatpush3.bf16.msra.mxu1 %v4534_v42  ;;  %4203 = vmatprep.mubr.msk.f32.mxu1 %vm4827_vm13, %v4828_v43  ;;  %v2281_v42 = vpop.permute.xlu1 %2280 }
0x1933   :  { %4542 = vmatprep.subr.bf16.mxu1 %v4825_v30  ;;  %vm2303_vm14 = vcmp.eq.s32.totalorder %v4892_v21, %v2281_v42 }
0x1935   :  { %4204 = vmatmul.mubr.msk.f32.gmra.mrb[20].mxu1 %vm1797_vm10, %v1793_v44 }
0x1936   :  { %4206 = vmatprep.mubr.msk.f32.mxu1 %vm4827_vm13, %v4828_v43 }
0x1939   :  { %4207 = vmatmul.mubr.msk.f32.gmra.mrb[22].mxu1 %vm1797_vm10, %v1794_v45 }
0x193a   :  { %4209 = vmatprep.mubr.msk.f32.mxu1 %vm4827_vm13, %v4828_v43 }
0x193d   :  { %4210 = vmatmul.mubr.msk.f32.gmra.mrb[24].mxu1 %vm1797_vm10, %v1795_v47 }
0x193e   :  { %4212 = vmatprep.mubr.msk.f32.mxu1 %vm4827_vm13, %v4828_v43 }
0x1940   :  { %v1765_v49 = vpop.f32.mrb[22].mxu0 }
0x1941   :  { %v4185_v50 = vpop.f32.mrb[23].mxu0  ;;  %4213 = vmatmul.mubr.msk.f32.gmra.mrb[26].mxu1 %vm1797_vm10, %v1796_v48  ;;  %v4816_v48 = vld [vmem:[%s4875_s9 + $0x18] sm:$0xff]  }
0x1942   :  { %4219 = vmatprep.mubr.msk.f32.mxu1 %vm4827_vm13, %v4828_v43 }
0x1944   :  { %v1770_v51 = vpop.f32.mrb[24].mxu0 }
0x1945   :  { %v4188_v53 = vpop.f32.mrb[25].mxu0  ;;  %4220 = vmatmul.mubr.msk.f32.vlgmr.msra.gmra.mrb[28].mxu1 %vm1903_vm11, %v1765_v49  ;;  %v2284_v49 = vpop.permute.xlu0 %2283 }
0x1946   :  { %4222 = vmatprep.mubr.msk.f32.mxu1 %vm4827_vm13, %v4828_v43  ;;  %v4817_v53 = vld [vmem:[%s4875_s9 + $0x20] sm:$0xff]   ;;  %vm2304_vm0 = vcmp.eq.s32.totalorder %v4892_v21, %v2284_v49 }
0x1947   :  { %vm3737_vm1 = vmpackc.low %vm2304_vm0, %vm2303_vm14  ;;  %v2500_v49 = vld [vmem:[%s3631_s15] sm:$0xff]  ;;  %vm2243_vm0 = vcmask 162816  }
0x1948   :  { %v1775_v54 = vpop.f32.mrb[26].mxu0 }
0x1949   :  { %v4191_v56 = vpop.f32.mrb[27].mxu0  ;;  %4223 = vmatmul.mubr.msk.f32.gmra.mrb[30].mxu1 %vm1903_vm11, %v1770_v51 }
0x194a   :  { %4225 = vmatprep.mubr.msk.f32.mxu1 %vm4827_vm13, %v4828_v43  ;;  %v2287_v56 = vpop.permute.xlu1 %2286 }
0x194b   :  { %vm2305_vm2 = vcmp.eq.s32.totalorder %v4892_v21, %v2287_v56 }
0x194c   :  { %v1780_v61 = vpop.f32.mrb[28].mxu0 }
0x194d   :  { %v4194_v57 = vpop.f32.mrb[29].mxu0  ;;  %4226 = vmatmul.mubr.msk.f32.gmra.mrb[32].mxu1 %vm1903_vm11, %v1775_v54  ;;  %v4818_v54 = vld [vmem:[%s4875_s9 + $0x28] sm:$0xff]  }
0x194e   :  { %4228 = vmatprep.mubr.msk.f32.mxu1 %vm4827_vm13, %v4828_v43  ;;  %v4819_v57 = vld [vmem:[%s4875_s9 + $0x30] sm:$0xff]  }
0x1950   :  { %v1785_v58 = vpop.f32.mrb[30].mxu0 }
0x1951   :  { %v4197_v60 = vpop.f32.mrb[31].mxu0  ;;  %4229 = vmatmul.mubr.msk.f32.gmra.mrb[34].mxu1 %vm1903_vm11, %v1780_v61  ;;  %v2290_v61 = vpop.permute.xlu0 %2289 }
0x1952   :  { %4231 = vmatprep.mubr.msk.f32.mxu1 %vm4827_vm13, %v4828_v43  ;;  %v4820_v60 = vld [vmem:[%s4875_s9 + $0x38] sm:$0xff]   ;;  %vm2306_vm4 = vcmp.eq.s32.totalorder %v4892_v21, %v2290_v61  ;;  %s4848_s9 = smov 25   ;;  %v2662_v61 = vld [vmem:[%s3635_s19 + $0x8] sm:$0xff] }
0x1953   :  { %vm3739_vm6 = vmpackc.low %vm2306_vm4, %vm2305_vm2  ;;  %s5275_s2 = sld [smem:[%s5499_s0 + %s4848_s9]]   ;;  %s4855_s9 = smov 28   ;;  %vm2268_vm2 = vcmask 441344  }
0x1955   :  { %4232 = vmatmul.mubr.msk.f32.gmra.mrb[36].mxu1 %vm1903_vm11, %v1785_v58  ;;  %v2293_v58 = vpop.permute.xlu1 %2292  ;;  %v2296_v62 = vpop.permute.xlu0 %2295  ;;  %vm4544_vm11 = vmpackc.low %vm349_vm12, %vm349_vm12 }
0x1956   :  { %4267 = vmatprep.mubr.msk.f32.mxu1 %vm4827_vm13, %v4828_v43  ;;  %vm2307_vm3 = vcmp.eq.s32.totalorder %v4892_v21, %v2293_v58  ;;  %vm2308_vm5 = vcmp.eq.s32.totalorder %v4892_v21, %v2296_v62 }
0x1957   :  { %vm3741_vm7 = vmpackc.low %vm2308_vm5, %vm2307_vm3 }
0x1959   :  { %v2299_v1 = vpop.permute.xlu1 %2298  ;;  %v2302_v63 = vpop.permute.xlu0 %2301 }
0x195a   :  { %vm2309_vm8 = vcmp.eq.s32.totalorder %v4892_v21, %v2299_v1  ;;  %vm2310_vm9 = vcmp.eq.s32.totalorder %v4892_v21, %v2302_v63 }
0x195b   :  { %vm3743_vm10 = vmpackc.low %vm2310_vm9, %vm2309_vm8 }
0x1a00   :  { %v5232_v6 = vpop.f32.mrb[16].mxu1 }
0x1a01   :  { %v4158_v52 = vpop.f32.mrb[17].mxu1 }
0x1a04   :  { %v1879_v8 = vpop.f32.mrb[18].mxu1 }
0x1a05   :  { %v4202_v9 = vpop.f32.mrb[19].mxu1 }
0x1a08   :  { %v1884_v10 = vpop.f32.mrb[20].mxu1 }
0x1a09   :  { %v4205_v39 = vpop.f32.mrb[21].mxu1 }
0x1a0c   :  { %v1889_v11 = vpop.f32.mrb[22].mxu1 }
0x1a0d   :  { %v4208_v12 = vpop.f32.mrb[23].mxu1 }
0x1a10   :  { %v1894_v13 = vpop.f32.mrb[24].mxu1 }
0x1a11   :  { %v4211_v46 = vpop.f32.mrb[25].mxu1 }
0x1a14   :  { %v1899_v14 = vpop.f32.mrb[26].mxu1 }
0x1a15   :  { %v4214_v15 = vpop.f32.mrb[27].mxu1 }
0x1a18   :  { %v1985_v2 = vpop.f32.mrb[28].mxu1 }
0x1a19   :  { %v1986_v17 = vadd.f32 %v1985_v2, %v1879_v8  ;;  %v4221_v19 = vpop.f32.mrb[29].mxu1 }
0x1a1a   :  { %v4674_v19 = vld [vmem:[%s5275_s2 + $0x8] sm:$0xff]  }
0x1a1b   :  { %v2016_v20 = vadd.f32 %v3715_v16, %v1986_v17 }
0x1a1c   :  { %v1990_v22 = vpop.f32.mrb[30].mxu1 }
0x1a1d   :  { %v2021_v23 = vmax.f32 %v2016_v20, 0.0  ;;  %v1991_v25 = vadd.f32 %v1990_v22, %v1884_v10  ;;  %v4224_v26 = vpop.f32.mrb[31].mxu1 }
0x1a1f   :  { %v2017_v27 = vadd.f32 %v3715_v16, %v1991_v25  ;;  %4243 = vmatmul.mubr.msk.f32.vlgmr.msra.gmra.mrb[32].mxu0 %vm349_vm12, %v2021_v23  ;;  %v2504_v23 = vld [vmem:[%s5289_s11] sm:$0xff]  ;;  %v2505_v25 = vld [vmem:[%s5289_s11 + $0x8] sm:$0xff] }
0x1a20   :  { %4271 = vmatpush3.bf16.msra.mxu0 %v4813_v5  ;;  %v1995_v28 = vpop.f32.mrb[32].mxu1  ;;  %4245 = vmatprep.mubr.msk.f32.mxu0 %vm4827_vm13, %v4828_v43 }
0x1a21   :  { %v2022_v29 = vmax.f32 %v2017_v27, 0.0  ;;  %v1996_v31 = vadd.f32 %v1995_v28, %v1889_v11  ;;  %v4227_v32 = vpop.f32.mrb[33].mxu1  ;;  %4272 = vmatprep.subr.bf16.mxu0 %v4814_v33 }
0x1a22   :  { %v2506_v32 = vld [vmem:[%s5289_s11 + $0x10] sm:$0xff] }
0x1a23   :  { %v2018_v34 = vadd.f32 %v3715_v16, %v1996_v31  ;;  %4246 = vmatmul.mubr.msk.f32.gmra.mrb[34].mxu0 %vm349_vm12, %v2022_v29  ;;  %v4551_v31 = vpack.c.bf16 %v2505_v25, %v2504_v23 }
0x1a24   :  { %4273 = vmatpush3.bf16.msra.mxu0 %v4814_v33  ;;  %v2000_v35 = vpop.f32.mrb[34].mxu1  ;;  %4248 = vmatprep.mubr.msk.f32.mxu0 %vm4827_vm13, %v4828_v43  ;;  %v2507_v33 = vld [vmem:[%s5289_s11 + $0x18] sm:$0xff] }
0x1a25   :  { %v2023_v36 = vmax.f32 %v2018_v34, 0.0  ;;  %v2001_v37 = vadd.f32 %v2000_v35, %v1894_v13  ;;  %v4230_v38 = vpop.f32.mrb[35].mxu1  ;;  %4274 = vmatprep.subr.bf16.mxu0 %v4815_v59  ;;  %v4554_v35 = vpack.c.bf16 %v2507_v33, %v2506_v32 }
0x1a26   :  { %v2509_v38 = vld [vmem:[%s5289_s11 + $0x28] sm:$0xff] }
0x1a27   :  { %v2019_v40 = vadd.f32 %v3715_v16, %v2001_v37  ;;  %4249 = vmatmul.mubr.msk.f32.gmra.mrb[36].mxu0 %vm349_vm12, %v2023_v36  ;;  %v2508_v37 = vld [vmem:[%s5289_s11 + $0x20] sm:$0xff] }
0x1a28   :  { %4275 = vmatpush3.bf16.msra.mxu0 %v4815_v59  ;;  %v2005_v41 = vpop.f32.mrb[36].mxu1  ;;  %4251 = vmatprep.mubr.msk.f32.mxu0 %vm4827_vm13, %v4828_v43 }
0x1a29   :  { %v2024_v44 = vmax.f32 %v2019_v40, 0.0  ;;  %v2006_v45 = vadd.f32 %v2005_v41, %v1899_v14  ;;  %v4233_v47 = vpop.f32.mrb[37].mxu1  ;;  %4276 = vmatprep.subr.bf16.mxu0 %v4816_v48 }
0x1a2a   :  { %v2511_v47 = vld [vmem:[%s5289_s11 + $0x38] sm:$0xff] }
0x1a2b   :  { %v2020_v50 = vadd.f32 %v3715_v16, %v2006_v45  ;;  %4252 = vmatmul.mubr.msk.f32.gmra.mrb[38].mxu0 %vm349_vm12, %v2024_v44  ;;  %v4673_v16 = vld [vmem:[%s5275_s2] sm:$0xff]   ;;  %v4557_v44 = vpack.c.bf16 %v2509_v38, %v2508_v37  ;;  %v2510_v45 = vld [vmem:[%s5289_s11 + $0x30] sm:$0xff]  ;;  %s3637_s2 = sld [smem:[%s5499_s0 + %s4855_s9]]  }
0x1a2c   :  { %4277 = vmatpush3.bf16.msra.mxu0 %v4816_v48  ;;  %4254 = vmatprep.mubr.msk.f32.mxu0 %vm4827_vm13, %v4828_v43  ;;  %v4560_v48 = vpack.c.bf16 %v2511_v47, %v2510_v45  ;;  %s5449_s11 = sld [smem:[%s5499_s0 + %s4857_s7]]  }
0x1a2d   :  { %v2025_v51 = vmax.f32 %v2020_v50, 0.0  ;;  %4278 = vmatprep.subr.bf16.mxu0 %v4817_v53  ;;  %v2501_v50 = vld [vmem:[%s3631_s15 + $0x8] sm:$0xff] }
0x1a2f   :  { %4255 = vmatmul.mubr.msk.f32.gmra.mrb[40].mxu0 %vm349_vm12, %v2025_v51  ;;  %v4563_v51 = vpack.c.bf16 %v2501_v50, %v2500_v49 }
0x1a30   :  { %4279 = vmatpush3.bf16.msra.mxu0 %v4817_v53  ;;  %4286 = vmatprep.mubr.msk.bf16.mxu0 %vm3737_vm1, %v4824_v24  ;;  %v2502_v53 = vld [vmem:[%s3631_s15 + $0x10] sm:$0xff]  ;;  %vm2266_vm1 = vcmask 277504  }
0x1a31   :  { %4280 = vmatprep.subr.bf16.mxu0 %v4818_v54 }
0x1a34   :  { %4281 = vmatpush3.bf16.msra.mxu0 %v4818_v54  ;;  %v2503_v54 = vld [vmem:[%s3631_s15 + $0x18] sm:$0xff] }
0x1a35   :  { %4282 = vmatprep.subr.bf16.mxu0 %v4819_v57  ;;  %v4566_v56 = vpack.c.bf16 %v2503_v54, %v2502_v53 }
0x1a38   :  { %4283 = vmatpush3.bf16.msra.mxu0 %v4819_v57  ;;  %v2663_v57 = vld [vmem:[%s3635_s19 + $0x10] sm:$0xff] }
0x1a39   :  { %4284 = vmatprep.subr.bf16.mxu0 %v4820_v60 }
0x1a3c   :  { %4285 = vmatpush3.bf16.msra.mxu0 %v4820_v60  ;;  %v2664_v60 = vld [vmem:[%s3635_s19 + $0x18] sm:$0xff] }
0x1a3d   :  { %4574 = vmatprep.subr.bf16.mxu0 %v4825_v30  ;;  %v5332_v62 = vpack.c.bf16 %v2664_v60, %v2663_v57 }
0x1a3f   :  { %4287 = vmatmul.mubr.msk.bf16.vlgmr.msra.gmra.mrb[44].mxu0 %vm3739_vm6, %v4824_v24 }
0x1a40   :  { %4290 = vmatprep.mubr.msk.bf16.mxu0 %vm3741_vm7, %v4824_v24 }
0x1a47   :  { %4291 = vmatmul.mubr.msk.bf16.gmra.mrb[48].mxu0 %vm3743_vm10, %v4824_v24 }
0x1a48   :  { %4355 = vmatprep.mubr.msk.f32.mxu0 %vm4827_vm13, %v4828_v43 }
0x1af2   :  { %v2118_v7 = vpop.f32.mrb[32].mxu0 }
0x1af3   :  { %v4244_v3 = vpop.f32.mrb[33].mxu0  ;;  %v2119_v52 = vadd.f32 %v3716_v4, %v2118_v7  ;;  %v3745_v7 = vld [vmem:[%s3636_s23] ss:$0 sm:$0xff] }
0x1af6   :  { %v2123_v5 = vpop.f32.mrb[34].mxu0 }
0x1af7   :  { %v2124_v24 = vadd.f32 %v3716_v4, %v2123_v5  ;;  %v4247_v8 = vpop.f32.mrb[35].mxu0 }
0x1af9   :  { %v4543_v9 = vpack.c.bf16 %v2124_v24, %v2119_v52 }
0x1afa   :  { %v2128_v10 = vpop.f32.mrb[36].mxu0 }
0x1afb   :  { %v4250_v39 = vpop.f32.mrb[37].mxu0  ;;  %4545 = vmatpush3.bf16.xpose.msk.msra.mxu1 %vm4544_vm11, %v4543_v9  ;;  %v2129_v12 = vadd.f32 %v3716_v4, %v2128_v10 }
0x1afc   :  { %4546 = vmatprep.subr.bf16.mxu1 %v4825_v30 }
0x1afe   :  { %v2133_v11 = vpop.f32.mrb[38].mxu0 }
0x1aff   :  { %v2134_v13 = vadd.f32 %v3716_v4, %v2133_v11  ;;  %v4253_v46 = vpop.f32.mrb[39].mxu0 }
0x1b01   :  { %v4547_v14 = vpack.c.bf16 %v2134_v13, %v2129_v12 }
0x1b02   :  { %v2138_v15 = vpop.f32.mrb[40].mxu0 }
0x1b03   :  { %v4256_v2 = vpop.f32.mrb[41].mxu0  ;;  %4549 = vmatpush3.bf16.xpose.msk.msra.mxu1 %vm4544_vm11, %v4547_v14  ;;  %v2139_v17 = vadd.f32 %v3716_v4, %v2138_v15 }
0x1b04   :  { %4265 = vmatprep.subr.mxu1 %v4828_v43 }
0x1b0b   :  { %4266 = vmatpush3.xpose.msk.msra.mxu1 %vm349_vm12, %v2139_v17 }
0x1b0c   :  { %4294 = vmatprep.subr.bf16.mxu1 %v4673_v16 }
0x1b0e   :  { %4268 = vmatmul.mubr.msk.f32.vlgmr.msra.gmra.mrb[38].mxu1 %vm349_vm12, %v5143_v0 }
0x1b0f   :  { %4295 = vmatpush3.bf16.msra.mxu1 %v4673_v16 }
0x1b10   :  { %4296 = vmatprep.subr.bf16.mxu1 %v4674_v19 }
0x1b12   :  { %v4288_v20 = vpop.f32.mrb[44].mxu0 }
0x1b13   :  { %v2365_v22 = vpop.f32.mrb[45].mxu0  ;;  %4297 = vmatpush3.bf16.msra.mxu1 %v4674_v19  ;;  %v3754_v19 = vld [vmem:[%s3633_s29] ss:$0 sm:$0xff] }
0x1b14   :  { %v4289_v26 = vpop.f32.mrb[46].mxu0  ;;  %4550 = vmatprep.subr.bf16.mxu1 %v4825_v30 }
0x1b15   :  { %v2397_v27 = vpack.c.bf16 %v4289_v26, %v4288_v20  ;;  %v2368_v28 = vpop.f32.mrb[47].mxu0 }
0x1b16   :  { %v2396_v29 = vpack.c.bf16 %v2368_v28, %v2365_v22 }
0x1b18   :  { %4298 = vmatprep.mubr.msk.bf16.mxu1 %vm349_vm12, %v2396_v29 }
0x1b19   :  { %4299 = vmatmul.mubr.msk.bf16.vlgmr.msra.gmra.mrb[40].mxu1 %vm349_vm12, %v2397_v27 }
0x1b1a   :  { %4552 = vmatpush3.bf16.msra.mxu1 %v4551_v31  ;;  %v4292_v34 = vpop.f32.mrb[48].mxu0 }
0x1b1b   :  { %v2381_v36 = vpop.f32.mrb[49].mxu0  ;;  %4553 = vmatprep.subr.bf16.mxu1 %v4825_v30 }
0x1b1c   :  { %v4293_v59 = vpop.f32.mrb[50].mxu0 }
0x1b1d   :  { %v2399_v40 = vpack.c.bf16 %v4293_v59, %v4292_v34  ;;  %v2384_v41 = vpop.f32.mrb[51].mxu0 }
0x1b1e   :  { %v2398_v42 = vpack.c.bf16 %v2384_v41, %v2381_v36  ;;  %4555 = vmatpush3.bf16.msra.mxu1 %v4554_v35 }
0x1b1f   :  { %4556 = vmatprep.subr.bf16.mxu1 %v4825_v30 }
0x1b20   :  { %4302 = vmatprep.mubr.msk.bf16.mxu1 %vm349_vm12, %v2398_v42 }
0x1b21   :  { %4303 = vmatmul.mubr.msk.bf16.gmra.mrb[44].mxu1 %vm349_vm12, %v2399_v40 }
0x1b22   :  { %4558 = vmatpush3.bf16.msra.mxu1 %v4557_v44  ;;  %4322 = vmatprep.mubr.msk.f32.mxu1 %vm4827_vm13, %v4828_v43 }
0x1b23   :  { %4559 = vmatprep.subr.bf16.mxu1 %v4825_v30 }
0x1b26   :  { %4561 = vmatpush3.bf16.msra.mxu1 %v4560_v48 }
0x1b27   :  { %4562 = vmatprep.subr.bf16.mxu1 %v4825_v30 }
0x1b29   :  { %4323 = vmatmul.mubr.msk.f32.vlgmr.msra.gmra.mrb[48].mxu1 %vm1305_vm15, %v5105_v55  ;;  %v2661_v55 = vld [vmem:[%s3635_s19] sm:$0xff] }
0x1b2a   :  { %4564 = vmatpush3.bf16.msra.mxu1 %v4563_v51  ;;  %4333 = vmatprep.mubr.msk.f32.mxu1 %vm4827_vm13, %v4828_v43  ;;  %v5329_v58 = vpack.c.bf16 %v2662_v61, %v2661_v55 }
0x1b2b   :  { %4565 = vmatprep.subr.bf16.mxu1 %v4825_v30 }
0x1b2c   :  { %4576 = vmatpush3.bf16.msra.mxu0 %v5329_v58 }
0x1b2d   :  { %4577 = vmatprep.subr.bf16.mxu0 %v4825_v30 }
0x1b2e   :  { %4567 = vmatpush3.bf16.msra.mxu1 %v4566_v56 }
0x1b2f   :  { %4568 = vmatprep.subr.bf16.mxu1 %v4825_v30 }
0x1b30   :  { %4579 = vmatpush3.bf16.msra.mxu0 %v5332_v62 }
0x1b31   :  { %4334 = vmatmul.mubr.msk.f32.vlgmr.msra.gmra.mrb[50].mxu1 %vm349_vm12, %v5143_v0  ;;  %4586 = vmatprep.subr.bf16.mxu0 %v4825_v30 }
0x1b32   :  { %4344 = vmatprep.mubr.msk.f32.mxu1 %vm4827_vm13, %v4828_v43  ;;  %4570 = vmatpush3.bf16.msra.mxu1 %v5329_v58 }
0x1b33   :  { %4571 = vmatprep.subr.bf16.mxu1 %v4825_v30 }
0x1b36   :  { %4573 = vmatpush3.bf16.msra.mxu1 %v5332_v62 }
0x1b37   :  { %4580 = vmatprep.subr.bf16.mxu1 %v4825_v30 }
0x1be1   :  { %v5341_v1 = vpop.f32.mrb[38].mxu1 }
0x1be2   :  { %v4269_v63 = vpop.f32.mrb[39].mxu1 }
0x1bec   :  { %v4300_v3 = vpop.f32.mrb[40].mxu1 }
0x1bed   :  { %v5346_v4 = vadd.f32 %v4300_v3, %v3745_v7  ;;  %v2469_v5 = vpop.f32.mrb[41].mxu1 }
0x1bee   :  { %v4301_v52 = vpop.f32.mrb[42].mxu1  ;;  %v2470_v26 = vadd.f32 %v3745_v7, %v2469_v5 }
0x1bef   :  { %v5348_v24 = vadd.f32 %v4301_v52, %v3745_v7  ;;  %v2472_v8 = vpop.f32.mrb[43].mxu1 }
0x1bf0   :  { %v2473_v9 = vadd.f32 %v3745_v7, %v2472_v8 }
0x1bf4   :  { %v4304_v10 = vpop.f32.mrb[44].mxu1 }
0x1bf5   :  { %v5350_v39 = vadd.f32 %v4304_v10, %v3745_v7  ;;  %v2485_v11 = vpop.f32.mrb[45].mxu1 }
0x1bf6   :  { %v5352_v12 = vadd.f32 %v3745_v7, %v2485_v11  ;;  %v4305_v13 = vpop.f32.mrb[46].mxu1 }
0x1bf7   :  { %v5354_v46 = vadd.f32 %v4305_v13, %v3745_v7  ;;  %v2488_v14 = vpop.f32.mrb[47].mxu1 }
0x1bf8   :  { %v5356_v15 = vadd.f32 %v3745_v7, %v2488_v14 }
0x1bfc   :  { %v2578_v2 = vpop.f32.mrb[48].mxu1 }
0x1bfd   :  { %v4324_v16 = vpop.f32.mrb[49].mxu1 }
0x1c04   :  { %v2648_v17 = vpop.f32.mrb[50].mxu1 }
0x1c05   :  { %v2649_v20 = vadd.f32 %v2648_v17, %v2578_v2  ;;  %v4335_v22 = vpop.f32.mrb[51].mxu1 }
0x1c07   :  { %v2659_v23 = vadd.f32 %v3754_v19, %v2649_v20 }
0x1c09   :  { %4743 = vtanh.f32 %v2659_v23 }
0x1c13   :  { %v4744_v25 = vpop.eup %4743 }
0x1c14   :  { %4345 = vmatmul.mubr.msk.f32.vlgmr.msra.gmra.mrb[52].mxu1 %vm349_vm12, %v4744_v25 }
0x1c15   :  { %4582 = vmatpush3.bf16.msra.mxu1 %v5329_v58  ;;  %4366 = vmatprep.mubr.msk.f32.mxu1 %vm4827_vm13, %v4828_v43 }
0x1c16   :  { %4583 = vmatprep.subr.bf16.mxu1 %v4825_v30 }
0x1c19   :  { %4585 = vmatpush3.bf16.msra.mxu1 %v5332_v62 }
0x1c1a   :  { %4592 = vmatprep.subr.bf16.mxu1 %v4825_v30 }
0x1ce7   :  { %v2734_v27 = vpop.f32.mrb[52].mxu1 }
0x1ce8   :  { %v2738_v28 = vadd.f32 %v2734_v27, %v2470_v26  ;;  %v4346_v29 = vpop.f32.mrb[53].mxu1 }
0x1cea   :  { %4745 = vtanh.f32 %v2738_v28  ;;  %v3756_v32 = vmul.f32 -1.442695, %v2738_v28 }
0x1cec   :  { %4747 = vpow2.f32 %v3756_v32 }
0x1cf4   :  { %v4746_v31 = vpop.eup %4745 }
0x1cf5   :  { %2748 = vrot.lane.b32.xlu1 %v4746_v31, %s4831_s26 }
0x1cf6   :  { %v4748_v33 = vpop.eup %4747 }
0x1cf7   :  { %v2742_v34 = vadd.f32 1.0, %v4748_v33 }
0x1cf9   :  { %4749 = vrcp.f32 %v2742_v34 }
0x1d03   :  { %v4750_v35 = vpop.eup %4749 }
0x1d04   :  { %v2746_v38 = vmul.f32 0.0, %v4750_v35 }
0x1d67   :  { %v2749_v36 = vpop.permute.xlu1 %2748 }
0x1d68   :  { %v2751_v37 = vmul.f32 %v4750_v35, %v2749_v36 }
0x1d6a   :  { %2753 = vrot.lane.b32.xlu0 %v2751_v37, %s4832_s27 }
0x1ddc   :  { %v2754_v59 = vpop.permute.xlu0 %2753 }
0x1ddd   :  { %v2756_v40 = vadd.f32 %v2754_v59, %v2746_v38 }
0x1ddf   :  { %4751 = vtanh.f32 %v2756_v40 }
0x1de9   :  { %v4752_v41 = vpop.eup %4751 }
0x1dea   :  { %2759 = vrot.lane.b32.xlu1 %v4752_v41, %s4831_s26 }
0x1e5c   :  { %v2760_v42 = vpop.permute.xlu1 %2759 }
0x1e5d   :  { %v2762_v44 = vmul.f32 %v4750_v35, %v2760_v42 }
0x1e5f   :  { %2764 = vrot.lane.b32.xlu0 %v2762_v44, %s4832_s27 }
0x1ed1   :  { %v2765_v45 = vpop.permute.xlu0 %2764 }
0x1ed2   :  { %2767 = vst.msk [vmem:[#allocation2] sm:$0xff] %vm349_vm12, %v2765_v45  ;;  %4356 = vmatmul.mubr.msk.f32.vlgmr.msra.gmra.mrb[42].mxu0 %vm349_vm12, %v2765_v45 }
0x1ed3   :  { %4588 = vmatpush3.bf16.msra.mxu0 %v5329_v58  ;;  %4377 = vmatprep.mubr.msk.f32.mxu0 %vm4827_vm13, %v4828_v43 }
0x1ed4   :  { %4589 = vmatprep.subr.bf16.mxu0 %v4825_v30 }
0x1ed7   :  { %4591 = vmatpush3.bf16.msra.mxu0 %v5332_v62 }
0x1ed8   :  { %4598 = vmatprep.subr.bf16.mxu0 %v4825_v30 }
0x1fa5   :  { %v2836_v47 = vpop.f32.mrb[42].mxu0 }
0x1fa6   :  { %v2840_v48 = vadd.f32 %v2836_v47, %v2473_v9  ;;  %v4357_v49 = vpop.f32.mrb[43].mxu0 }
0x1fa8   :  { %4753 = vtanh.f32 %v2840_v48  ;;  %v3758_v51 = vmul.f32 -1.442695, %v2840_v48 }
0x1faa   :  { %4755 = vpow2.f32 %v3758_v51 }
0x1fb2   :  { %v4754_v50 = vpop.eup %4753 }
0x1fb3   :  { %2850 = vrot.lane.b32.xlu1 %v4754_v50, %s4831_s26 }
0x1fb4   :  { %v4756_v53 = vpop.eup %4755 }
0x1fb5   :  { %v2844_v54 = vadd.f32 1.0, %v4756_v53 }
0x1fb7   :  { %4757 = vrcp.f32 %v2844_v54 }
0x1fc1   :  { %v4758_v56 = vpop.eup %4757 }
0x1fc2   :  { %v2848_v57 = vmul.f32 %v4758_v56, %v2756_v40 }
0x2025   :  { %v2851_v55 = vpop.permute.xlu1 %2850 }
0x2026   :  { %v2853_v61 = vmul.f32 %v4758_v56, %v2851_v55 }
0x2028   :  { %2855 = vrot.lane.b32.xlu0 %v2853_v61, %s4832_s27 }
0x209a   :  { %v2856_v60 = vpop.permute.xlu0 %2855 }
0x209b   :  { %v2858_v63 = vadd.f32 %v2856_v60, %v2848_v57 }
0x209d   :  { %4759 = vtanh.f32 %v2858_v63 }
0x20a7   :  { %v4760_v7 = vpop.eup %4759 }
0x20a8   :  { %2861 = vrot.lane.b32.xlu1 %v4760_v7, %s4831_s26 }
0x211a   :  { %v2862_v3 = vpop.permute.xlu1 %2861 }
0x211b   :  { %v2864_v5 = vmul.f32 %v4758_v56, %v2862_v3 }
0x211d   :  { %2866 = vrot.lane.b32.xlu0 %v2864_v5, %s4832_s27 }
0x218f   :  { %v2867_v52 = vpop.permute.xlu0 %2866 }
0x2190   :  { %2869 = vst.msk [vmem:[#allocation2 + $0x8] sm:$0xff] %vm349_vm12, %v2867_v52  ;;  %4367 = vmatmul.mubr.msk.f32.vlgmr.msra.gmra.mrb[54].mxu1 %vm349_vm12, %v2867_v52 }
0x2191   :  { %4594 = vmatpush3.bf16.msra.mxu1 %v5329_v58  ;;  %4388 = vmatprep.mubr.msk.f32.mxu1 %vm4827_vm13, %v4828_v43 }
0x2192   :  { %4595 = vmatprep.subr.bf16.mxu1 %v4825_v30 }
0x2195   :  { %4597 = vmatpush3.bf16.msra.mxu1 %v5332_v62 }
0x2196   :  { %4604 = vmatprep.subr.bf16.mxu1 %v4825_v30 }
0x2263   :  { %v2938_v8 = vpop.f32.mrb[54].mxu1 }
0x2264   :  { %v2942_v9 = vadd.f32 %v2938_v8, %v5346_v4  ;;  %v4368_v10 = vpop.f32.mrb[55].mxu1 }
0x2266   :  { %4761 = vtanh.f32 %v2942_v9  ;;  %v3760_v13 = vmul.f32 -1.442695, %v2942_v9 }
0x2268   :  { %4763 = vpow2.f32 %v3760_v13 }
0x2270   :  { %v4762_v11 = vpop.eup %4761 }
0x2271   :  { %2952 = vrot.lane.b32.xlu1 %v4762_v11, %s4831_s26 }
0x2272   :  { %v4764_v14 = vpop.eup %4763 }
0x2273   :  { %v2946_v2 = vadd.f32 1.0, %v4764_v14 }
0x2275   :  { %4765 = vrcp.f32 %v2946_v2 }
0x227f   :  { %v4766_v16 = vpop.eup %4765 }
0x2280   :  { %v2950_v20 = vmul.f32 %v4766_v16, %v2858_v63 }
0x22e3   :  { %v2953_v17 = vpop.permute.xlu1 %2952 }
0x22e4   :  { %v2955_v19 = vmul.f32 %v4766_v16, %v2953_v17 }
0x22e6   :  { %2957 = vrot.lane.b32.xlu0 %v2955_v19, %s4832_s27 }
0x2358   :  { %v2958_v22 = vpop.permute.xlu0 %2957 }
0x2359   :  { %v2960_v23 = vadd.f32 %v2958_v22, %v2950_v20 }
0x235b   :  { %4767 = vtanh.f32 %v2960_v23 }
0x2365   :  { %v4768_v4 = vpop.eup %4767 }
0x2366   :  { %2963 = vrot.lane.b32.xlu1 %v4768_v4, %s4831_s26  ;;  %v3482_v4 = vld [vmem:[#allocation2] sm:$0xff] }
0x23d8   :  { %v2964_v25 = vpop.permute.xlu1 %2963 }
0x23d9   :  { %v2966_v26 = vmul.f32 %v4766_v16, %v2964_v25  ;;  %v4676_v25 = vld [vmem:[%s3637_s2 + $0x8] sm:$0xff]  }
0x23db   :  { %2968 = vrot.lane.b32.xlu0 %v2966_v26, %s4832_s27 }
0x244d   :  { %v2969_v27 = vpop.permute.xlu0 %2968 }
0x244e   :  { %2971 = vst.msk [vmem:[#allocation2 + $0x10] sm:$0xff] %vm349_vm12, %v2969_v27  ;;  %4378 = vmatmul.mubr.msk.f32.vlgmr.msra.gmra.mrb[52].mxu0 %vm349_vm12, %v2969_v27 }
0x244f   :  { %4600 = vmatpush3.bf16.msra.mxu0 %v5329_v58  ;;  %4399 = vmatprep.mubr.msk.f32.mxu0 %vm4827_vm13, %v4828_v43 }
0x2450   :  { %4601 = vmatprep.subr.bf16.mxu0 %v4825_v30 }
0x2453   :  { %4603 = vmatpush3.bf16.msra.mxu0 %v5332_v62 }
0x2454   :  { %4610 = vmatprep.subr.bf16.mxu0 %v4825_v30 }
0x2521   :  { %v3040_v28 = vpop.f32.mrb[52].mxu0 }
0x2522   :  { %v3044_v29 = vadd.f32 %v3040_v28, %v5348_v24  ;;  %v4379_v31 = vpop.f32.mrb[53].mxu0 }
0x2524   :  { %4769 = vtanh.f32 %v3044_v29  ;;  %v3762_v33 = vmul.f32 -1.442695, %v3044_v29  ;;  %v3484_v29 = vld [vmem:[#allocation2 + $0x10] sm:$0xff] }
0x2526   :  { %4771 = vpow2.f32 %v3762_v33 }
0x252e   :  { %v4770_v32 = vpop.eup %4769 }
0x252f   :  { %3054 = vrot.lane.b32.xlu1 %v4770_v32, %s4831_s26 }
0x2530   :  { %v4772_v34 = vpop.eup %4771 }
0x2531   :  { %v3048_v35 = vadd.f32 1.0, %v4772_v34 }
0x2533   :  { %4773 = vrcp.f32 %v3048_v35 }
0x253d   :  { %v4774_v36 = vpop.eup %4773 }
0x253e   :  { %v3052_v59 = vmul.f32 %v4774_v36, %v2960_v23  ;;  %v3483_v23 = vld [vmem:[#allocation2 + $0x8] sm:$0xff] }
0x253f   :  { %v3490_v27 = vpack.c.bf16 %v3483_v23, %v3482_v4 }
0x25a1   :  { %v3055_v37 = vpop.permute.xlu1 %3054 }
0x25a2   :  { %v3057_v38 = vmul.f32 %v4774_v36, %v3055_v37 }
0x25a4   :  { %3059 = vrot.lane.b32.xlu0 %v3057_v38, %s4832_s27  ;;  %v5451_v38 = vld [vmem:[%s3638_s6] ss:$0 sm:$0xff] }
0x2616   :  { %v3060_v40 = vpop.permute.xlu0 %3059 }
0x2617   :  { %v3062_v41 = vadd.f32 %v3060_v40, %v3052_v59 }
0x2619   :  { %4775 = vtanh.f32 %v3062_v41 }
0x2623   :  { %v4776_v24 = vpop.eup %4775 }
0x2624   :  { %3065 = vrot.lane.b32.xlu1 %v4776_v24, %s4831_s26 }
0x2696   :  { %v3066_v42 = vpop.permute.xlu1 %3065 }
0x2697   :  { %v3068_v44 = vmul.f32 %v4774_v36, %v3066_v42 }
0x2699   :  { %3070 = vrot.lane.b32.xlu0 %v3068_v44, %s4832_s27 }
0x270b   :  { %v3071_v45 = vpop.permute.xlu0 %3070 }
0x270c   :  { %3073 = vst.msk [vmem:[#allocation2 + $0x18] sm:$0xff] %vm349_vm12, %v3071_v45  ;;  %4389 = vmatmul.mubr.msk.f32.vlgmr.msra.gmra.mrb[56].mxu1 %vm349_vm12, %v3071_v45 }
0x270d   :  { %4606 = vmatpush3.bf16.msra.mxu1 %v5329_v58  ;;  %4410 = vmatprep.mubr.msk.f32.mxu1 %vm4827_vm13, %v4828_v43 }
0x270e   :  { %4607 = vmatprep.subr.bf16.mxu1 %v4825_v30 }
0x2711   :  { %4609 = vmatpush3.bf16.msra.mxu1 %v5332_v62 }
0x2713   :  { %v3485_v28 = vld [vmem:[#allocation2 + $0x18] sm:$0xff] }
0x2714   :  { %v3491_v31 = vpack.c.bf16 %v3485_v28, %v3484_v29 }
0x27df   :  { %v3142_v47 = vpop.f32.mrb[56].mxu1 }
0x27e0   :  { %v3146_v48 = vadd.f32 %v3142_v47, %v5352_v12  ;;  %v4390_v49 = vpop.f32.mrb[57].mxu1 }
0x27e2   :  { %4777 = vtanh.f32 %v3146_v48  ;;  %v3764_v51 = vmul.f32 -1.442695, %v3146_v48 }
0x27e4   :  { %4779 = vpow2.f32 %v3764_v51 }
0x27ec   :  { %v4778_v50 = vpop.eup %4777 }
0x27ed   :  { %3156 = vrot.lane.b32.xlu1 %v4778_v50, %s4831_s26 }
0x27ee   :  { %v4780_v53 = vpop.eup %4779 }
0x27ef   :  { %v3150_v54 = vadd.f32 1.0, %v4780_v53 }
0x27f1   :  { %4781 = vrcp.f32 %v3150_v54 }
0x27fb   :  { %v4782_v56 = vpop.eup %4781 }
0x27fc   :  { %v3154_v57 = vmul.f32 %v4782_v56, %v3062_v41 }
0x285f   :  { %v3157_v55 = vpop.permute.xlu1 %3156 }
0x2860   :  { %v3159_v61 = vmul.f32 %v4782_v56, %v3157_v55 }
0x2862   :  { %3161 = vrot.lane.b32.xlu0 %v3159_v61, %s4832_s27 }
0x28d4   :  { %v3162_v60 = vpop.permute.xlu0 %3161 }
0x28d5   :  { %v3164_v63 = vadd.f32 %v3162_v60, %v3154_v57 }
0x28d7   :  { %4783 = vtanh.f32 %v3164_v63 }
0x28e1   :  { %v4784_v12 = vpop.eup %4783 }
0x28e2   :  { %3167 = vrot.lane.b32.xlu1 %v4784_v12, %s4831_s26 }
0x2954   :  { %v3168_v7 = vpop.permute.xlu1 %3167 }
0x2955   :  { %v3170_v3 = vmul.f32 %v4782_v56, %v3168_v7 }
0x2957   :  { %3172 = vrot.lane.b32.xlu0 %v3170_v3, %s4832_s27 }
0x29c9   :  { %v3173_v5 = vpop.permute.xlu0 %3172 }
0x29ca   :  { %3175 = vst.msk [vmem:[#allocation2 + $0x20] sm:$0xff] %vm349_vm12, %v3173_v5  ;;  %4400 = vmatmul.mubr.msk.f32.vlgmr.msra.gmra.mrb[54].mxu0 %vm349_vm12, %v3173_v5 }
0x29cb   :  { %4612 = vmatpush3.bf16.msra.mxu0 %v5329_v58  ;;  %4421 = vmatprep.mubr.msk.f32.mxu0 %vm4827_vm13, %v4828_v43 }
0x29cc   :  { %4613 = vmatprep.subr.bf16.mxu0 %v4825_v30 }
0x29cf   :  { %4615 = vmatpush3.bf16.msra.mxu0 %v5332_v62 }
0x29d1   :  { %v3486_v32 = vld [vmem:[#allocation2 + $0x20] sm:$0xff] }
0x2a9d   :  { %v3244_v52 = vpop.f32.mrb[54].mxu0 }
0x2a9e   :  { %v3248_v8 = vadd.f32 %v3244_v52, %v5356_v15  ;;  %v4401_v9 = vpop.f32.mrb[55].mxu0  ;;  %v4675_v15 = vld [vmem:[%s3637_s2] sm:$0xff]  }
0x2a9f   :  { %4424 = vmatprep.subr.bf16.mxu1 %v4675_v15 }
0x2aa0   :  { %4785 = vtanh.f32 %v3248_v8  ;;  %v3766_v11 = vmul.f32 -1.442695, %v3248_v8 }
0x2aa2   :  { %4787 = vpow2.f32 %v3766_v11 }
0x2aaa   :  { %v4786_v10 = vpop.eup %4785 }
0x2aab   :  { %3258 = vrot.lane.b32.xlu1 %v4786_v10, %s4831_s26  ;;  %v2228_v10 = vshrl.u32 %v155_v18, 7 }
0x2aac   :  { %v4788_v13 = vpop.eup %4787 }
0x2aad   :  { %v3252_v14 = vadd.f32 1.0, %v4788_v13  ;;  %v2231_v13 = vadd.s32 1, %v2228_v10 }
0x2aaf   :  { %4789 = vrcp.f32 %v3252_v14  ;;  %v2229_v14 = vmul.u32 20, %v2228_v10 }
0x2ab1   :  { %vm2230_vm13 = vcmp.ge.s32.totalorder %v4892_v21, %v2229_v14 }
0x2ab9   :  { %v4790_v58 = vpop.eup %4789 }
0x2aba   :  { %v3256_v30 = vmul.f32 %v4790_v58, %v3164_v63 }
0x2b1d   :  { %v3259_v2 = vpop.permute.xlu1 %3258 }
0x2b1e   :  { %v3261_v16 = vmul.f32 %v4790_v58, %v3259_v2 }
0x2b20   :  { %3263 = vrot.lane.b32.xlu0 %v3261_v16, %s4832_s27 }
0x2b92   :  { %v3264_v62 = vpop.permute.xlu0 %3263 }
0x2b93   :  { %v3266_v17 = vadd.f32 %v3264_v62, %v3256_v30 }
0x2b95   :  { %4791 = vtanh.f32 %v3266_v17 }
0x2b9f   :  { %v4792_v19 = vpop.eup %4791 }
0x2ba0   :  { %3269 = vrot.lane.b32.xlu1 %v4792_v19, %s4831_s26 }
0x2c12   :  { %v3270_v20 = vpop.permute.xlu1 %3269 }
0x2c13   :  { %v3272_v22 = vmul.f32 %v4790_v58, %v3270_v20  ;;  %v2232_v58 = vmul.u32 20, %v2231_v13 }
0x2c15   :  { %3274 = vrot.lane.b32.xlu0 %v3272_v22, %s4832_s27  ;;  %vm2233_vm15 = vcmp.lt.s32.totalorder %v4892_v21, %v2232_v58 }
0x2c16   :  { %vm2234_vm14 = vmand %vm2230_vm13, %vm2233_vm15 }
0x2c17   :  { %v3728_v30 = vsel %vm2234_vm14, 1.0, %v4828_v43  ;;  %v3692_v43 = vld [vmem:[%s3626_s16] ss:$0 sm:$0xff] }
0x2c18   :  { %v2237_v62 = vmul.f32 %v3728_v30, %v5341_v1  ;;  %v1629_v1 = vadd.f32 %v3692_v43, %v5232_v6 }
0x2c87   :  { %v3275_v26 = vpop.permute.xlu0 %3274 }
0x2c88   :  { %3277 = vst.msk [vmem:[#allocation2 + $0x28] sm:$0xff] %vm349_vm12, %v3275_v26  ;;  %4411 = vmatmul.mubr.msk.f32.vlgmr.msra.gmra.mrb[58].mxu1 %vm349_vm12, %v3275_v26 }
0x2c89   :  { %4425 = vmatpush3.bf16.msra.mxu1 %v4675_v15  ;;  %4428 = vmatprep.mubr.msk.bf16.mxu1 %vm349_vm12, %v3490_v27 }
0x2c8a   :  { %4426 = vmatprep.subr.bf16.mxu1 %v4676_v25 }
0x2c8d   :  { %4427 = vmatpush3.bf16.msra.mxu1 %v4676_v25 }
0x2c8f   :  { %v3487_v33 = vld [vmem:[#allocation2 + $0x28] sm:$0xff] }
0x2c90   :  { %4429 = vmatmul.mubr.msk.bf16.vlgmr.msra.gmra.mrb[60].mxu1 %vm349_vm12, %v3491_v31  ;;  %v3492_v34 = vpack.c.bf16 %v3487_v33, %v3486_v32 }
0x2c92   :  { %4432 = vmatprep.mubr.msk.bf16.mxu1 %vm349_vm12, %v3492_v34 }
0x2d5b   :  { %v3346_v35 = vpop.f32.mrb[58].mxu1 }
0x2d5c   :  { %v3350_v36 = vadd.f32 %v3346_v35, %v5350_v39  ;;  %v4412_v37 = vpop.f32.mrb[59].mxu1 }
0x2d5e   :  { %4793 = vtanh.f32 %v3350_v36  ;;  %v3768_v48 = vmul.f32 -1.442695, %v3350_v36 }
0x2d60   :  { %4795 = vpow2.f32 %v3768_v48 }
0x2d63   :  { %v4430_v59 = vpop.f32.mrb[60].mxu1 }
0x2d64   :  { %v3572_v40 = vadd.f32 %v4430_v59, %v5451_v38  ;;  %v3563_v41 = vpop.f32.mrb[61].mxu1 }
0x2d65   :  { %v3564_v39 = vadd.f32 %v5451_v38, %v3563_v41  ;;  %v4431_v24 = vpop.f32.mrb[62].mxu1 }
0x2d66   :  { %3596 = vst [vmem:[%s5449_s11 + $0x10] sm:$0xff] %v3572_v40  ;;  %v3575_v42 = vadd.f32 %v4431_v24, %v5451_v38  ;;  %v3566_v44 = vpop.f32.mrb[63].mxu1 }
0x2d67   :  { %3594 = vst [vmem:[%s5449_s11] sm:$0xff] %v3564_v39  ;;  %v3567_v45 = vadd.f32 %v5451_v38, %v3566_v44 }
0x2d68   :  { %v4794_v47 = vpop.eup %4793  ;;  %3597 = vst [vmem:[%s5449_s11 + $0x18] sm:$0xff] %v3575_v42 }
0x2d69   :  { %3595 = vst [vmem:[%s5449_s11 + $0x8] sm:$0xff] %v3567_v45  ;;  %3360 = vrot.lane.b32.xlu1 %v4794_v47, %s4831_s26 }
0x2d6a   :  { %v4796_v49 = vpop.eup %4795 }
0x2d6b   :  { %v3354_v50 = vadd.f32 1.0, %v4796_v49 }
0x2d6d   :  { %4797 = vrcp.f32 %v3354_v50 }
0x2d77   :  { %v4798_v51 = vpop.eup %4797 }
0x2d78   :  { %v3358_v56 = vmul.f32 %v4798_v51, %v3266_v17 }
0x2ddb   :  { %v3361_v53 = vpop.permute.xlu1 %3360 }
0x2ddc   :  { %v3363_v54 = vmul.f32 %v4798_v51, %v3361_v53 }
0x2dde   :  { %3365 = vrot.lane.b32.xlu0 %v3363_v54, %s4832_s27 }
0x2e50   :  { %v3366_v55 = vpop.permute.xlu0 %3365 }
0x2e51   :  { %v3368_v61 = vadd.f32 %v3366_v55, %v3358_v56 }
0x2e53   :  { %4799 = vtanh.f32 %v3368_v61 }
0x2e5d   :  { %v4800_v57 = vpop.eup %4799 }
0x2e5e   :  { %3371 = vrot.lane.b32.xlu1 %v4800_v57, %s4831_s26 }
0x2ed0   :  { %v3372_v60 = vpop.permute.xlu1 %3371 }
0x2ed1   :  { %v3374_v63 = vmul.f32 %v4798_v51, %v3372_v60 }
0x2ed3   :  { %3376 = vrot.lane.b32.xlu0 %v3374_v63, %s4832_s27 }
0x2f45   :  { %v3377_v12 = vpop.permute.xlu0 %3376 }
0x2f46   :  { %3379 = vst.msk [vmem:[#allocation2 + $0x30] sm:$0xff] %vm349_vm12, %v3377_v12  ;;  %4422 = vmatmul.mubr.msk.f32.vlgmr.msra.gmra.mrb[56].mxu0 %vm349_vm12, %v3377_v12 }
0x2f4d   :  { %v3488_v32 = vld [vmem:[#allocation2 + $0x30] sm:$0xff] }
0x3019   :  { %v3448_v7 = vpop.f32.mrb[56].mxu0 }
0x301a   :  { %v3452_v3 = vadd.f32 %v3448_v7, %v5354_v46  ;;  %v4423_v5 = vpop.f32.mrb[57].mxu0 }
0x301c   :  { %4801 = vtanh.f32 %v3452_v3  ;;  %v3770_v8 = vmul.f32 -1.442695, %v3452_v3 }
0x301e   :  { %4803 = vpow2.f32 %v3770_v8 }
0x3026   :  { %v4802_v52 = vpop.eup %4801 }
0x3027   :  { %3462 = vrot.lane.b32.xlu1 %v4802_v52, %s4831_s26 }
0x3028   :  { %v4804_v9 = vpop.eup %4803 }
0x3029   :  { %v3456_v11 = vadd.f32 1.0, %v4804_v9 }
0x302b   :  { %4805 = vrcp.f32 %v3456_v11 }
0x3035   :  { %v4806_v46 = vpop.eup %4805 }
0x3036   :  { %v3460_v18 = vmul.f32 %v4806_v46, %v3368_v61 }
0x3099   :  { %v3463_v2 = vpop.permute.xlu1 %3462 }
0x309a   :  { %v3465_v16 = vmul.f32 %v4806_v46, %v3463_v2 }
0x309c   :  { %3467 = vrot.lane.b32.xlu0 %v3465_v16, %s4832_s27 }
0x30a0   :  { %2239 = vrot.lane.b32.xlu0 %v2237_v62, %s4858_s12 }
0x310e   :  { %v3468_v17 = vpop.permute.xlu0 %3467 }
0x310f   :  { %v3470_v15 = vadd.f32 %v3468_v17, %v3460_v18 }
0x3111   :  { %4807 = vtanh.f32 %v3470_v15 }
0x3112   :  { %v2240_v19 = vpop.permute.xlu0 %2239 }
0x3113   :  { %v2242_v20 = vadd.f32 %v2240_v19, %v2237_v62 }
0x3115   :  { %v2244_v21 = vsel %vm2243_vm0, %v2242_v20, -inf }
0x3116   :  { %2245 = vmax.xlane.f32.xlu0 %v2244_v21 }
0x311b   :  { %v4808_v22 = vpop.eup %4807 }
0x311c   :  { %3473 = vrot.lane.b32.xlu1 %v4808_v22, %s4831_s26  ;;  %s4860_s26 = smov 34  }
0x312c   :  { %2258 = vrot.lane.b32.xlu0 %v1629_v1, %s4832_s27 }
0x318e   :  { %v3474_v23 = vpop.permute.xlu1 %3473 }
0x318f   :  { %v3476_v4 = vmul.f32 %v4806_v46, %v3474_v23 }
0x3191   :  { %3478 = vrot.lane.b32.xlu1 %v3476_v4, %s4832_s27  ;;  %s4861_s27 = smov 30  }
0x3192   :  { %s3639_s19 = sld [smem:[%s5499_s0 + %s4861_s27]]  }
0x31a3   :  { %v2246_v25 = vpop.xlane.xlu0 %2245 }
0x31a4   :  { %v2247_v26 = vsub.f32 %v2242_v20, %v2246_v25 }
0x31a6   :  { %v2248_v27 = vmul.f32 1.442695, %v2247_v26 }
0x31a7   :  { %v2259_v40 = vpop.permute.xlu0 %2258 }
0x31a8   :  { %4809 = vpow2.f32 %v2248_v27  ;;  %v2265_v41 = vsel %vm349_vm12, %v5143_v0, %v2259_v40 }
0x31b2   :  { %v4810_v28 = vpop.eup %4809 }
0x31b3   :  { %v2250_v29 = vsel %vm2243_vm0, %v4810_v28, 0.0 }
0x31b5   :  { %2251 = vadd.xlane.f32.xlu1 %v2250_v29 }
0x3203   :  { %v3479_v31 = vpop.permute.xlu1 %3478 }
0x3204   :  { %3481 = vst.msk [vmem:[#allocation2 + $0x38] sm:$0xff] %vm349_vm12, %v3479_v31 }
0x320b   :  { %v3489_v33 = vld [vmem:[#allocation2 + $0x38] sm:$0xff] }
0x320c   :  { %v3493_v6 = vpack.c.bf16 %v3489_v33, %v3488_v32 }
0x320e   :  { %4433 = vmatmul.mubr.msk.bf16.gmra.mrb[64].mxu1 %vm349_vm12, %v3493_v6 }
0x3242   :  { %v2252_v34 = vpop.xlane.xlu1 %2251 }
0x3243   :  { %4811 = vlog2.f32 %v2252_v34 }
0x324d   :  { %v4812_v35 = vpop.eup %4811 }
0x324e   :  { %v2254_v36 = vmul.f32 0.6931472, %v4812_v35 }
0x3250   :  { %v2255_v37 = vadd.f32 %v2254_v36, %v2246_v25 }
0x3252   :  { %v2256_v59 = vsub.f32 %v2242_v20, %v2255_v37 }
0x3254   :  { %2262 = vrot.lane.b32.xlu1 %v2256_v59, %s4860_s26 }
0x32c6   :  { %v2263_v39 = vpop.permute.xlu1 %2262 }
0x32c7   :  { %v2267_v24 = vsel %vm2266_vm1, %v2265_v41, %v2263_v39 }
0x32c8   :  { %v2269_v42 = vsel %vm2268_vm2, %v2267_v24, 0.0 }
0x32c9   :  { %2270 = vst [vmem:[%s3639_s19] sm:$0xff] %v2269_v42 }
0x32e1   :  { %v4434_v44 = vpop.f32.mrb[64].mxu1 }
0x32e2   :  { %v3588_v45 = vadd.f32 %v4434_v44, %v5451_v38  ;;  %v3579_v47 = vpop.f32.mrb[65].mxu1 }
0x32e3   :  { %v3580_v48 = vadd.f32 %v5451_v38, %v3579_v47  ;;  %v4435_v49 = vpop.f32.mrb[66].mxu1 }
0x32e4   :  { %3600 = vst [vmem:[%s5449_s11 + $0x30] sm:$0xff] %v3588_v45  ;;  %v3591_v50 = vadd.f32 %v4435_v49, %v5451_v38  ;;  %v3582_v51 = vpop.f32.mrb[67].mxu1 }
0x32e5   :  { %3598 = vst [vmem:[%s5449_s11 + $0x20] sm:$0xff] %v3580_v48  ;;  %v3583_v53 = vadd.f32 %v5451_v38, %v3582_v51 }
0x32e6   :  { %3601 = vst [vmem:[%s5449_s11 + $0x38] sm:$0xff] %v3591_v50 }
0x32e7   :  { %3599 = vst [vmem:[%s5449_s11 + $0x28] sm:$0xff] %v3583_v53 }

</bundles_post_ra>
